<compile_context>
chip_gen: v7x
topology: tpu7x:2x2x1
jax: 0.10.0
libtpu: 0.0.40
codegen_flags: <defaults>
</compile_context>

<pallas_src>
import functools

import jax
import jax.numpy as jnp
from jax.experimental import pallas as pl
from jax.experimental.pallas import tpu as pltpu

EPS = 1e-5                      # nn.BatchNorm2d / nn.InstanceNorm2d default eps
LANE = 128                      # TPU lane width


def _round_up(x, m):
    return (x + m - 1) // m * m


def _pad_axis(a, target, axis):
    pad = target - a.shape[axis]
    if pad == 0:
        return a
    widths = [(0, 0)] * a.ndim
    widths[axis] = (0, pad)
    return jnp.pad(a, widths)


def _tpu_vmem_capacity():
    try:
        return int(pltpu.get_tpu_info().vmem_capacity_bytes)
    except Exception:
        return 64 * 1024 * 1024      # conservative fallback (v7x-class)


def _pick_block_h(h, w, c, target_bytes):
    # Largest divisor of h whose (block_h, w, c) f32-equivalent tile fits the
    # per-tile budget (4-byte estimate leaves ~2x headroom for bf16 storage).
    best = 1
    for d in range(1, h + 1):
        if h % d == 0 and d * w * c * 4 <= target_bytes:
            best = d
    return best


# --------------- kernel 1: conv1 (1x1) + partial IN/BN statistics ------------
def _conv1_kernel(x_ref, w_ref, y_ref, st_ref):
    x = x_ref[...]                                     # (1, Ht, W, Ci) bf16
    _, ht, w, ci = x.shape
    cp = w_ref.shape[1]
    y = jnp.dot(x.reshape(ht * w, ci), w_ref[...],
                preferred_element_type=jnp.float32)    # (Ht*W, Cp) f32
    y_ref[...] = y.reshape(1, ht, w, cp).astype(y_ref.dtype)
    st_ref[0, 0, 0:1, :] = jnp.sum(y, axis=0, keepdims=True)
    st_ref[0, 0, 1:2, :] = jnp.sum(y * y, axis=0, keepdims=True)


# -- kernel 2: IBN affine + ReLU + conv2 (3x3, 9 MXU taps) + BN2 partials -----
def _conv2_kernel(y1_ref, sc_ref, sh_ref, w_ref, y2_ref, st_ref, pad_ref):
    y1 = y1_ref[...].astype(jnp.float32)               # (1, H, W, Cp)
    _, h, w, cp = y1.shape
    sc = sc_ref[...].reshape(1, 1, 1, cp)
    sh = sh_ref[...].reshape(1, 1, 1, cp)
    h1 = jnp.maximum(y1 * sc + sh, 0.0).astype(pad_ref.dtype)

    # Halo scratch: zero only the 1-pixel border strips (cheap, megacore-safe),
    # then write the interior.  No full-tile memset per grid step.
    zrow = jnp.zeros((1, 1, w + 2, cp), pad_ref.dtype)
    zcol = jnp.zeros((1, h, 1, cp), pad_ref.dtype)
    pad_ref[:, 0:1, :, :] = zrow
    pad_ref[:, h + 1:h + 2, :, :] = zrow
    pad_ref[:, 1:h + 1, 0:1, :] = zcol
    pad_ref[:, 1:h + 1, w + 1:w + 2, :] = zcol
    pad_ref[:, 1:h + 1, 1:w + 1, :] = h1

    # 9 unrolled accumulating MXU matmuls (bf16 operands, f32 accumulation).
    # TODO(synk): sublane-misaligned dx in {0,2} tap reads could be expressed
    # via pltpu.roll (XLU slot) instead of shifted loads.
    acc = jnp.zeros((h * w, cp), jnp.float32)
    for dy in range(3):
        for dx in range(3):
            lhs = pad_ref[0, dy:dy + h, dx:dx + w, :].reshape(h * w, cp)
            acc = acc + jnp.dot(lhs, w_ref[dy, dx],
                                preferred_element_type=jnp.float32)

    y2_ref[...] = acc.reshape(1, h, w, cp).astype(y2_ref.dtype)
    st_ref[0, 0, 0:1, :] = jnp.sum(acc, axis=0, keepdims=True)
    st_ref[0, 0, 1:2, :] = jnp.sum(acc * acc, axis=0, keepdims=True)


# --------- kernel 3: BN2 affine + ReLU + conv3 (1x1) + BN3 partials ----------
def _conv3_kernel(y2_ref, sc_ref, sh_ref, w_ref, y3_ref, st_ref):
    y2 = y2_ref[...].astype(jnp.float32)               # (1, Ht, W, Cp)
    _, ht, w, cp = y2.shape
    co = w_ref.shape[1]
    sc = sc_ref[...].reshape(1, 1, 1, cp)
    sh = sh_ref[...].reshape(1, 1, 1, cp)
    h2 = jnp.maximum(y2 * sc + sh, 0.0).astype(w_ref.dtype).reshape(ht * w, cp)
    y3 = jnp.dot(h2, w_ref[...], preferred_element_type=jnp.float32)
    y3_ref[...] = y3.reshape(1, ht, w, co).astype(y3_ref.dtype)
    st_ref[0, 0, 0:1, :] = jnp.sum(y3, axis=0, keepdims=True)
    st_ref[0, 0, 1:2, :] = jnp.sum(y3 * y3, axis=0, keepdims=True)


# ----------------- kernel 4: BN3 affine + residual add + ReLU ----------------
def _bn_add_relu_kernel(y3_ref, res_ref, sc_ref, sh_ref, o_ref):
    y3 = y3_ref[...].astype(jnp.float32)               # (1, Ht, W, Co)
    co = y3.shape[-1]
    sc = sc_ref[...].reshape(1, 1, 1, co)
    sh = sh_ref[...].reshape(1, 1, 1, co)
    res = res_ref[...].astype(jnp.float32)
    o_ref[...] = jnp.maximum(y3 * sc + sh + res, 0.0).astype(o_ref.dtype)


# --------------------------------- wrapper -----------------------------------
def _scale_shift(s, q, count, gamma, beta):
    # one-pass biased variance: var = E[x^2] - E[x]^2 (f32 accumulation)
    mean = s / count
    var = jnp.maximum(q / count - mean * mean, 0.0)
    scale = gamma * jax.lax.rsqrt(var + EPS)
    shift = beta - mean * scale
    return scale, shift


@functools.partial(jax.jit, static_argnames=("ibn", "block_h"))
def bottleneck_ibn_forward(x_nchw, params, *, ibn=True, block_h=None):
    w1, g1, b1, w2, g2, b2, w3, g3, b3 = params
    n, cin, h, w = x_nchw.shape
    p = w1.shape[1]
    pout = w3.shape[1]
    assert cin == pout, "downsample=None requires inplanes == planes * expansion"
    half = p // 2 if ibn else 0

    ci = _round_up(cin, LANE)
    cp = _round_up(p, LANE)
    co = _round_up(pout, LANE)

    # Per-generation budgets: v5e/v6e (128 MiB VMEM) -> 8 MiB-class tiles,
    # 64 MiB scoped limit; v7x (64 MiB) -> 4 MiB tiles, 32 MiB limit.
    vmem_cap = _tpu_vmem_capacity()
    vmem_limit = int(min(64 * 1024 * 1024, max(vmem_cap // 2, 32 * 1024 * 1024)))
    tile_target = vmem_cap // 16

    if block_h is None:
        block_h = _pick_block_h(h, w, max(ci, cp, co), tile_target)
    assert h % block_h == 0
    gh = h // block_h

    f32 = jnp.float32
    bf16 = jnp.bfloat16

    # boundary layout plumbing: NCHW -> NHWC, pad channels, bf16 storage
    x = jnp.transpose(x_nchw, (0, 2, 3, 1)).astype(f32)
    x = _pad_axis(x, ci, 3).astype(bf16)                           # (N,H,W,Ci)

    w1p = _pad_axis(_pad_axis(w1.astype(f32), ci, 0), cp, 1).astype(bf16)   # (Ci,Cp)
    w2p = _pad_axis(_pad_axis(w2.astype(f32), cp, 2), cp, 3).astype(bf16)   # (3,3,Cp,Cp)
    w3p = _pad_axis(_pad_axis(w3.astype(f32), cp, 0), co, 1).astype(bf16)   # (Cp,Co)
    g1p = _pad_axis(g1.reshape(1, -1).astype(f32), cp, 1)
    b1p = _pad_axis(b1.reshape(1, -1).astype(f32), cp, 1)
    g2p = _pad_axis(g2.reshape(1, -1).astype(f32), cp, 1)
    b2p = _pad_axis(b2.reshape(1, -1).astype(f32), cp, 1)
    g3p = _pad_axis(g3.reshape(1, -1).astype(f32), co, 1)
    b3p = _pad_axis(b3.reshape(1, -1).astype(f32), co, 1)

    cparams2d = pltpu.CompilerParams(
        dimension_semantics=("parallel", "parallel"),
        vmem_limit_bytes=vmem_limit)
    cparams1d = pltpu.CompilerParams(
        dimension_semantics=("parallel",),
        vmem_limit_bytes=vmem_limit)

    # ---------------- stage 1: conv1 + partial IN/BN statistics --------------
    y1, st1 = pl.pallas_call(
        _conv1_kernel,
        out_shape=(jax.ShapeDtypeStruct((n, h, w, cp), bf16),
                   jax.ShapeDtypeStruct((n, gh, 2, cp), f32)),
        grid=(n, gh),
        in_specs=[pl.BlockSpec((1, block_h, w, ci), lambda i, j: (i, j, 0, 0)),
                  pl.BlockSpec((ci, cp), lambda i, j: (0, 0))],
        out_specs=(pl.BlockSpec((1, block_h, w, cp), lambda i, j: (i, j, 0, 0)),
                   pl.BlockSpec((1, 1, 2, cp), lambda i, j: (i, j, 0, 0))),
        compiler_params=cparams2d,
        cost_estimate=pl.CostEstimate(
            flops=2 * n * h * w * ci * cp, transcendentals=0,
            bytes_accessed=2 * (n * h * w * (ci + cp) + ci * cp)),
    )(x, w1p)

    # host side (tiny): fold IN (per-sample) / BN (batch) stats + affine into a
    # single per-(sample, channel) scale/shift; selection happens on the stats.
    s_n = jnp.sum(st1[:, :, 0, :], axis=1)                         # (N, Cp)
    q_n = jnp.sum(st1[:, :, 1, :], axis=1)
    sc_in, sh_in = _scale_shift(s_n, q_n, h * w, g1p, b1p)         # (N, Cp)
    sc_bn, sh_bn = _scale_shift(jnp.sum(s_n, 0, keepdims=True),
                                jnp.sum(q_n, 0, keepdims=True),
                                n * h * w, g1p, b1p)               # (1, Cp)
    is_in = jnp.arange(cp) < half
    scale1 = jnp.where(is_in, sc_in, sc_bn).reshape(n, 1, cp)
    shift1 = jnp.where(is_in, sh_in, sh_bn).reshape(n, 1, cp)

    # ------- stage 2: IBN+ReLU + conv2 (3x3, 9 MXU taps) + BN2 partials ------
    y2, st2 = pl.pallas_call(
        _conv2_kernel,
        out_shape=(jax.ShapeDtypeStruct((n, h, w, cp), bf16),
                   jax.ShapeDtypeStruct((n, 1, 2, cp), f32)),
        grid=(n,),
        in_specs=[pl.BlockSpec((1, h, w, cp), lambda i: (i, 0, 0, 0)),
                  pl.BlockSpec((1, 1, cp), lambda i: (i, 0, 0)),
                  pl.BlockSpec((1, 1, cp), lambda i: (i, 0, 0)),
                  pl.BlockSpec((3, 3, cp, cp), lambda i: (0, 0, 0, 0))],
        out_specs=(pl.BlockSpec((1, h, w, cp), lambda i: (i, 0, 0, 0)),
                   pl.BlockSpec((1, 1, 2, cp), lambda i: (i, 0, 0, 0))),
        scratch_shapes=[pltpu.VMEM((1, h + 2, w + 2, cp), bf16)],
        compiler_params=cparams1d,
        cost_estimate=pl.CostEstimate(
            flops=2 * n * h * w * 9 * cp * cp, transcendentals=0,
            bytes_accessed=2 * (2 * n * h * w * cp + 9 * cp * cp)),
    )(y1, scale1, shift1, w2p)

    s2 = jnp.sum(st2[:, :, 0, :], axis=(0, 1))
    q2 = jnp.sum(st2[:, :, 1, :], axis=(0, 1))
    scale2, shift2 = _scale_shift(s2, q2, n * h * w, g2p, b2p)
    scale2 = scale2.reshape(1, 1, cp)
    shift2 = shift2.reshape(1, 1, cp)

    # --------- stage 3: BN2+ReLU + conv3 (1x1) + partial BN3 stats -----------
    y3, st3 = pl.pallas_call(
        _conv3_kernel,
        out_shape=(jax.ShapeDtypeStruct((n, h, w, co), bf16),
                   jax.ShapeDtypeStruct((n, gh, 2, co), f32)),
        grid=(n, gh),
        in_specs=[pl.BlockSpec((1, block_h, w, cp), lambda i, j: (i, j, 0, 0)),
                  pl.BlockSpec((1, 1, cp), lambda i, j: (0, 0, 0)),
                  pl.BlockSpec((1, 1, cp), lambda i, j: (0, 0, 0)),
                  pl.BlockSpec((cp, co), lambda i, j: (0, 0))],
        out_specs=(pl.BlockSpec((1, block_h, w, co), lambda i, j: (i, j, 0, 0)),
                   pl.BlockSpec((1, 1, 2, co), lambda i, j: (i, j, 0, 0))),
        compiler_params=cparams2d,
        cost_estimate=pl.CostEstimate(
            flops=2 * n * h * w * cp * co, transcendentals=0,
            bytes_accessed=2 * (n * h * w * (cp + co) + cp * co)),
    )(y2, scale2, shift2, w3p)

    s3 = jnp.sum(st3[:, :, 0, :], axis=(0, 1))
    q3 = jnp.sum(st3[:, :, 1, :], axis=(0, 1))
    scale3, shift3 = _scale_shift(s3, q3, n * h * w, g3p, b3p)
    scale3 = scale3.reshape(1, 1, co)
    shift3 = shift3.reshape(1, 1, co)

    # ------ stage 4: BN3 + residual add + ReLU (aliases residual buffer) -----
    out = pl.pallas_call(
        _bn_add_relu_kernel,
        out_shape=jax.ShapeDtypeStruct((n, h, w, co), bf16),
        grid=(n, gh),
        in_specs=[pl.BlockSpec((1, block_h, w, co), lambda i, j: (i, j, 0, 0)),
                  pl.BlockSpec((1, block_h, w, co), lambda i, j: (i, j, 0, 0)),
                  pl.BlockSpec((1, 1, co), lambda i, j: (0, 0, 0)),
                  pl.BlockSpec((1, 1, co), lambda i, j: (0, 0, 0))],
        out_specs=pl.BlockSpec((1, block_h, w, co), lambda i, j: (i, j, 0, 0)),
        input_output_aliases={1: 0},
        compiler_params=cparams2d,
        cost_estimate=pl.CostEstimate(
            flops=3 * n * h * w * co, transcendentals=0,
            bytes_accessed=2 * 3 * n * h * w * co),
    )(y3, x, scale3, shift3)

    out = out[:, :, :, :pout]
    return jnp.transpose(out, (0, 3, 1, 2)).astype(f32)  # NHWC -> NCHW, f32


# ---------------- pure-JAX reference (for correctness check) ----------------
def ref_forward(x_nchw, params, *, ibn=True):
    w1, g1, b1, w2, g2, b2, w3, g3, b3 = params
    x = jnp.transpose(x_nchw, (0, 2, 3, 1)).astype(jnp.float32)
    p = w1.shape[1]
    half = p // 2 if ibn else 0

    def bn(y, gamma, beta):
        mean = jnp.mean(y, axis=(0, 1, 2))
        var = jnp.var(y, axis=(0, 1, 2))
        return (y - mean) * jax.lax.rsqrt(var + EPS) * gamma + beta

    y = jnp.einsum('nhwc,cp->nhwp', x, w1)
    if half > 0:
        y1, y2 = y[..., :half], y[..., half:]
        m1 = jnp.mean(y1, axis=(1, 2), keepdims=True)
        v1 = jnp.var(y1, axis=(1, 2), keepdims=True)
        n1 = (y1 - m1) * jax.lax.rsqrt(v1 + EPS) * g1[0, :half] + b1[0, :half]
        m2 = jnp.mean(y2, axis=(0, 1, 2))
        v2 = jnp.var(y2, axis=(0, 1, 2))
        n2 = (y2 - m2) * jax.lax.rsqrt(v2 + EPS) * g1[0, half:] + b1[0, half:]
        y = jnp.concatenate([n1, n2], axis=-1)
    else:
        y = bn(y, g1[0], b1[0])
    h1 = jax.nn.relu(y)

    h2 = jax.lax.conv_general_dilated(h1, w2, (1, 1), 'SAME',
                                      dimension_numbers=('NHWC', 'HWIO', 'NHWC'))
    h2 = jax.nn.relu(bn(h2, g2[0], b2[0]))

    y3 = jnp.einsum('nhwc,cp->nhwp', h2, w3)
    out = jax.nn.relu(bn(y3, g3[0], b3[0]) + x)
    return jnp.transpose(out, (0, 3, 1, 2))


if __name__ == "__main__":
    # Small shapes consistent with the module: inplanes = planes * expansion (=4)
    N, inplanes, planes, H, W = 2, 32, 8, 16, 16
    pout = planes * 4

    key = jax.random.PRNGKey(0)
    ks = jax.random.split(key, 10)
    x = jax.random.normal(ks[0], (N, inplanes, H, W), jnp.float32)        # NCHW input
    # Conv weights as (Cin, Cout) for 1x1 and HWIO for 3x3 (synthetic init).
    w1 = jax.random.normal(ks[1], (inplanes, planes), jnp.float32) / jnp.sqrt(inplanes)
    w2 = jax.random.normal(ks[2], (3, 3, planes, planes), jnp.float32) / jnp.sqrt(9.0 * planes)
    w3 = jax.random.normal(ks[3], (planes, pout), jnp.float32) / jnp.sqrt(planes)
    # Affine params: g1/b1 concatenate IN-half and BN-half affine parameters.
    g1 = 1.0 + 0.1 * jax.random.normal(ks[4], (1, planes), jnp.float32)
    b1 = 0.1 * jax.random.normal(ks[5], (1, planes), jnp.float32)
    g2 = 1.0 + 0.1 * jax.random.normal(ks[6], (1, planes), jnp.float32)
    b2 = 0.1 * jax.random.normal(ks[7], (1, planes), jnp.float32)
    g3 = 1.0 + 0.1 * jax.random.normal(ks[8], (1, pout), jnp.float32)
    b3 = 0.1 * jax.random.normal(ks[9], (1, pout), jnp.float32)
    params = (w1, g1, b1, w2, g2, b2, w3, g3, b3)

    # block_h=8 exercises the multi-tile (N x H-tiles) grid + partial-stat path.
    out = jax.block_until_ready(
        bottleneck_ibn_forward(x, params, ibn=True, block_h=8))
    ref = jax.block_until_ready(ref_forward(x, params, ibn=True))
    assert out.shape == (N, pout, H, W)
    # bf16 intermediate storage -> ~1e-2-class relative error vs f32 reference.
    if not jnp.allclose(out, ref, atol=5e-2, rtol=5e-2):
        raise AssertionError(f"mismatch: max abs diff {jnp.max(jnp.abs(out - ref))}")
    print("KERNEL_OK")
</pallas_src>

<mosaic_0001>
module attributes {stable_mosaic.version = 11 : i64} {
  func.func @_conv1_kernel(%arg0: i32, %arg1: i32, %arg2: memref<1x8x16x128xbf16, #tpu.memory_space<vmem>>, %arg3: memref<128x128xbf16, #tpu.memory_space<vmem>>, %arg4: memref<1x8x16x128xbf16, #tpu.memory_space<vmem>>, %arg5: memref<1x1x2x128xf32, #tpu.memory_space<vmem>>) attributes {dimension_semantics = [#tpu.dimension_semantics<parallel>, #tpu.dimension_semantics<parallel>], iteration_bounds = array<i64: 2, 2>, scalar_prefetch = 0 : i64, scratch_operands = 0 : i64, tpu.core_type = #tpu.core_type<tc>, window_params = [{transform_indices = @transform_0, window_bounds = array<i64: 1, 8, 16, 128>}, {pipeline_mode = #tpu.pipeline_mode<synchronous>, transform_indices = @transform_1, window_bounds = array<i64: 128, 128>}, {transform_indices = @transform_2, window_bounds = array<i64: 1, 8, 16, 128>}, {transform_indices = @transform_3, window_bounds = array<i64: 1, 1, 2, 128>}]} {
    %c0 = arith.constant 0 : index
    %c0_0 = arith.constant 0 : index
    %c0_1 = arith.constant 0 : index
    %c0_2 = arith.constant 0 : index
    %0 = vector.load %arg2[%c0, %c0_0, %c0_1, %c0_2] : memref<1x8x16x128xbf16, #tpu.memory_space<vmem>>, vector<1x8x16x128xbf16>
    %1 = vector.shape_cast %0 : vector<1x8x16x128xbf16> to vector<128x128xbf16>
    %c0_3 = arith.constant 0 : index
    %c0_4 = arith.constant 0 : index
    %2 = vector.load %arg3[%c0_3, %c0_4] : memref<128x128xbf16, #tpu.memory_space<vmem>>, vector<128x128xbf16>
    %cst = arith.constant dense<0.000000e+00> : vector<128x128xf32>
    %3 = tpu.matmul %1, %2, %cst {dimension_numbers = #tpu.dot_dimension_numbers<[1], [0], [0], [1], [0, 0, 1, 1], [], []>} : vector<128x128xbf16>, vector<128x128xbf16>, vector<128x128xf32> -> vector<128x128xf32>
    %4 = vector.shape_cast %3 : vector<128x128xf32> to vector<1x8x16x128xf32>
    %5 = arith.truncf %4 : vector<1x8x16x128xf32> to vector<1x8x16x128xbf16>
    %c0_5 = arith.constant 0 : index
    %c0_6 = arith.constant 0 : index
    %c0_7 = arith.constant 0 : index
    %c0_8 = arith.constant 0 : index
    %6 = vector.load %arg4[%c0_5, %c0_6, %c0_7, %c0_8] : memref<1x8x16x128xbf16, #tpu.memory_space<vmem>>, vector<1x8x16x128xbf16>
    tpu.vector_store %arg4[%c0_5, %c0_6, %c0_7, %c0_8], %5 {strides = array<i32>} : memref<1x8x16x128xbf16, #tpu.memory_space<vmem>>, vector<1x8x16x128xbf16>,
    %cst_9 = arith.constant dense<0.000000e+00> : vector<128xf32>
    %7 = vector.multi_reduction <add>, %3, %cst_9 [0] : vector<128x128xf32> to vector<128xf32>
    %8 = vector.shape_cast %7 : vector<128xf32> to vector<1x128xf32>
    %c0_10 = arith.constant 0 : index
    %c0_11 = arith.constant 0 : index
    %c0_12 = arith.constant 0 : index
    %c0_13 = arith.constant 0 : index
    %9 = vector.load %arg5[%c0_10, %c0_11, %c0_12, %c0_13] : memref<1x1x2x128xf32, #tpu.memory_space<vmem>>, vector<1x1x1x128xf32>
    %10 = vector.shape_cast %9 : vector<1x1x1x128xf32> to vector<1x128xf32>
    %11 = vector.shape_cast %8 : vector<1x128xf32> to vector<1x1x1x128xf32>
    tpu.vector_store %arg5[%c0_10, %c0_11, %c0_12, %c0_13], %11 {strides = array<i32>} : memref<1x1x2x128xf32, #tpu.memory_space<vmem>>, vector<1x1x1x128xf32>,
    %12 = arith.mulf %3, %3 : vector<128x128xf32>
    %cst_14 = arith.constant dense<0.000000e+00> : vector<128xf32>
    %13 = vector.multi_reduction <add>, %12, %cst_14 [0] : vector<128x128xf32> to vector<128xf32>
    %14 = vector.shape_cast %13 : vector<128xf32> to vector<1x128xf32>
    %c0_15 = arith.constant 0 : index
    %c0_16 = arith.constant 0 : index
    %c1 = arith.constant 1 : index
    %c0_17 = arith.constant 0 : index
    %15 = vector.load %arg5[%c0_15, %c0_16, %c1, %c0_17] : memref<1x1x2x128xf32, #tpu.memory_space<vmem>>, vector<1x1x1x128xf32>
    %16 = vector.shape_cast %15 : vector<1x1x1x128xf32> to vector<1x128xf32>
    %17 = vector.shape_cast %14 : vector<1x128xf32> to vector<1x1x1x128xf32>
    tpu.vector_store %arg5[%c0_15, %c0_16, %c1, %c0_17], %17 {strides = array<i32>} : memref<1x1x2x128xf32, #tpu.memory_space<vmem>>, vector<1x1x1x128xf32>,
    return
  }
  func.func @transform_0(%arg0: i32, %arg1: i32) -> (i32, i32, i32, i32) {
    %c0_i32 = arith.constant 0 : i32
    %c0_i32_0 = arith.constant 0 : i32
    %c0_i32_1 = arith.constant 0 : i32
    return %arg0, %arg1, %c0_i32, %c0_i32_0 : i32, i32, i32, i32
  }
  func.func @transform_1(%arg0: i32, %arg1: i32) -> (i32, i32) {
    %c0_i32 = arith.constant 0 : i32
    %c0_i32_0 = arith.constant 0 : i32
    %c0_i32_1 = arith.constant 0 : i32
    return %c0_i32, %c0_i32_0 : i32, i32
  }
  func.func @transform_2(%arg0: i32, %arg1: i32) -> (i32, i32, i32, i32) {
    %c0_i32 = arith.constant 0 : i32
    %c0_i32_0 = arith.constant 0 : i32
    %c0_i32_1 = arith.constant 0 : i32
    return %arg0, %arg1, %c0_i32, %c0_i32_0 : i32, i32, i32, i32
  }
  func.func @transform_3(%arg0: i32, %arg1: i32) -> (i32, i32, i32, i32) {
    %c0_i32 = arith.constant 0 : i32
    %c0_i32_0 = arith.constant 0 : i32
    %c0_i32_1 = arith.constant 0 : i32
    return %arg0, %arg1, %c0_i32, %c0_i32_0 : i32, i32, i32, i32
  }
}

module attributes {stable_mosaic.version = 11 : i64} {
  func.func @_conv2_kernel(%arg0: i32, %arg1: memref<1x16x16x128xbf16, #tpu.memory_space<vmem>>, %arg2: memref<1x1x128xf32, #tpu.memory_space<vmem>>, %arg3: memref<1x1x128xf32, #tpu.memory_space<vmem>>, %arg4: memref<3x3x128x128xbf16, #tpu.memory_space<vmem>>, %arg5: memref<1x16x16x128xbf16, #tpu.memory_space<vmem>>, %arg6: memref<1x1x2x128xf32, #tpu.memory_space<vmem>>, %arg7: memref<1x18x18x128xbf16, #tpu.memory_space<vmem>>) attributes {dimension_semantics = [#tpu.dimension_semantics<parallel>], iteration_bounds = array<i64: 2>, scalar_prefetch = 0 : i64, scratch_operands = 1 : i64, tpu.core_type = #tpu.core_type<tc>, window_params = [{transform_indices = @transform_0, window_bounds = array<i64: 1, 16, 16, 128>}, {transform_indices = @transform_1, window_bounds = array<i64: 1, 1, 128>}, {transform_indices = @transform_2, window_bounds = array<i64: 1, 1, 128>}, {pipeline_mode = #tpu.pipeline_mode<synchronous>, transform_indices = @transform_3, window_bounds = array<i64: 3, 3, 128, 128>}, {transform_indices = @transform_4, window_bounds = array<i64: 1, 16, 16, 128>}, {transform_indices = @transform_5, window_bounds = array<i64: 1, 1, 2, 128>}]} {
    %c0 = arith.constant 0 : index
    %c0_0 = arith.constant 0 : index
    %c0_1 = arith.constant 0 : index
    %c0_2 = arith.constant 0 : index
    %0 = vector.load %arg1[%c0, %c0_0, %c0_1, %c0_2] : memref<1x16x16x128xbf16, #tpu.memory_space<vmem>>, vector<1x16x16x128xbf16>
    %1 = arith.extf %0 : vector<1x16x16x128xbf16> to vector<1x16x16x128xf32>
    %c0_3 = arith.constant 0 : index
    %c0_4 = arith.constant 0 : index
    %c0_5 = arith.constant 0 : index
    %2 = vector.load %arg2[%c0_3, %c0_4, %c0_5] : memref<1x1x128xf32, #tpu.memory_space<vmem>>, vector<1x1x128xf32>
    %3 = vector.shape_cast %2 : vector<1x1x128xf32> to vector<1x1x1x128xf32>
    %c0_6 = arith.constant 0 : index
    %c0_7 = arith.constant 0 : index
    %c0_8 = arith.constant 0 : index
    %4 = vector.load %arg3[%c0_6, %c0_7, %c0_8] : memref<1x1x128xf32, #tpu.memory_space<vmem>>, vector<1x1x128xf32>
    %5 = vector.shape_cast %4 : vector<1x1x128xf32> to vector<1x1x1x128xf32>
    %6 = vector.broadcast %3 : vector<1x1x1x128xf32> to vector<1x16x16x128xf32>
    %7 = arith.mulf %1, %6 : vector<1x16x16x128xf32>
    %8 = vector.broadcast %5 : vector<1x1x1x128xf32> to vector<1x16x16x128xf32>
    %9 = arith.addf %7, %8 : vector<1x16x16x128xf32>
    %cst = arith.constant 0.000000e+00 : f32
    %10 = vector.broadcast %cst : f32 to vector<1x16x16x128xf32>
    %11 = arith.maximumf %9, %10 : vector<1x16x16x128xf32>
    %12 = arith.truncf %11 : vector<1x16x16x128xf32> to vector<1x16x16x128xbf16>
    %cst_9 = arith.constant 0.000000e+00 : bf16
    %13 = vector.broadcast %cst_9 : bf16 to vector<1x1x18x128xbf16>
    %cst_10 = arith.constant 0.000000e+00 : bf16
    %14 = vector.broadcast %cst_10 : bf16 to vector<1x16x1x128xbf16>
    %c0_11 = arith.constant 0 : index
    %c0_12 = arith.constant 0 : index
    %c0_13 = arith.constant 0 : index
    %c0_14 = arith.constant 0 : index
    %15 = vector.load %arg7[%c0_11, %c0_12, %c0_13, %c0_14] : memref<1x18x18x128xbf16, #tpu.memory_space<vmem>>, vector<1x1x18x128xbf16>
    tpu.vector_store %arg7[%c0_11, %c0_12, %c0_13, %c0_14], %13 {strides = array<i32>} : memref<1x18x18x128xbf16, #tpu.memory_space<vmem>>, vector<1x1x18x128xbf16>,
    %c0_15 = arith.constant 0 : index
    %c17 = arith.constant 17 : index
    %c0_16 = arith.constant 0 : index
    %c0_17 = arith.constant 0 : index
    %16 = vector.load %arg7[%c0_15, %c17, %c0_16, %c0_17] : memref<1x18x18x128xbf16, #tpu.memory_space<vmem>>, vector<1x1x18x128xbf16>
    tpu.vector_store %arg7[%c0_15, %c17, %c0_16, %c0_17], %13 {strides = array<i32>} : memref<1x18x18x128xbf16, #tpu.memory_space<vmem>>, vector<1x1x18x128xbf16>,
    %c0_18 = arith.constant 0 : index
    %c1 = arith.constant 1 : index
    %c0_19 = arith.constant 0 : index
    %c0_20 = arith.constant 0 : index
    %17 = vector.load %arg7[%c0_18, %c1, %c0_19, %c0_20] : memref<1x18x18x128xbf16, #tpu.memory_space<vmem>>, vector<1x16x1x128xbf16>
    tpu.vector_store %arg7[%c0_18, %c1, %c0_19, %c0_20], %14 {strides = array<i32>} : memref<1x18x18x128xbf16, #tpu.memory_space<vmem>>, vector<1x16x1x128xbf16>,
    %c0_21 = arith.constant 0 : index
    %c1_22 = arith.constant 1 : index
    %c17_23 = arith.constant 17 : index
    %c0_24 = arith.constant 0 : index
    %18 = vector.load %arg7[%c0_21, %c1_22, %c17_23, %c0_24] : memref<1x18x18x128xbf16, #tpu.memory_space<vmem>>, vector<1x16x1x128xbf16>
    tpu.vector_store %arg7[%c0_21, %c1_22, %c17_23, %c0_24], %14 {strides = array<i32>} : memref<1x18x18x128xbf16, #tpu.memory_space<vmem>>, vector<1x16x1x128xbf16>,
    %c0_25 = arith.constant 0 : index
    %c1_26 = arith.constant 1 : index
    %c1_27 = arith.constant 1 : index
    %c0_28 = arith.constant 0 : index
    %19 = vector.load %arg7[%c0_25, %c1_26, %c1_27, %c0_28] : memref<1x18x18x128xbf16, #tpu.memory_space<vmem>>, vector<1x16x16x128xbf16>
    tpu.vector_store %arg7[%c0_25, %c1_26, %c1_27, %c0_28], %12 {strides = array<i32>} : memref<1x18x18x128xbf16, #tpu.memory_space<vmem>>, vector<1x16x16x128xbf16>,
    %cst_29 = arith.constant 0.000000e+00 : f32
    %20 = vector.broadcast %cst_29 : f32 to vector<256x128xf32>
    %c0_30 = arith.constant 0 : index
    %c0_31 = arith.constant 0 : index
    %c0_32 = arith.constant 0 : index
    %c0_33 = arith.constant 0 : index
    %21 = vector.load %arg7[%c0_30, %c0_31, %c0_32, %c0_33] : memref<1x18x18x128xbf16, #tpu.memory_space<vmem>>, vector<1x16x16x128xbf16>
    %22 = vector.shape_cast %21 : vector<1x16x16x128xbf16> to vector<16x16x128xbf16>
    %23 = vector.shape_cast %22 : vector<16x16x128xbf16> to vector<256x128xbf16>
    %c0_34 = arith.constant 0 : index
    %c0_35 = arith.constant 0 : index
    %c0_36 = arith.constant 0 : index
    %c0_37 = arith.constant 0 : index
    %24 = vector.load %arg4[%c0_34, %c0_35, %c0_36, %c0_37] : memref<3x3x128x128xbf16, #tpu.memory_space<vmem>>, vector<1x1x128x128xbf16>
    %25 = vector.shape_cast %24 : vector<1x1x128x128xbf16> to vector<128x128xbf16>
    %cst_38 = arith.constant dense<0.000000e+00> : vector<256x128xf32>
    %26 = tpu.matmul %23, %25, %cst_38 {dimension_numbers = #tpu.dot_dimension_numbers<[1], [0], [0], [1], [0, 0, 1, 1], [], []>} : vector<256x128xbf16>, vector<128x128xbf16>, vector<256x128xf32> -> vector<256x128xf32>
    %27 = arith.addf %20, %26 : vector<256x128xf32>
    %c0_39 = arith.constant 0 : index
    %c0_40 = arith.constant 0 : index
    %c1_41 = arith.constant 1 : index
    %c0_42 = arith.constant 0 : index
    %28 = vector.load %arg7[%c0_39, %c0_40, %c1_41, %c0_42] : memref<1x18x18x128xbf16, #tpu.memory_space<vmem>>, vector<1x16x16x128xbf16>
    %29 = vector.shape_cast %28 : vector<1x16x16x128xbf16> to vector<16x16x128xbf16>
    %30 = vector.shape_cast %29 : vector<16x16x128xbf16> to vector<256x128xbf16>
    %c0_43 = arith.constant 0 : index
    %c1_44 = arith.constant 1 : index
    %c0_45 = arith.constant 0 : index
    %c0_46 = arith.constant 0 : index
    %31 = vector.load %arg4[%c0_43, %c1_44, %c0_45, %c0_46] : memref<3x3x128x128xbf16, #tpu.memory_space<vmem>>, vector<1x1x128x128xbf16>
    %32 = vector.shape_cast %31 : vector<1x1x128x128xbf16> to vector<128x128xbf16>
    %cst_47 = arith.constant dense<0.000000e+00> : vector<256x128xf32>
    %33 = tpu.matmul %30, %32, %cst_47 {dimension_numbers = #tpu.dot_dimension_numbers<[1], [0], [0], [1], [0, 0, 1, 1], [], []>} : vector<256x128xbf16>, vector<128x128xbf16>, vector<256x128xf32> -> vector<256x128xf32>
    %34 = arith.addf %27, %33 : vector<256x128xf32>
    %c0_48 = arith.constant 0 : index
    %c0_49 = arith.constant 0 : index
    %c2 = arith.constant 2 : index
    %c0_50 = arith.constant 0 : index
    %35 = vector.load %arg7[%c0_48, %c0_49, %c2, %c0_50] : memref<1x18x18x128xbf16, #tpu.memory_space<vmem>>, vector<1x16x16x128xbf16>
    %36 = vector.shape_cast %35 : vector<1x16x16x128xbf16> to vector<16x16x128xbf16>
    %37 = vector.shape_cast %36 : vector<16x16x128xbf16> to vector<256x128xbf16>
    %c0_51 = arith.constant 0 : index
    %c2_52 = arith.constant 2 : index
    %c0_53 = arith.constant 0 : index
    %c0_54 = arith.constant 0 : index
    %38 = vector.load %arg4[%c0_51, %c2_52, %c0_53, %c0_54] : memref<3x3x128x128xbf16, #tpu.memory_space<vmem>>, vector<1x1x128x128xbf16>
    %39 = vector.shape_cast %38 : vector<1x1x128x128xbf16> to vector<128x128xbf16>
    %cst_55 = arith.constant dense<0.000000e+00> : vector<256x128xf32>
    %40 = tpu.matmul %37, %39, %cst_55 {dimension_numbers = #tpu.dot_dimension_numbers<[1], [0], [0], [1], [0, 0, 1, 1], [], []>} : vector<256x128xbf16>, vector<128x128xbf16>, vector<256x128xf32> -> vector<256x128xf32>
    %41 = arith.addf %34, %40 : vector<256x128xf32>
    %c0_56 = arith.constant 0 : index
    %c1_57 = arith.constant 1 : index
    %c0_58 = arith.constant 0 : index
    %c0_59 = arith.constant 0 : index
    %42 = vector.load %arg7[%c0_56, %c1_57, %c0_58, %c0_59] : memref<1x18x18x128xbf16, #tpu.memory_space<vmem>>, vector<1x16x16x128xbf16>
    %43 = vector.shape_cast %42 : vector<1x16x16x128xbf16> to vector<16x16x128xbf16>
    %44 = vector.shape_cast %43 : vector<16x16x128xbf16> to vector<256x128xbf16>
    %c1_60 = arith.constant 1 : index
    %c0_61 = arith.constant 0 : index
    %c0_62 = arith.constant 0 : index
    %c0_63 = arith.constant 0 : index
    %45 = vector.load %arg4[%c1_60, %c0_61, %c0_62, %c0_63] : memref<3x3x128x128xbf16, #tpu.memory_space<vmem>>, vector<1x1x128x128xbf16>
    %46 = vector.shape_cast %45 : vector<1x1x128x128xbf16> to vector<128x128xbf16>
    %cst_64 = arith.constant dense<0.000000e+00> : vector<256x128xf32>
    %47 = tpu.matmul %44, %46, %cst_64 {dimension_numbers = #tpu.dot_dimension_numbers<[1], [0], [0], [1], [0, 0, 1, 1], [], []>} : vector<256x128xbf16>, vector<128x128xbf16>, vector<256x128xf32> -> vector<256x128xf32>
    %48 = arith.addf %41, %47 : vector<256x128xf32>
    %c0_65 = arith.constant 0 : index
    %c1_66 = arith.constant 1 : index
    %c1_67 = arith.constant 1 : index
    %c0_68 = arith.constant 0 : index
    %49 = vector.load %arg7[%c0_65, %c1_66, %c1_67, %c0_68] : memref<1x18x18x128xbf16, #tpu.memory_space<vmem>>, vector<1x16x16x128xbf16>
    %50 = vector.shape_cast %49 : vector<1x16x16x128xbf16> to vector<16x16x128xbf16>
    %51 = vector.shape_cast %50 : vector<16x16x128xbf16> to vector<256x128xbf16>
    %c1_69 = arith.constant 1 : index
    %c1_70 = arith.constant 1 : index
    %c0_71 = arith.constant 0 : index
    %c0_72 = arith.constant 0 : index
    %52 = vector.load %arg4[%c1_69, %c1_70, %c0_71, %c0_72] : memref<3x3x128x128xbf16, #tpu.memory_space<vmem>>, vector<1x1x128x128xbf16>
    %53 = vector.shape_cast %52 : vector<1x1x128x128xbf16> to vector<128x128xbf16>
    %cst_73 = arith.constant dense<0.000000e+00> : vector<256x128xf32>
    %54 = tpu.matmul %51, %53, %cst_73 {dimension_numbers = #tpu.dot_dimension_numbers<[1], [0], [0], [1], [0, 0, 1, 1], [], []>} : vector<256x128xbf16>, vector<128x128xbf16>, vector<256x128xf32> -> vector<256x128xf32>
    %55 = arith.addf %48, %54 : vector<256x128xf32>
    %c0_74 = arith.constant 0 : index
    %c1_75 = arith.constant 1 : index
    %c2_76 = arith.constant 2 : index
    %c0_77 = arith.constant 0 : index
    %56 = vector.load %arg7[%c0_74, %c1_75, %c2_76, %c0_77] : memref<1x18x18x128xbf16, #tpu.memory_space<vmem>>, vector<1x16x16x128xbf16>
    %57 = vector.shape_cast %56 : vector<1x16x16x128xbf16> to vector<16x16x128xbf16>
    %58 = vector.shape_cast %57 : vector<16x16x128xbf16> to vector<256x128xbf16>
    %c1_78 = arith.constant 1 : index
    %c2_79 = arith.constant 2 : index
    %c0_80 = arith.constant 0 : index
    %c0_81 = arith.constant 0 : index
    %59 = vector.load %arg4[%c1_78, %c2_79, %c0_80, %c0_81] : memref<3x3x128x128xbf16, #tpu.memory_space<vmem>>, vector<1x1x128x128xbf16>
    %60 = vector.shape_cast %59 : vector<1x1x128x128xbf16> to vector<128x128xbf16>
    %cst_82 = arith.constant dense<0.000000e+00> : vector<256x128xf32>
    %61 = tpu.matmul %58, %60, %cst_82 {dimension_numbers = #tpu.dot_dimension_numbers<[1], [0], [0], [1], [0, 0, 1, 1], [], []>} : vector<256x128xbf16>, vector<128x128xbf16>, vector<256x128xf32> -> vector<256x128xf32>
    %62 = arith.addf %55, %61 : vector<256x128xf32>
    %c0_83 = arith.constant 0 : index
    %c2_84 = arith.constant 2 : index
    %c0_85 = arith.constant 0 : index
    %c0_86 = arith.constant 0 : index
    %63 = vector.load %arg7[%c0_83, %c2_84, %c0_85, %c0_86] : memref<1x18x18x128xbf16, #tpu.memory_space<vmem>>, vector<1x16x16x128xbf16>
    %64 = vector.shape_cast %63 : vector<1x16x16x128xbf16> to vector<16x16x128xbf16>
    %65 = vector.shape_cast %64 : vector<16x16x128xbf16> to vector<256x128xbf16>
    %c2_87 = arith.constant 2 : index
    %c0_88 = arith.constant 0 : index
    %c0_89 = arith.constant 0 : index
    %c0_90 = arith.constant 0 : index
    %66 = vector.load %arg4[%c2_87, %c0_88, %c0_89, %c0_90] : memref<3x3x128x128xbf16, #tpu.memory_space<vmem>>, vector<1x1x128x128xbf16>
    %67 = vector.shape_cast %66 : vector<1x1x128x128xbf16> to vector<128x128xbf16>
    %cst_91 = arith.constant dense<0.000000e+00> : vector<256x128xf32>
    %68 = tpu.matmul %65, %67, %cst_91 {dimension_numbers = #tpu.dot_dimension_numbers<[1], [0], [0], [1], [0, 0, 1, 1], [], []>} : vector<256x128xbf16>, vector<128x128xbf16>, vector<256x128xf32> -> vector<256x128xf32>
    %69 = arith.addf %62, %68 : vector<256x128xf32>
    %c0_92 = arith.constant 0 : index
    %c2_93 = arith.constant 2 : index
    %c1_94 = arith.constant 1 : index
    %c0_95 = arith.constant 0 : index
    %70 = vector.load %arg7[%c0_92, %c2_93, %c1_94, %c0_95] : memref<1x18x18x128xbf16, #tpu.memory_space<vmem>>, vector<1x16x16x128xbf16>
    %71 = vector.shape_cast %70 : vector<1x16x16x128xbf16> to vector<16x16x128xbf16>
    %72 = vector.shape_cast %71 : vector<16x16x128xbf16> to vector<256x128xbf16>
    %c2_96 = arith.constant 2 : index
    %c1_97 = arith.constant 1 : index
    %c0_98 = arith.constant 0 : index
    %c0_99 = arith.constant 0 : index
    %73 = vector.load %arg4[%c2_96, %c1_97, %c0_98, %c0_99] : memref<3x3x128x128xbf16, #tpu.memory_space<vmem>>, vector<1x1x128x128xbf16>
    %74 = vector.shape_cast %73 : vector<1x1x128x128xbf16> to vector<128x128xbf16>
    %cst_100 = arith.constant dense<0.000000e+00> : vector<256x128xf32>
    %75 = tpu.matmul %72, %74, %cst_100 {dimension_numbers = #tpu.dot_dimension_numbers<[1], [0], [0], [1], [0, 0, 1, 1], [], []>} : vector<256x128xbf16>, vector<128x128xbf16>, vector<256x128xf32> -> vector<256x128xf32>
    %76 = arith.addf %69, %75 : vector<256x128xf32>
    %c0_101 = arith.constant 0 : index
    %c2_102 = arith.constant 2 : index
    %c2_103 = arith.constant 2 : index
    %c0_104 = arith.constant 0 : index
    %77 = vector.load %arg7[%c0_101, %c2_102, %c2_103, %c0_104] : memref<1x18x18x128xbf16, #tpu.memory_space<vmem>>, vector<1x16x16x128xbf16>
    %78 = vector.shape_cast %77 : vector<1x16x16x128xbf16> to vector<16x16x128xbf16>
    %79 = vector.shape_cast %78 : vector<16x16x128xbf16> to vector<256x128xbf16>
    %c2_105 = arith.constant 2 : index
    %c2_106 = arith.constant 2 : index
    %c0_107 = arith.constant 0 : index
    %c0_108 = arith.constant 0 : index
    %80 = vector.load %arg4[%c2_105, %c2_106, %c0_107, %c0_108] : memref<3x3x128x128xbf16, #tpu.memory_space<vmem>>, vector<1x1x128x128xbf16>
    %81 = vector.shape_cast %80 : vector<1x1x128x128xbf16> to vector<128x128xbf16>
    %cst_109 = arith.constant dense<0.000000e+00> : vector<256x128xf32>
    %82 = tpu.matmul %79, %81, %cst_109 {dimension_numbers = #tpu.dot_dimension_numbers<[1], [0], [0], [1], [0, 0, 1, 1], [], []>} : vector<256x128xbf16>, vector<128x128xbf16>, vector<256x128xf32> -> vector<256x128xf32>
    %83 = arith.addf %76, %82 : vector<256x128xf32>
    %84 = vector.shape_cast %83 : vector<256x128xf32> to vector<1x16x16x128xf32>
    %85 = arith.truncf %84 : vector<1x16x16x128xf32> to vector<1x16x16x128xbf16>
    %c0_110 = arith.constant 0 : index
    %c0_111 = arith.constant 0 : index
    %c0_112 = arith.constant 0 : index
    %c0_113 = arith.constant 0 : index
    %86 = vector.load %arg5[%c0_110, %c0_111, %c0_112, %c0_113] : memref<1x16x16x128xbf16, #tpu.memory_space<vmem>>, vector<1x16x16x128xbf16>
    tpu.vector_store %arg5[%c0_110, %c0_111, %c0_112, %c0_113], %85 {strides = array<i32>} : memref<1x16x16x128xbf16, #tpu.memory_space<vmem>>, vector<1x16x16x128xbf16>,
    %cst_114 = arith.constant dense<0.000000e+00> : vector<128xf32>
    %87 = vector.multi_reduction <add>, %83, %cst_114 [0] : vector<256x128xf32> to vector<128xf32>
    %88 = vector.shape_cast %87 : vector<128xf32> to vector<1x128xf32>
    %c0_115 = arith.constant 0 : index
    %c0_116 = arith.constant 0 : index
    %c0_117 = arith.constant 0 : index
    %c0_118 = arith.constant 0 : index
    %89 = vector.load %arg6[%c0_115, %c0_116, %c0_117, %c0_118] : memref<1x1x2x128xf32, #tpu.memory_space<vmem>>, vector<1x1x1x128xf32>
    %90 = vector.shape_cast %89 : vector<1x1x1x128xf32> to vector<1x128xf32>
    %91 = vector.shape_cast %88 : vector<1x128xf32> to vector<1x1x1x128xf32>
    tpu.vector_store %arg6[%c0_115, %c0_116, %c0_117, %c0_118], %91 {strides = array<i32>} : memref<1x1x2x128xf32, #tpu.memory_space<vmem>>, vector<1x1x1x128xf32>,
    %92 = arith.mulf %83, %83 : vector<256x128xf32>
    %cst_119 = arith.constant dense<0.000000e+00> : vector<128xf32>
    %93 = vector.multi_reduction <add>, %92, %cst_119 [0] : vector<256x128xf32> to vector<128xf32>
    %94 = vector.shape_cast %93 : vector<128xf32> to vector<1x128xf32>
    %c0_120 = arith.constant 0 : index
    %c0_121 = arith.constant 0 : index
    %c1_122 = arith.constant 1 : index
    %c0_123 = arith.constant 0 : index
    %95 = vector.load %arg6[%c0_120, %c0_121, %c1_122, %c0_123] : memref<1x1x2x128xf32, #tpu.memory_space<vmem>>, vector<1x1x1x128xf32>
    %96 = vector.shape_cast %95 : vector<1x1x1x128xf32> to vector<1x128xf32>
    %97 = vector.shape_cast %94 : vector<1x128xf32> to vector<1x1x1x128xf32>
    tpu.vector_store %arg6[%c0_120, %c0_121, %c1_122, %c0_123], %97 {strides = array<i32>} : memref<1x1x2x128xf32, #tpu.memory_space<vmem>>, vector<1x1x1x128xf32>,
    return
  }
  func.func @transform_0(%arg0: i32) -> (i32, i32, i32, i32) {
    %c0_i32 = arith.constant 0 : i32
    %c0_i32_0 = arith.constant 0 : i32
    %c0_i32_1 = arith.constant 0 : i32
    %c0_i32_2 = arith.constant 0 : i32
    return %arg0, %c0_i32, %c0_i32_0, %c0_i32_1 : i32, i32, i32, i32
  }
  func.func @transform_1(%arg0: i32) -> (i32, i32, i32) {
    %c0_i32 = arith.constant 0 : i32
    %c0_i32_0 = arith.constant 0 : i32
    %c0_i32_1 = arith.constant 0 : i32
    return %arg0, %c0_i32, %c0_i32_0 : i32, i32, i32
  }
  func.func @transform_2(%arg0: i32) -> (i32, i32, i32) {
    %c0_i32 = arith.constant 0 : i32
    %c0_i32_0 = arith.constant 0 : i32
    %c0_i32_1 = arith.constant 0 : i32
    return %arg0, %c0_i32, %c0_i32_0 : i32, i32, i32
  }
  func.func @transform_3(%arg0: i32) -> (i32, i32, i32, i32) {
    %c0_i32 = arith.constant 0 : i32
    %c0_i32_0 = arith.constant 0 : i32
    %c0_i32_1 = arith.constant 0 : i32
    %c0_i32_2 = arith.constant 0 : i32
    %c0_i32_3 = arith.constant 0 : i32
    return %c0_i32, %c0_i32_0, %c0_i32_1, %c0_i32_2 : i32, i32, i32, i32
  }
  func.func @transform_4(%arg0: i32) -> (i32, i32, i32, i32) {
    %c0_i32 = arith.constant 0 : i32
    %c0_i32_0 = arith.constant 0 : i32
    %c0_i32_1 = arith.constant 0 : i32
    %c0_i32_2 = arith.constant 0 : i32
    return %arg0, %c0_i32, %c0_i32_0, %c0_i32_1 : i32, i32, i32, i32
  }
  func.func @transform_5(%arg0: i32) -> (i32, i32, i32, i32) {
    %c0_i32 = arith.constant 0 : i32
    %c0_i32_0 = arith.constant 0 : i32
    %c0_i32_1 = arith.constant 0 : i32
    %c0_i32_2 = arith.constant 0 : i32
    return %arg0, %c0_i32, %c0_i32_0, %c0_i32_1 : i32, i32, i32, i32
  }
}

module attributes {stable_mosaic.version = 11 : i64} {
  func.func @_conv3_kernel(%arg0: i32, %arg1: i32, %arg2: memref<1x8x16x128xbf16, #tpu.memory_space<vmem>>, %arg3: memref<1x1x128xf32, #tpu.memory_space<vmem>>, %arg4: memref<1x1x128xf32, #tpu.memory_space<vmem>>, %arg5: memref<128x128xbf16, #tpu.memory_space<vmem>>, %arg6: memref<1x8x16x128xbf16, #tpu.memory_space<vmem>>, %arg7: memref<1x1x2x128xf32, #tpu.memory_space<vmem>>) attributes {dimension_semantics = [#tpu.dimension_semantics<parallel>, #tpu.dimension_semantics<parallel>], iteration_bounds = array<i64: 2, 2>, scalar_prefetch = 0 : i64, scratch_operands = 0 : i64, tpu.core_type = #tpu.core_type<tc>, window_params = [{transform_indices = @transform_0, window_bounds = array<i64: 1, 8, 16, 128>}, {pipeline_mode = #tpu.pipeline_mode<synchronous>, transform_indices = @transform_1, window_bounds = array<i64: 1, 1, 128>}, {pipeline_mode = #tpu.pipeline_mode<synchronous>, transform_indices = @transform_2, window_bounds = array<i64: 1, 1, 128>}, {pipeline_mode = #tpu.pipeline_mode<synchronous>, transform_indices = @transform_3, window_bounds = array<i64: 128, 128>}, {transform_indices = @transform_4, window_bounds = array<i64: 1, 8, 16, 128>}, {transform_indices = @transform_5, window_bounds = array<i64: 1, 1, 2, 128>}]} {
    %c0 = arith.constant 0 : index
    %c0_0 = arith.constant 0 : index
    %c0_1 = arith.constant 0 : index
    %c0_2 = arith.constant 0 : index
    %0 = vector.load %arg2[%c0, %c0_0, %c0_1, %c0_2] : memref<1x8x16x128xbf16, #tpu.memory_space<vmem>>, vector<1x8x16x128xbf16>
    %1 = arith.extf %0 : vector<1x8x16x128xbf16> to vector<1x8x16x128xf32>
    %c0_3 = arith.constant 0 : index
    %c0_4 = arith.constant 0 : index
    %c0_5 = arith.constant 0 : index
    %2 = vector.load %arg3[%c0_3, %c0_4, %c0_5] : memref<1x1x128xf32, #tpu.memory_space<vmem>>, vector<1x1x128xf32>
    %3 = vector.shape_cast %2 : vector<1x1x128xf32> to vector<1x1x1x128xf32>
    %c0_6 = arith.constant 0 : index
    %c0_7 = arith.constant 0 : index
    %c0_8 = arith.constant 0 : index
    %4 = vector.load %arg4[%c0_6, %c0_7, %c0_8] : memref<1x1x128xf32, #tpu.memory_space<vmem>>, vector<1x1x128xf32>
    %5 = vector.shape_cast %4 : vector<1x1x128xf32> to vector<1x1x1x128xf32>
    %6 = vector.broadcast %3 : vector<1x1x1x128xf32> to vector<1x8x16x128xf32>
    %7 = arith.mulf %1, %6 : vector<1x8x16x128xf32>
    %8 = vector.broadcast %5 : vector<1x1x1x128xf32> to vector<1x8x16x128xf32>
    %9 = arith.addf %7, %8 : vector<1x8x16x128xf32>
    %cst = arith.constant 0.000000e+00 : f32
    %10 = vector.broadcast %cst : f32 to vector<1x8x16x128xf32>
    %11 = arith.maximumf %9, %10 : vector<1x8x16x128xf32>
    %12 = arith.truncf %11 : vector<1x8x16x128xf32> to vector<1x8x16x128xbf16>
    %13 = vector.shape_cast %12 : vector<1x8x16x128xbf16> to vector<128x128xbf16>
    %c0_9 = arith.constant 0 : index
    %c0_10 = arith.constant 0 : index
    %14 = vector.load %arg5[%c0_9, %c0_10] : memref<128x128xbf16, #tpu.memory_space<vmem>>, vector<128x128xbf16>
    %cst_11 = arith.constant dense<0.000000e+00> : vector<128x128xf32>
    %15 = tpu.matmul %13, %14, %cst_11 {dimension_numbers = #tpu.dot_dimension_numbers<[1], [0], [0], [1], [0, 0, 1, 1], [], []>} : vector<128x128xbf16>, vector<128x128xbf16>, vector<128x128xf32> -> vector<128x128xf32>
    %16 = vector.shape_cast %15 : vector<128x128xf32> to vector<1x8x16x128xf32>
    %17 = arith.truncf %16 : vector<1x8x16x128xf32> to vector<1x8x16x128xbf16>
    %c0_12 = arith.constant 0 : index
    %c0_13 = arith.constant 0 : index
    %c0_14 = arith.constant 0 : index
    %c0_15 = arith.constant 0 : index
    %18 = vector.load %arg6[%c0_12, %c0_13, %c0_14, %c0_15] : memref<1x8x16x128xbf16, #tpu.memory_space<vmem>>, vector<1x8x16x128xbf16>
    tpu.vector_store %arg6[%c0_12, %c0_13, %c0_14, %c0_15], %17 {strides = array<i32>} : memref<1x8x16x128xbf16, #tpu.memory_space<vmem>>, vector<1x8x16x128xbf16>,
    %cst_16 = arith.constant dense<0.000000e+00> : vector<128xf32>
    %19 = vector.multi_reduction <add>, %15, %cst_16 [0] : vector<128x128xf32> to vector<128xf32>
    %20 = vector.shape_cast %19 : vector<128xf32> to vector<1x128xf32>
    %c0_17 = arith.constant 0 : index
    %c0_18 = arith.constant 0 : index
    %c0_19 = arith.constant 0 : index
    %c0_20 = arith.constant 0 : index
    %21 = vector.load %arg7[%c0_17, %c0_18, %c0_19, %c0_20] : memref<1x1x2x128xf32, #tpu.memory_space<vmem>>, vector<1x1x1x128xf32>
    %22 = vector.shape_cast %21 : vector<1x1x1x128xf32> to vector<1x128xf32>
    %23 = vector.shape_cast %20 : vector<1x128xf32> to vector<1x1x1x128xf32>
    tpu.vector_store %arg7[%c0_17, %c0_18, %c0_19, %c0_20], %23 {strides = array<i32>} : memref<1x1x2x128xf32, #tpu.memory_space<vmem>>, vector<1x1x1x128xf32>,
    %24 = arith.mulf %15, %15 : vector<128x128xf32>
    %cst_21 = arith.constant dense<0.000000e+00> : vector<128xf32>
    %25 = vector.multi_reduction <add>, %24, %cst_21 [0] : vector<128x128xf32> to vector<128xf32>
    %26 = vector.shape_cast %25 : vector<128xf32> to vector<1x128xf32>
    %c0_22 = arith.constant 0 : index
    %c0_23 = arith.constant 0 : index
    %c1 = arith.constant 1 : index
    %c0_24 = arith.constant 0 : index
    %27 = vector.load %arg7[%c0_22, %c0_23, %c1, %c0_24] : memref<1x1x2x128xf32, #tpu.memory_space<vmem>>, vector<1x1x1x128xf32>
    %28 = vector.shape_cast %27 : vector<1x1x1x128xf32> to vector<1x128xf32>
    %29 = vector.shape_cast %26 : vector<1x128xf32> to vector<1x1x1x128xf32>
    tpu.vector_store %arg7[%c0_22, %c0_23, %c1, %c0_24], %29 {strides = array<i32>} : memref<1x1x2x128xf32, #tpu.memory_space<vmem>>, vector<1x1x1x128xf32>,
    return
  }
  func.func @transform_0(%arg0: i32, %arg1: i32) -> (i32, i32, i32, i32) {
    %c0_i32 = arith.constant 0 : i32
    %c0_i32_0 = arith.constant 0 : i32
    %c0_i32_1 = arith.constant 0 : i32
    return %arg0, %arg1, %c0_i32, %c0_i32_0 : i32, i32, i32, i32
  }
  func.func @transform_1(%arg0: i32, %arg1: i32) -> (i32, i32, i32) {
    %c0_i32 = arith.constant 0 : i32
    %c0_i32_0 = arith.constant 0 : i32
    %c0_i32_1 = arith.constant 0 : i32
    %c0_i32_2 = arith.constant 0 : i32
    return %c0_i32, %c0_i32_0, %c0_i32_1 : i32, i32, i32
  }
  func.func @transform_2(%arg0: i32, %arg1: i32) -> (i32, i32, i32) {
    %c0_i32 = arith.constant 0 : i32
    %c0_i32_0 = arith.constant 0 : i32
    %c0_i32_1 = arith.constant 0 : i32
    %c0_i32_2 = arith.constant 0 : i32
    return %c0_i32, %c0_i32_0, %c0_i32_1 : i32, i32, i32
  }
  func.func @transform_3(%arg0: i32, %arg1: i32) -> (i32, i32) {
    %c0_i32 = arith.constant 0 : i32
    %c0_i32_0 = arith.constant 0 : i32
    %c0_i32_1 = arith.constant 0 : i32
    return %c0_i32, %c0_i32_0 : i32, i32
  }
  func.func @transform_4(%arg0: i32, %arg1: i32) -> (i32, i32, i32, i32) {
    %c0_i32 = arith.constant 0 : i32
    %c0_i32_0 = arith.constant 0 : i32
    %c0_i32_1 = arith.constant 0 : i32
    return %arg0, %arg1, %c0_i32, %c0_i32_0 : i32, i32, i32, i32
  }
  func.func @transform_5(%arg0: i32, %arg1: i32) -> (i32, i32, i32, i32) {
    %c0_i32 = arith.constant 0 : i32
    %c0_i32_0 = arith.constant 0 : i32
    %c0_i32_1 = arith.constant 0 : i32
    return %arg0, %arg1, %c0_i32, %c0_i32_0 : i32, i32, i32, i32
  }
}

module attributes {stable_mosaic.version = 11 : i64} {
  func.func @_bn_add_relu_kernel(%arg0: i32, %arg1: i32, %arg2: memref<1x8x16x128xbf16, #tpu.memory_space<vmem>>, %arg3: memref<1x8x16x128xbf16, #tpu.memory_space<vmem>>, %arg4: memref<1x1x128xf32, #tpu.memory_space<vmem>>, %arg5: memref<1x1x128xf32, #tpu.memory_space<vmem>>, %arg6: memref<1x8x16x128xbf16, #tpu.memory_space<vmem>>) attributes {dimension_semantics = [#tpu.dimension_semantics<parallel>, #tpu.dimension_semantics<parallel>], iteration_bounds = array<i64: 2, 2>, scalar_prefetch = 0 : i64, scratch_operands = 0 : i64, tpu.core_type = #tpu.core_type<tc>, window_params = [{transform_indices = @transform_0, window_bounds = array<i64: 1, 8, 16, 128>}, {transform_indices = @transform_1, window_bounds = array<i64: 1, 8, 16, 128>}, {pipeline_mode = #tpu.pipeline_mode<synchronous>, transform_indices = @transform_2, window_bounds = array<i64: 1, 1, 128>}, {pipeline_mode = #tpu.pipeline_mode<synchronous>, transform_indices = @transform_3, window_bounds = array<i64: 1, 1, 128>}, {transform_indices = @transform_4, window_bounds = array<i64: 1, 8, 16, 128>}]} {
    %c0 = arith.constant 0 : index
    %c0_0 = arith.constant 0 : index
    %c0_1 = arith.constant 0 : index
    %c0_2 = arith.constant 0 : index
    %0 = vector.load %arg2[%c0, %c0_0, %c0_1, %c0_2] : memref<1x8x16x128xbf16, #tpu.memory_space<vmem>>, vector<1x8x16x128xbf16>
    %1 = arith.extf %0 : vector<1x8x16x128xbf16> to vector<1x8x16x128xf32>
    %c0_3 = arith.constant 0 : index
    %c0_4 = arith.constant 0 : index
    %c0_5 = arith.constant 0 : index
    %2 = vector.load %arg4[%c0_3, %c0_4, %c0_5] : memref<1x1x128xf32, #tpu.memory_space<vmem>>, vector<1x1x128xf32>
    %3 = vector.shape_cast %2 : vector<1x1x128xf32> to vector<1x1x1x128xf32>
    %c0_6 = arith.constant 0 : index
    %c0_7 = arith.constant 0 : index
    %c0_8 = arith.constant 0 : index
    %4 = vector.load %arg5[%c0_6, %c0_7, %c0_8] : memref<1x1x128xf32, #tpu.memory_space<vmem>>, vector<1x1x128xf32>
    %5 = vector.shape_cast %4 : vector<1x1x128xf32> to vector<1x1x1x128xf32>
    %c0_9 = arith.constant 0 : index
    %c0_10 = arith.constant 0 : index
    %c0_11 = arith.constant 0 : index
    %c0_12 = arith.constant 0 : index
    %6 = vector.load %arg3[%c0_9, %c0_10, %c0_11, %c0_12] : memref<1x8x16x128xbf16, #tpu.memory_space<vmem>>, vector<1x8x16x128xbf16>
    %7 = arith.extf %6 : vector<1x8x16x128xbf16> to vector<1x8x16x128xf32>
    %8 = vector.broadcast %3 : vector<1x1x1x128xf32> to vector<1x8x16x128xf32>
    %9 = arith.mulf %1, %8 : vector<1x8x16x128xf32>
    %10 = vector.broadcast %5 : vector<1x1x1x128xf32> to vector<1x8x16x128xf32>
    %11 = arith.addf %9, %10 : vector<1x8x16x128xf32>
    %12 = arith.addf %11, %7 : vector<1x8x16x128xf32>
    %cst = arith.constant 0.000000e+00 : f32
    %13 = vector.broadcast %cst : f32 to vector<1x8x16x128xf32>
    %14 = arith.maximumf %12, %13 : vector<1x8x16x128xf32>
    %15 = arith.truncf %14 : vector<1x8x16x128xf32> to vector<1x8x16x128xbf16>
    %c0_13 = arith.constant 0 : index
    %c0_14 = arith.constant 0 : index
    %c0_15 = arith.constant 0 : index
    %c0_16 = arith.constant 0 : index
    %16 = vector.load %arg6[%c0_13, %c0_14, %c0_15, %c0_16] : memref<1x8x16x128xbf16, #tpu.memory_space<vmem>>, vector<1x8x16x128xbf16>
    tpu.vector_store %arg6[%c0_13, %c0_14, %c0_15, %c0_16], %15 {strides = array<i32>} : memref<1x8x16x128xbf16, #tpu.memory_space<vmem>>, vector<1x8x16x128xbf16>,
    return
  }
  func.func @transform_0(%arg0: i32, %arg1: i32) -> (i32, i32, i32, i32) {
    %c0_i32 = arith.constant 0 : i32
    %c0_i32_0 = arith.constant 0 : i32
    %c0_i32_1 = arith.constant 0 : i32
    return %arg0, %arg1, %c0_i32, %c0_i32_0 : i32, i32, i32, i32
  }
  func.func @transform_1(%arg0: i32, %arg1: i32) -> (i32, i32, i32, i32) {
    %c0_i32 = arith.constant 0 : i32
    %c0_i32_0 = arith.constant 0 : i32
    %c0_i32_1 = arith.constant 0 : i32
    return %arg0, %arg1, %c0_i32, %c0_i32_0 : i32, i32, i32, i32
  }
  func.func @transform_2(%arg0: i32, %arg1: i32) -> (i32, i32, i32) {
    %c0_i32 = arith.constant 0 : i32
    %c0_i32_0 = arith.constant 0 : i32
    %c0_i32_1 = arith.constant 0 : i32
    %c0_i32_2 = arith.constant 0 : i32
    return %c0_i32, %c0_i32_0, %c0_i32_1 : i32, i32, i32
  }
  func.func @transform_3(%arg0: i32, %arg1: i32) -> (i32, i32, i32) {
    %c0_i32 = arith.constant 0 : i32
    %c0_i32_0 = arith.constant 0 : i32
    %c0_i32_1 = arith.constant 0 : i32
    %c0_i32_2 = arith.constant 0 : i32
    return %c0_i32, %c0_i32_0, %c0_i32_1 : i32, i32, i32
  }
  func.func @transform_4(%arg0: i32, %arg1: i32) -> (i32, i32, i32, i32) {
    %c0_i32 = arith.constant 0 : i32
    %c0_i32_0 = arith.constant 0 : i32
    %c0_i32_1 = arith.constant 0 : i32
    return %arg0, %arg1, %c0_i32, %c0_i32_0 : i32, i32, i32, i32
  }
}

</mosaic_0001>

<bundles_post_ra>
// kernel: bottleneck_ibn_forward.6
= control target key start
LH: loop header
LB: loop body
LE: loop exit
PB: predicated region body
PF: predicated region fallthrough
CT: control target
= control target key end

     0   :  { %s1167_s18 = smov 0   ;;  %s1169_s19 = smov 0   ;;  %s1323_s0 = inlined_call_operand.vmem [shape: bf16[2,16,16,128], index: 0, kind: input, shape index: {}]   ;;  %s1324_s1 = inlined_call_operand.vmem [shape: f32[1,1,128], index: 1, kind: input, shape index: {}]   ;;  %s1325_s2 = inlined_call_operand.vmem [shape: f32[1,1,128], index: 2, kind: input, shape index: {}]   ;;  %s1326_s3 = inlined_call_operand.vmem [shape: bf16[128,128], index: 3, kind: input, shape index: {}]   ;;  %s1327_s4 = inlined_call_operand.vmem [shape: bf16[2,16,16,128], index: 4, kind: output, shape index: {0}]   ;;  %s1328_s5 = inlined_call_operand.vmem [shape: f32[2,2,2,128], index: 5, kind: output, shape index: {1}]  }
   0x1   :  { %s1171_s20 = smov 0   ;;  %s1173_s21 = smov 0  }
   0x2   :  { %s1175_s22 = smov 0  }
   0x3 LB: > { %s25_s23 = sadd.s32 1, %s1127_s20  ;;  %s28_s24 = sadd.s32 1, %s1131_s21  ;;  %s1135_s22 = sphi %s1175_s22, %s16_s22   ;;  %s1131_s21 = sphi %s1173_s21, %s1332_s21   ;;  %s1127_s20 = sphi %s1171_s20, %s1331_s20   ;;  %s1123_s19 = sphi %s1169_s19, %s1330_s19   ;;  %s1119_s18 = sphi %s1167_s18, %s1329_s18  }
   0x4   : > { %p26_p0 = scmp.ge.s32.totalorder %s25_s23, 2  ;;  %p844_p1 = scmp.ge.s32.totalorder %s1135_s22, 1 }
   0x5   : > { %p214_p2 = scmp.lt.s32.totalorder %s1135_s22, 5 }
   0x6   : > { %s1334_s23 = smov (%p26_p0, %s25_s23), 0  ;;  %s1336_s24 = smov (!%p26_p0, %s28_s24), %s1131_s21 }
   0x7   : > { %p215_p3 = pnand %p844_p1, %p214_p2  ;;  %p30_p4 = scmp.ge.s32.totalorder %s1336_s24, 2 }
   0x8   : > { %v1089_v0 = vld [vmem:[%s1326_s3] sm:$0xff] (!%p215_p3)   ;;  %s845_s27 = sshll.u32 (!%p215_p3), %s1119_s18, 3  ;;  %v1090_v1 = vld [vmem:[%s1326_s3 + $0x8] sm:$0xff] (!%p215_p3)   ;;  %p261_p5 = scmp.lt.s32.totalorder (!%p215_p3), %s1123_s19, 1  ;;  %v1091_v2 = vld [vmem:[%s1326_s3 + $0x10] sm:$0xff] (!%p215_p3)  }
   0x9   : > { %s1338_s24 = smov (%p30_p4, %s1336_s24), 0  ;;  %218 = sbr.rel (%p215_p3) target bundleno = 302 (0x12e), region = 36 }
   0xa   : > { %1001 = vmatprep.subr.bf16.mxu0 (!%p215_p3), %v1089_v0  ;;  %1033 = vmatprep.subr.bf16.mxu1 (!%p215_p3), %v1089_v0  ;;  %p263_p6 = scmp.lt.s32.totalorder (!%p215_p3), %s845_s27, 15  ;;  %v1092_v3 = vld [vmem:[%s1326_s3 + $0x18] sm:$0xff] (!%p215_p3)   ;;  %v1228_v4 = vld [vmem:[%s1324_s1] ss:$0 sm:$0xff] (!%p215_p3)  ;;  %v1094_v25 = vld [vmem:[%s1326_s3 + $0x28] sm:$0xff] (!%p215_p3)   ;;  %p284_p7 = scmp.lt.s32.totalorder (!%p215_p3), %s1119_s18, 1 }
   0xb   : > { %1002 = vmatpush3.bf16.msra.mxu0 (!%p215_p3), %v1089_v0  ;;  %1041 = vmatpush3.bf16.msra.mxu1 (!%p215_p3), %v1089_v0  ;;  %v1093_v11 = vld [vmem:[%s1326_s3 + $0x20] sm:$0xff] (!%p215_p3)   ;;  %v1095_v41 = vld [vmem:[%s1326_s3 + $0x30] sm:$0xff] (!%p215_p3)   ;;  %v1096_v58 = vld [vmem:[%s1326_s3 + $0x38] sm:$0xff] (!%p215_p3)  }
   0xc   : > { %1003 = vmatprep.subr.bf16.mxu0 (!%p215_p3), %v1090_v1  ;;  %1034 = vmatprep.subr.bf16.mxu1 (!%p215_p3), %v1090_v1  ;;  %v1240_v12 = vld [vmem:[%s1325_s2] ss:$0 sm:$0xff] (!%p215_p3) }
   0xf   : > { %1004 = vmatpush3.bf16.msra.mxu0 (!%p215_p3), %v1090_v1  ;;  %1042 = vmatpush3.bf16.msra.mxu1 (!%p215_p3), %v1090_v1 }
  0x10   : > { %s1340_s19 = smov (!%p261_p5, %s1123_s19), 1  ;;  %s1342_s27 = smov (!%p263_p6, %s845_s27), 15  ;;  %1005 = vmatprep.subr.bf16.mxu0 %v1091_v2  ;;  %1035 = vmatprep.subr.bf16.mxu1 %v1091_v2 }
  0x11   : > { %s847_s7 = sshll.u32 %s1340_s19, 5  ;;  %s846_s8 = sshll.u32 %s1342_s27, 1 }
  0x12   : > { %s1212_s9 = sadd.s32 %s847_s7, %s846_s8  ;;  %s1344_s18 = smov (!%p284_p7, %s1119_s18), 1 }
  0x13   : > { %s848_s12 = sshll.u32 %s1212_s9, 2  ;;  %1006 = vmatpush3.bf16.msra.mxu0 %v1091_v2  ;;  %1043 = vmatpush3.bf16.msra.mxu1 %v1091_v2  ;;  %s853_s9 = sshll.u32 %s1340_s19, 1 }
  0x14   : > { %s1223_s15 = scalar_lea.vmem %s1323_s0, %s848_s12  ;;  %1007 = vmatprep.subr.bf16.mxu0 %v1092_v3  ;;  %1036 = vmatprep.subr.bf16.mxu1 %v1092_v3  ;;  %s1292_s14 = scalar_lea.vmem %s1327_s4, %s848_s12 }
  0x15   : > { %v900_v5 = vld [vmem:[%s1223_s15] sm:$0xff]   ;;  %v971_v6 = vld [vmem:[%s1223_s15 + $0x8] sm:$0xff]   ;;  %v972_v7 = vld [vmem:[%s1223_s15 + $0x10] sm:$0xff]   ;;  %s287_s12 = sadd.s32 %s853_s9, %s1344_s18 }
  0x16   : > { %v901_v8 = vunpack.c.l.bf16 %v900_v5  ;;  %v902_v9 = vunpack.c.h.bf16 %v900_v5  ;;  %v973_v10 = vld [vmem:[%s1223_s15 + $0x18] sm:$0xff]   ;;  %v905_v13 = vunpack.c.l.bf16 %v971_v6  ;;  %v906_v14 = vunpack.c.h.bf16 %v971_v6  ;;  %v974_v16 = vld [vmem:[%s1223_s15 + $0x20] sm:$0xff]   ;;  %v975_v32 = vld [vmem:[%s1223_s15 + $0x28] sm:$0xff]  }
  0x17   : > { %v909_v15 = vunpack.c.l.bf16 %v972_v7  ;;  %v910_v19 = vunpack.c.h.bf16 %v972_v7  ;;  %v913_v20 = vunpack.c.l.bf16 %v973_v10  ;;  %v914_v21 = vunpack.c.h.bf16 %v973_v10  ;;  %1008 = vmatpush3.bf16.msra.mxu0 %v1092_v3  ;;  %1044 = vmatpush3.bf16.msra.mxu1 %v1092_v3  ;;  %v976_v36 = vld [vmem:[%s1223_s15 + $0x30] sm:$0xff]   ;;  %v977_v40 = vld [vmem:[%s1223_s15 + $0x38] sm:$0xff]   ;;  %s854_s15 = sshll.u32 %s287_s12, 1 }
  0x18   : > { %v331_v17 = vmul.f32 %v901_v8, %v1228_v4  ;;  %v332_v18 = vmul.f32 %v902_v9, %v1228_v4  ;;  %v917_v24 = vunpack.c.l.bf16 %v974_v16  ;;  %1009 = vmatprep.subr.bf16.mxu0 %v1093_v11  ;;  %1037 = vmatprep.subr.bf16.mxu1 %v1093_v11  ;;  %v333_v26 = vmul.f32 %v905_v13, %v1228_v4  ;;  %s289_s25 = scalar_lea.vmem %s1328_s5, %s854_s15 }
  0x19   : > { %v334_v27 = vmul.f32 %v906_v14, %v1228_v4  ;;  %v335_v28 = vmul.f32 %v909_v15, %v1228_v4  ;;  %v918_v29 = vunpack.c.h.bf16 %v974_v16  ;;  %v336_v33 = vmul.f32 %v910_v19, %v1228_v4 }
  0x1a   : > { %v353_v22 = vadd.f32 %v1240_v12, %v331_v17  ;;  %v354_v23 = vadd.f32 %v1240_v12, %v332_v18  ;;  %v337_v34 = vmul.f32 %v913_v20, %v1228_v4  ;;  %v338_v35 = vmul.f32 %v914_v21, %v1228_v4 }
  0x1b   : > { %1010 = vmatpush3.bf16.msra.mxu0 %v1093_v11  ;;  %1045 = vmatpush3.bf16.msra.mxu1 %v1093_v11  ;;  %v339_v38 = vmul.f32 %v917_v24, %v1228_v4  ;;  %v340_v39 = vmul.f32 %v918_v29, %v1228_v4  ;;  %v355_v42 = vadd.f32 %v1240_v12, %v333_v26  ;;  %v921_v45 = vunpack.c.l.bf16 %v975_v32 }
  0x1c   : > { %v369_v30 = vmax.f32 %v353_v22, 0.0  ;;  %v370_v31 = vmax.f32 %v354_v23, 0.0  ;;  %1011 = vmatprep.subr.bf16.mxu0 %v1094_v25  ;;  %v356_v43 = vadd.f32 %v1240_v12, %v334_v27  ;;  %1038 = vmatprep.subr.bf16.mxu1 %v1094_v25  ;;  %v357_v44 = vadd.f32 %v1240_v12, %v335_v28 }
  0x1d   : > { %v361_v46 = vadd.f32 %v1240_v12, %v339_v38  ;;  %v362_v47 = vadd.f32 %v1240_v12, %v340_v39  ;;  %v922_v48 = vunpack.c.h.bf16 %v975_v32  ;;  %v925_v49 = vunpack.c.l.bf16 %v976_v36 }
  0x1e   : > { %v385_v37 = vpack.c.bf16 %v370_v31, %v369_v30  ;;  %v358_v50 = vadd.f32 %v1240_v12, %v336_v33  ;;  %v341_v51 = vmul.f32 %v921_v45, %v1228_v4  ;;  %v926_v52 = vunpack.c.h.bf16 %v976_v36 }
  0x1f   : > { %v929_v53 = vunpack.c.l.bf16 %v977_v40  ;;  %1012 = vmatpush3.bf16.msra.mxu0 %v1094_v25  ;;  %1046 = vmatpush3.bf16.msra.mxu1 %v1094_v25  ;;  %v377_v54 = vmax.f32 %v361_v46, 0.0  ;;  %v378_v55 = vmax.f32 %v362_v47, 0.0  ;;  %v342_v56 = vmul.f32 %v922_v48, %v1228_v4 }
  0x20   : > { %1017 = vmatprep.mubr.bf16.mxu0 %v385_v37  ;;  %v343_v57 = vmul.f32 %v925_v49, %v1228_v4  ;;  %1013 = vmatprep.subr.bf16.mxu0 %v1095_v41  ;;  %v371_v59 = vmax.f32 %v355_v42, 0.0  ;;  %v363_v60 = vadd.f32 %v1240_v12, %v341_v51  ;;  %v344_v61 = vmul.f32 %v926_v52, %v1228_v4 }
  0x21   : > { %1039 = vmatprep.subr.bf16.mxu1 %v1095_v41  ;;  %v930_v62 = vunpack.c.h.bf16 %v977_v40  ;;  %v372_v63 = vmax.f32 %v356_v43, 0.0  ;;  %v389_v0 = vpack.c.bf16 %v378_v55, %v377_v54  ;;  %v364_v1 = vadd.f32 %v1240_v12, %v342_v56 }
  0x22   : > { %v365_v2 = vadd.f32 %v1240_v12, %v343_v57  ;;  %v379_v3 = vmax.f32 %v363_v60, 0.0  ;;  %v366_v5 = vadd.f32 %v1240_v12, %v344_v61  ;;  %v345_v6 = vmul.f32 %v929_v53, %v1228_v4 }
  0x23   : > { %v346_v7 = vmul.f32 %v930_v62, %v1228_v4  ;;  %1014 = vmatpush3.bf16.msra.mxu0 %v1095_v41  ;;  %1047 = vmatpush3.bf16.msra.mxu1 %v1095_v41  ;;  %v373_v8 = vmax.f32 %v357_v44, 0.0  ;;  %v374_v9 = vmax.f32 %v358_v50, 0.0  ;;  %v380_v10 = vmax.f32 %v364_v1, 0.0 }
  0x24   : > { %v381_v11 = vmax.f32 %v365_v2, 0.0  ;;  %1015 = vmatprep.subr.bf16.mxu0 %v1096_v58  ;;  %1040 = vmatprep.subr.bf16.mxu1 %v1096_v58  ;;  %v382_v13 = vmax.f32 %v366_v5, 0.0  ;;  %v359_v14 = vadd.f32 %v1240_v12, %v337_v34  ;;  %v360_v15 = vadd.f32 %v1240_v12, %v338_v35 }
  0x25   : > { %1025 = vmatprep.mubr.bf16.mxu1 %v389_v0  ;;  %v386_v16 = vpack.c.bf16 %v372_v63, %v371_v59  ;;  %v390_v17 = vpack.c.bf16 %v380_v10, %v379_v3  ;;  %v367_v18 = vadd.f32 %v1240_v12, %v345_v6  ;;  %v368_v4 = vadd.f32 %v1240_v12, %v346_v7 }
  0x26   : > { %v387_v19 = vpack.c.bf16 %v374_v9, %v373_v8  ;;  %v391_v20 = vpack.c.bf16 %v382_v13, %v381_v11  ;;  %v375_v21 = vmax.f32 %v359_v14, 0.0  ;;  %v376_v22 = vmax.f32 %v360_v15, 0.0 }
  0x27   : > { %1016 = vmatpush3.bf16.msra.mxu0 %v1096_v58  ;;  %1048 = vmatpush3.bf16.msra.mxu1 %v1096_v58  ;;  %v383_v23 = vmax.f32 %v367_v18, 0.0  ;;  %v384_v24 = vmax.f32 %v368_v4, 0.0 }
  0x28   : > { %v388_v25 = vpack.c.bf16 %v376_v22, %v375_v21 }
  0x29   : > { %v392_v26 = vpack.c.bf16 %v384_v24, %v383_v23 }
  0x2a   : > { %1018 = vmatmul.mubr.bf16.vlgmr.msra.gmra.mrb[0].mxu0 %v386_v16  ;;  %1026 = vmatmul.mubr.bf16.vlgmr.msra.gmra.mrb[0].mxu1 %v390_v17 }
  0x2b   : > { %1021 = vmatprep.mubr.bf16.mxu0 %v387_v19  ;;  %1029 = vmatprep.mubr.bf16.mxu1 %v391_v20 }
  0x32   : > { %1022 = vmatmul.mubr.bf16.gmra.mrb[4].mxu0 %v388_v25  ;;  %1030 = vmatmul.mubr.bf16.gmra.mrb[4].mxu1 %v392_v26 }
  0xfd   : > { %v1019_v27 = vpop.f32.mrb[0].mxu0  ;;  %v1027_v28 = vpop.f32.mrb[0].mxu1 }
  0xfe   : > { %v491_v12 = vpop.f32.mrb[1].mxu0  ;;  %v523_v29 = vpop.f32.mrb[1].mxu1  ;;  %v658_v41 = vmul.f32 %v1019_v27, %v1019_v27  ;;  %v666_v15 = vmul.f32 %v1027_v28, %v1027_v28 }
  0xff   : > { %v1020_v30 = vpop.f32.mrb[2].mxu0  ;;  %v1028_v31 = vpop.f32.mrb[2].mxu1  ;;  %v656_v32 = vmul.f32 %v491_v12, %v491_v12  ;;  %v664_v8 = vmul.f32 %v523_v29, %v523_v29 }
 0x100   : > { %v939_v33 = vpack.c.bf16 %v1020_v30, %v1019_v27  ;;  %v494_v34 = vpop.f32.mrb[3].mxu0  ;;  %v959_v35 = vpack.c.bf16 %v1028_v31, %v1027_v28  ;;  %v526_v36 = vpop.f32.mrb[3].mxu1  ;;  %v659_v44 = vmul.f32 %v1020_v30, %v1020_v30  ;;  %v667_v18 = vmul.f32 %v1028_v31, %v1028_v31 }
 0x101   : > { %v934_v37 = vpack.c.bf16 %v494_v34, %v491_v12  ;;  %v634_v38 = vadd.f32 %v494_v34, %v491_v12  ;;  %v657_v39 = vmul.f32 %v494_v34, %v494_v34  ;;  %v954_v40 = vpack.c.bf16 %v526_v36, %v523_v29 }
 0x102   : > { %978 = vst [vmem:[%s1292_s14 + $0x8] sm:$0xff] %v939_v33   ;;  %982 = vst [vmem:[%s1292_s14 + $0x28] sm:$0xff] %v959_v35   ;;  %v665_v14 = vmul.f32 %v526_v36, %v526_v36 }
 0x103   : > { %935 = vst [vmem:[%s1292_s14] sm:$0xff] %v934_v37   ;;  %v635_v42 = vadd.f32 %v1019_v27, %v634_v38  ;;  %v672_v43 = vadd.f32 %v657_v39, %v656_v32  ;;  %981 = vst [vmem:[%s1292_s14 + $0x20] sm:$0xff] %v954_v40  }
 0x105   : > { %v673_v45 = vadd.f32 %v672_v43, %v658_v41  ;;  %v1023_v46 = vpop.f32.mrb[4].mxu0  ;;  %v636_v47 = vadd.f32 %v1020_v30, %v635_v42  ;;  %v1031_v48 = vpop.f32.mrb[4].mxu1 }
 0x106   : > { %v507_v49 = vpop.f32.mrb[5].mxu0  ;;  %v539_v50 = vpop.f32.mrb[5].mxu1  ;;  %v662_v1 = vmul.f32 %v1023_v46, %v1023_v46  ;;  %v670_v26 = vmul.f32 %v1031_v48, %v1031_v48 }
 0x107   : > { %v637_v51 = vadd.f32 %v636_v47, %v507_v49  ;;  %v660_v52 = vmul.f32 %v507_v49, %v507_v49  ;;  %v674_v53 = vadd.f32 %v673_v45, %v659_v44  ;;  %v1024_v54 = vpop.f32.mrb[6].mxu0  ;;  %v1032_v55 = vpop.f32.mrb[6].mxu1  ;;  %v668_v20 = vmul.f32 %v539_v50, %v539_v50 }
 0x108   : > { %v949_v56 = vpack.c.bf16 %v1024_v54, %v1023_v46  ;;  %v510_v57 = vpop.f32.mrb[7].mxu0  ;;  %v969_v58 = vpack.c.bf16 %v1032_v55, %v1031_v48  ;;  %v542_v59 = vpop.f32.mrb[7].mxu1  ;;  %v663_v5 = vmul.f32 %v1024_v54, %v1024_v54 }
 0x109   : > { %v675_v60 = vadd.f32 %v674_v53, %v660_v52  ;;  %v944_v61 = vpack.c.bf16 %v510_v57, %v507_v49  ;;  %v638_v62 = vadd.f32 %v637_v51, %v510_v57  ;;  %v661_v63 = vmul.f32 %v510_v57, %v510_v57 }
 0x10a   : > { %980 = vst [vmem:[%s1292_s14 + $0x18] sm:$0xff] %v949_v56   ;;  %984 = vst [vmem:[%s1292_s14 + $0x38] sm:$0xff] %v969_v58   ;;  %v964_v0 = vpack.c.bf16 %v542_v59, %v539_v50  ;;  %v669_v25 = vmul.f32 %v542_v59, %v542_v59 }
 0x10b   : > { %979 = vst [vmem:[%s1292_s14 + $0x10] sm:$0xff] %v944_v61   ;;  %v639_v2 = vadd.f32 %v1023_v46, %v638_v62  ;;  %v676_v3 = vadd.f32 %v675_v60, %v661_v63 }
 0x10c   : > { %983 = vst [vmem:[%s1292_s14 + $0x30] sm:$0xff] %v964_v0  }
 0x10d   : > { %v677_v6 = vadd.f32 %v676_v3, %v662_v1  ;;  %v640_v7 = vadd.f32 %v1024_v54, %v639_v2 }
 0x10f   : > { %v641_v9 = vadd.f32 %v640_v7, %v523_v29  ;;  %v678_v10 = vadd.f32 %v677_v6, %v663_v5  ;;  %v671_v29 = vmul.f32 %v1032_v55, %v1032_v55 }
 0x111   : > { %v679_v11 = vadd.f32 %v678_v10, %v664_v8  ;;  %v642_v13 = vadd.f32 %v641_v9, %v526_v36 }
 0x113   : > { %v643_v16 = vadd.f32 %v1027_v28, %v642_v13  ;;  %v680_v17 = vadd.f32 %v679_v11, %v665_v14 }
 0x115   : > { %v681_v4 = vadd.f32 %v680_v17, %v666_v15  ;;  %v644_v19 = vadd.f32 %v1028_v31, %v643_v16 }
 0x117   : > { %v645_v21 = vadd.f32 %v644_v19, %v539_v50  ;;  %v682_v22 = vadd.f32 %v681_v4, %v667_v18 }
 0x119   : > { %v683_v23 = vadd.f32 %v682_v22, %v668_v20  ;;  %v646_v24 = vadd.f32 %v645_v21, %v542_v59 }
 0x11b   : > { %v647_v27 = vadd.f32 %v1031_v48, %v646_v24  ;;  %v684_v12 = vadd.f32 %v683_v23, %v669_v25 }
 0x11d   : > { %v648_v30 = vadd.f32 %v1032_v55, %v647_v27  ;;  %v685_v32 = vadd.f32 %v684_v12, %v670_v26 }
 0x11f   : > { %v649_v28 = vrot.slane %v648_v30, 4  ;;  %v686_v33 = vadd.f32 %v685_v32, %v671_v29 }
 0x121   : > { %v650_v34 = vadd.f32 %v649_v28, %v648_v30  ;;  %v687_v35 = vrot.slane %v686_v33, 4 }
 0x123   : > { %v651_v31 = vrot.slane %v650_v34, 2  ;;  %v688_v36 = vadd.f32 %v687_v35, %v686_v33 }
 0x125   : > { %v652_v37 = vadd.f32 %v651_v31, %v650_v34  ;;  %v689_v38 = vrot.slane %v688_v36, 2 }
 0x127   : > { %v653_v39 = vrot.slane %v652_v37, 1  ;;  %v690_v40 = vadd.f32 %v689_v38, %v688_v36 }
 0x129   : > { %v654_v41 = vadd.f32 %v653_v39, %v652_v37  ;;  %v691_v42 = vrot.slane %v690_v40, 1 }
 0x12b   : > { %655 = vst [vmem:[%s289_s25] sm:$0x1] %v654_v41  ;;  %v692_v43 = vadd.f32 %v691_v42, %v690_v40 }
 0x12d   : > { %693 = vst [vmem:[%s289_s25 + $0x1] sm:$0x1] %v692_v43 }
 0x12e PF: > { %s16_s22 = sadd.s32 1, %s1135_s22   ;;  %s1329_s18 = smov %s1127_s20 }
 0x12f   : > { %p13_p8 = scmp.ge.s32.totalorder %s16_s22, 6   ;;  %s1330_s19 = smov %s1131_s21 }
 0x130   : > { %s1331_s20 = smov %s1334_s23  ;;  %s1332_s21 = smov %s1338_s24 }
 0x131   :  { %15 = sbr.rel (!%p13_p8) target bundleno = 3 (0x3), region = 78 }

// kernel: bottleneck_ibn_forward.4
= control target key start
LH: loop header
LB: loop body
LE: loop exit
PB: predicated region body
PF: predicated region fallthrough
CT: control target
= control target key end

     0   :  { %s1040_s12 = smov 0   ;;  %s1042_s13 = smov 0   ;;  %s1154_s0 = inlined_call_operand.vmem [shape: bf16[2,16,16,128], index: 0, kind: input, shape index: {}]   ;;  %s1155_s1 = inlined_call_operand.vmem [shape: bf16[128,128], index: 1, kind: input, shape index: {}]   ;;  %s1156_s2 = inlined_call_operand.vmem [shape: bf16[2,16,16,128], index: 2, kind: output, shape index: {0}]   ;;  %s1157_s3 = inlined_call_operand.vmem [shape: f32[2,2,2,128], index: 3, kind: output, shape index: {1}]  }
   0x1   :  { %s1044_s14 = smov 0   ;;  %s1046_s15 = smov 0  }
   0x2   :  { %s1048_s16 = smov 0  }
   0x3 LB: > { %s23_s17 = sadd.s32 1, %s1010_s14  ;;  %s26_s18 = sadd.s32 1, %s1014_s15  ;;  %s1018_s16 = sphi %s1048_s16, %s14_s16   ;;  %s1014_s15 = sphi %s1046_s15, %s1161_s15   ;;  %s1010_s14 = sphi %s1044_s14, %s1160_s14   ;;  %s1006_s13 = sphi %s1042_s13, %s1159_s13   ;;  %s1002_s12 = sphi %s1040_s12, %s1158_s12  }
   0x4   : > { %p24_p0 = scmp.ge.s32.totalorder %s23_s17, 2  ;;  %p752_p1 = scmp.ge.s32.totalorder %s1018_s16, 1 }
   0x5   : > { %p164_p2 = scmp.lt.s32.totalorder %s1018_s16, 5 }
   0x6   : > { %s1163_s17 = smov (%p24_p0, %s23_s17), 0  ;;  %s1165_s18 = smov (!%p24_p0, %s26_s18), %s1014_s15 }
   0x7   : > { %p165_p3 = pnand %p752_p1, %p164_p2  ;;  %p28_p4 = scmp.ge.s32.totalorder %s1165_s18, 2 }
   0x8   : > { %v964_v0 = vld [vmem:[%s1155_s1] sm:$0xff] (!%p165_p3)   ;;  %s753_s21 = sshll.u32 (!%p165_p3), %s1002_s12, 3  ;;  %v965_v1 = vld [vmem:[%s1155_s1 + $0x8] sm:$0xff] (!%p165_p3)   ;;  %p207_p5 = scmp.lt.s32.totalorder (!%p165_p3), %s1006_s13, 1  ;;  %v966_v2 = vld [vmem:[%s1155_s1 + $0x10] sm:$0xff] (!%p165_p3)  }
   0x9   : > { %s1167_s18 = smov (%p28_p4, %s1165_s18), 0  ;;  %168 = sbr.rel (%p165_p3) target bundleno = 302 (0x12e), region = 28 }
   0xa   : > { %876 = vmatprep.subr.bf16.mxu0 (!%p165_p3), %v964_v0  ;;  %908 = vmatprep.subr.bf16.mxu1 (!%p165_p3), %v964_v0  ;;  %p209_p6 = scmp.lt.s32.totalorder (!%p165_p3), %s753_s21, 15  ;;  %v967_v3 = vld [vmem:[%s1155_s1 + $0x18] sm:$0xff] (!%p165_p3)   ;;  %v968_v5 = vld [vmem:[%s1155_s1 + $0x20] sm:$0xff] (!%p165_p3)   ;;  %v969_v7 = vld [vmem:[%s1155_s1 + $0x28] sm:$0xff] (!%p165_p3)   ;;  %p230_p7 = scmp.lt.s32.totalorder (!%p165_p3), %s1002_s12, 1 }
   0xb   : > { %877 = vmatpush3.bf16.msra.mxu0 (!%p165_p3), %v964_v0  ;;  %916 = vmatpush3.bf16.msra.mxu1 (!%p165_p3), %v964_v0  ;;  %v970_v8 = vld [vmem:[%s1155_s1 + $0x30] sm:$0xff] (!%p165_p3)   ;;  %v971_v9 = vld [vmem:[%s1155_s1 + $0x38] sm:$0xff] (!%p165_p3)  }
   0xc   : > { %878 = vmatprep.subr.bf16.mxu0 (!%p165_p3), %v965_v1  ;;  %909 = vmatprep.subr.bf16.mxu1 (!%p165_p3), %v965_v1 }
   0xf   : > { %879 = vmatpush3.bf16.msra.mxu0 (!%p165_p3), %v965_v1  ;;  %917 = vmatpush3.bf16.msra.mxu1 (!%p165_p3), %v965_v1 }
  0x10   : > { %s1169_s13 = smov (!%p207_p5, %s1006_s13), 1  ;;  %s1171_s21 = smov (!%p209_p6, %s753_s21), 15  ;;  %880 = vmatprep.subr.bf16.mxu0 %v966_v2  ;;  %910 = vmatprep.subr.bf16.mxu1 %v966_v2 }
  0x11   : > { %s755_s26 = sshll.u32 %s1169_s13, 5  ;;  %s754_s27 = sshll.u32 %s1171_s21, 1 }
  0x12   : > { %s1085_s28 = sadd.s32 %s755_s26, %s754_s27  ;;  %s1173_s12 = smov (!%p230_p7, %s1002_s12), 1 }
  0x13   : > { %s756_s4 = sshll.u32 %s1085_s28, 2  ;;  %881 = vmatpush3.bf16.msra.mxu0 %v966_v2  ;;  %918 = vmatpush3.bf16.msra.mxu1 %v966_v2  ;;  %s761_s26 = sshll.u32 %s1169_s13, 1 }
  0x14   : > { %s1096_s7 = scalar_lea.vmem %s1154_s0, %s756_s4  ;;  %882 = vmatprep.subr.bf16.mxu0 %v967_v3  ;;  %911 = vmatprep.subr.bf16.mxu1 %v967_v3  ;;  %s1123_s25 = scalar_lea.vmem %s1156_s2, %s756_s4 }
  0x15   : > { %v972_v4 = vld [vmem:[%s1096_s7] sm:$0xff]   ;;  %v973_v10 = vld [vmem:[%s1096_s7 + $0x8] sm:$0xff]   ;;  %v974_v12 = vld [vmem:[%s1096_s7 + $0x10] sm:$0xff]   ;;  %s233_s27 = sadd.s32 %s761_s26, %s1173_s12 }
  0x16   : > { %892 = vmatprep.mubr.bf16.mxu0 %v972_v4  ;;  %v976_v6 = vld [vmem:[%s1096_s7 + $0x20] sm:$0xff]   ;;  %v977_v11 = vld [vmem:[%s1096_s7 + $0x28] sm:$0xff]   ;;  %v978_v13 = vld [vmem:[%s1096_s7 + $0x30] sm:$0xff]   ;;  %s762_s28 = sshll.u32 %s233_s27, 1 }
  0x17   : > { %883 = vmatpush3.bf16.msra.mxu0 %v967_v3  ;;  %919 = vmatpush3.bf16.msra.mxu1 %v967_v3  ;;  %v975_v14 = vld [vmem:[%s1096_s7 + $0x18] sm:$0xff]   ;;  %s235_s4 = scalar_lea.vmem %s1157_s3, %s762_s28 }
  0x18   : > { %884 = vmatprep.subr.bf16.mxu0 %v968_v5  ;;  %912 = vmatprep.subr.bf16.mxu1 %v968_v5  ;;  %v979_v15 = vld [vmem:[%s1096_s7 + $0x38] sm:$0xff]  }
  0x19   : > { %900 = vmatprep.mubr.bf16.mxu1 %v976_v6 }
  0x1b   : > { %885 = vmatpush3.bf16.msra.mxu0 %v968_v5  ;;  %920 = vmatpush3.bf16.msra.mxu1 %v968_v5 }
  0x1c   : > { %886 = vmatprep.subr.bf16.mxu0 %v969_v7  ;;  %913 = vmatprep.subr.bf16.mxu1 %v969_v7 }
  0x1f   : > { %887 = vmatpush3.bf16.msra.mxu0 %v969_v7  ;;  %921 = vmatpush3.bf16.msra.mxu1 %v969_v7 }
  0x20   : > { %888 = vmatprep.subr.bf16.mxu0 %v970_v8  ;;  %914 = vmatprep.subr.bf16.mxu1 %v970_v8 }
  0x23   : > { %889 = vmatpush3.bf16.msra.mxu0 %v970_v8  ;;  %922 = vmatpush3.bf16.msra.mxu1 %v970_v8 }
  0x24   : > { %890 = vmatprep.subr.bf16.mxu0 %v971_v9  ;;  %915 = vmatprep.subr.bf16.mxu1 %v971_v9 }
  0x27   : > { %891 = vmatpush3.bf16.msra.mxu0 %v971_v9  ;;  %923 = vmatpush3.bf16.msra.mxu1 %v971_v9 }
  0x2a   : > { %893 = vmatmul.mubr.bf16.vlgmr.msra.gmra.mrb[0].mxu0 %v973_v10  ;;  %901 = vmatmul.mubr.bf16.vlgmr.msra.gmra.mrb[0].mxu1 %v977_v11 }
  0x2b   : > { %896 = vmatprep.mubr.bf16.mxu0 %v974_v12  ;;  %904 = vmatprep.mubr.bf16.mxu1 %v978_v13 }
  0x32   : > { %897 = vmatmul.mubr.bf16.gmra.mrb[4].mxu0 %v975_v14  ;;  %905 = vmatmul.mubr.bf16.gmra.mrb[4].mxu1 %v979_v15 }
  0xfd   : > { %v894_v16 = vpop.f32.mrb[0].mxu0  ;;  %v902_v17 = vpop.f32.mrb[0].mxu1 }
  0xfe   : > { %v399_v18 = vpop.f32.mrb[1].mxu0  ;;  %v431_v19 = vpop.f32.mrb[1].mxu1  ;;  %v566_v31 = vmul.f32 %v894_v16, %v894_v16  ;;  %v574_v3 = vmul.f32 %v902_v17, %v902_v17 }
  0xff   : > { %v895_v20 = vpop.f32.mrb[2].mxu0  ;;  %v903_v21 = vpop.f32.mrb[2].mxu1  ;;  %v564_v22 = vmul.f32 %v399_v18, %v399_v18  ;;  %v572_v61 = vmul.f32 %v431_v19, %v431_v19 }
 0x100   : > { %v821_v23 = vpack.c.bf16 %v895_v20, %v894_v16  ;;  %v402_v24 = vpop.f32.mrb[3].mxu0  ;;  %v841_v25 = vpack.c.bf16 %v903_v21, %v902_v17  ;;  %v434_v26 = vpop.f32.mrb[3].mxu1  ;;  %v567_v34 = vmul.f32 %v895_v20, %v895_v20  ;;  %v575_v6 = vmul.f32 %v903_v21, %v903_v21 }
 0x101   : > { %v816_v27 = vpack.c.bf16 %v402_v24, %v399_v18  ;;  %v542_v28 = vadd.f32 %v402_v24, %v399_v18  ;;  %v565_v29 = vmul.f32 %v402_v24, %v402_v24  ;;  %v836_v30 = vpack.c.bf16 %v434_v26, %v431_v19 }
 0x102   : > { %853 = vst [vmem:[%s1123_s25 + $0x8] sm:$0xff] %v821_v23   ;;  %857 = vst [vmem:[%s1123_s25 + $0x28] sm:$0xff] %v841_v25   ;;  %v573_v2 = vmul.f32 %v434_v26, %v434_v26 }
 0x103   : > { %817 = vst [vmem:[%s1123_s25] sm:$0xff] %v816_v27   ;;  %v543_v32 = vadd.f32 %v894_v16, %v542_v28  ;;  %v580_v33 = vadd.f32 %v565_v29, %v564_v22  ;;  %856 = vst [vmem:[%s1123_s25 + $0x20] sm:$0xff] %v836_v30  }
 0x105   : > { %v581_v35 = vadd.f32 %v580_v33, %v566_v31  ;;  %v898_v36 = vpop.f32.mrb[4].mxu0  ;;  %v544_v37 = vadd.f32 %v895_v20, %v543_v32  ;;  %v906_v38 = vpop.f32.mrb[4].mxu1 }
 0x106   : > { %v415_v39 = vpop.f32.mrb[5].mxu0  ;;  %v447_v40 = vpop.f32.mrb[5].mxu1  ;;  %v570_v55 = vmul.f32 %v898_v36, %v898_v36  ;;  %v578_v15 = vmul.f32 %v906_v38, %v906_v38 }
 0x107   : > { %v545_v41 = vadd.f32 %v544_v37, %v415_v39  ;;  %v568_v42 = vmul.f32 %v415_v39, %v415_v39  ;;  %v582_v43 = vadd.f32 %v581_v35, %v567_v34  ;;  %v899_v44 = vpop.f32.mrb[6].mxu0  ;;  %v907_v45 = vpop.f32.mrb[6].mxu1  ;;  %v576_v9 = vmul.f32 %v447_v40, %v447_v40 }
 0x108   : > { %v831_v46 = vpack.c.bf16 %v899_v44, %v898_v36  ;;  %v418_v47 = vpop.f32.mrb[7].mxu0  ;;  %v851_v48 = vpack.c.bf16 %v907_v45, %v906_v38  ;;  %v450_v49 = vpop.f32.mrb[7].mxu1  ;;  %v571_v58 = vmul.f32 %v899_v44, %v899_v44 }
 0x109   : > { %v583_v50 = vadd.f32 %v582_v43, %v568_v42  ;;  %v826_v51 = vpack.c.bf16 %v418_v47, %v415_v39  ;;  %v546_v52 = vadd.f32 %v545_v41, %v418_v47  ;;  %v569_v53 = vmul.f32 %v418_v47, %v418_v47 }
 0x10a   : > { %855 = vst [vmem:[%s1123_s25 + $0x18] sm:$0xff] %v831_v46   ;;  %859 = vst [vmem:[%s1123_s25 + $0x38] sm:$0xff] %v851_v48   ;;  %v846_v54 = vpack.c.bf16 %v450_v49, %v447_v40  ;;  %v577_v14 = vmul.f32 %v450_v49, %v450_v49 }
 0x10b   : > { %854 = vst [vmem:[%s1123_s25 + $0x10] sm:$0xff] %v826_v51   ;;  %v547_v56 = vadd.f32 %v898_v36, %v546_v52  ;;  %v584_v57 = vadd.f32 %v583_v50, %v569_v53 }
 0x10c   : > { %858 = vst [vmem:[%s1123_s25 + $0x30] sm:$0xff] %v846_v54  }
 0x10d   : > { %v585_v59 = vadd.f32 %v584_v57, %v570_v55  ;;  %v548_v60 = vadd.f32 %v899_v44, %v547_v56 }
 0x10f   : > { %v549_v62 = vadd.f32 %v548_v60, %v431_v19  ;;  %v586_v63 = vadd.f32 %v585_v59, %v571_v58  ;;  %v579_v19 = vmul.f32 %v907_v45, %v907_v45 }
 0x111   : > { %v587_v0 = vadd.f32 %v586_v63, %v572_v61  ;;  %v550_v1 = vadd.f32 %v549_v62, %v434_v26 }
 0x113   : > { %v551_v4 = vadd.f32 %v902_v17, %v550_v1  ;;  %v588_v5 = vadd.f32 %v587_v0, %v573_v2 }
 0x115   : > { %v589_v7 = vadd.f32 %v588_v5, %v574_v3  ;;  %v552_v8 = vadd.f32 %v903_v21, %v551_v4 }
 0x117   : > { %v553_v10 = vadd.f32 %v552_v8, %v447_v40  ;;  %v590_v11 = vadd.f32 %v589_v7, %v575_v6 }
 0x119   : > { %v591_v12 = vadd.f32 %v590_v11, %v576_v9  ;;  %v554_v13 = vadd.f32 %v553_v10, %v450_v49 }
 0x11b   : > { %v555_v16 = vadd.f32 %v906_v38, %v554_v13  ;;  %v592_v18 = vadd.f32 %v591_v12, %v577_v14 }
 0x11d   : > { %v556_v20 = vadd.f32 %v907_v45, %v555_v16  ;;  %v593_v22 = vadd.f32 %v592_v18, %v578_v15 }
 0x11f   : > { %v557_v17 = vrot.slane %v556_v20, 4  ;;  %v594_v23 = vadd.f32 %v593_v22, %v579_v19 }
 0x121   : > { %v558_v24 = vadd.f32 %v557_v17, %v556_v20  ;;  %v595_v25 = vrot.slane %v594_v23, 4 }
 0x123   : > { %v559_v21 = vrot.slane %v558_v24, 2  ;;  %v596_v26 = vadd.f32 %v595_v25, %v594_v23 }
 0x125   : > { %v560_v27 = vadd.f32 %v559_v21, %v558_v24  ;;  %v597_v28 = vrot.slane %v596_v26, 2 }
 0x127   : > { %v561_v29 = vrot.slane %v560_v27, 1  ;;  %v598_v30 = vadd.f32 %v597_v28, %v596_v26 }
 0x129   : > { %v562_v31 = vadd.f32 %v561_v29, %v560_v27  ;;  %v599_v32 = vrot.slane %v598_v30, 1 }
 0x12b   : > { %563 = vst [vmem:[%s235_s4] sm:$0x1] %v562_v31  ;;  %v600_v33 = vadd.f32 %v599_v32, %v598_v30 }
 0x12d   : > { %601 = vst [vmem:[%s235_s4 + $0x1] sm:$0x1] %v600_v33 }
 0x12e PF: > { %s14_s16 = sadd.s32 1, %s1018_s16   ;;  %s1158_s12 = smov %s1010_s14 }
 0x12f   : > { %p11_p8 = scmp.ge.s32.totalorder %s14_s16, 6   ;;  %s1159_s13 = smov %s1014_s15 }
 0x130   : > { %s1160_s14 = smov %s1163_s17  ;;  %s1161_s15 = smov %s1167_s18 }
 0x131   :  { %13 = sbr.rel (!%p11_p8) target bundleno = 3 (0x3), region = 70 }

// kernel: bottleneck_ibn_forward.7
= control target key start
LH: loop header
LB: loop body
LE: loop exit
PB: predicated region body
PF: predicated region fallthrough
CT: control target
= control target key end

     0   :  { %s906_s15 = smov 0   ;;  %s908_s16 = smov 0   ;;  %s1009_s0 = inlined_call_operand.vmem [shape: bf16[2,16,16,128], index: 0, kind: input, shape index: {}]   ;;  %s1010_s1 = inlined_call_operand.vmem [shape: bf16[2,16,16,128], index: 1, kind: input, shape index: {}, may-alias: {1,4}]   ;;  %s1011_s2 = inlined_call_operand.vmem [shape: f32[1,1,128], index: 2, kind: input, shape index: {}]   ;;  %s1012_s3 = inlined_call_operand.vmem [shape: f32[1,1,128], index: 3, kind: input, shape index: {}]   ;;  %s1013_s4 = inlined_call_operand.vmem [shape: bf16[2,16,16,128], index: 4, kind: output, shape index: {}, may-alias: {1,4}]  }
   0x1   :  { %s910_s17 = smov 0   ;;  %s912_s18 = smov 0  }
   0x2   :  { %s914_s19 = smov 0  }
   0x3 LB: > { %s23_s20 = sadd.s32 1, %s871_s17  ;;  %s26_s21 = sadd.s32 1, %s875_s18  ;;  %s879_s19 = sphi %s914_s19, %s14_s19   ;;  %s875_s18 = sphi %s912_s18, %s1017_s18   ;;  %s871_s17 = sphi %s910_s17, %s1016_s17   ;;  %s867_s16 = sphi %s908_s16, %s1015_s16   ;;  %s863_s15 = sphi %s906_s15, %s1014_s15  }
   0x4   : > { %p24_p0 = scmp.ge.s32.totalorder %s23_s20, 2  ;;  %p627_p1 = scmp.ge.s32.totalorder %s879_s19, 1 }
   0x5   : > { %p202_p2 = scmp.lt.s32.totalorder %s879_s19, 5 }
   0x6   : > { %s1019_s20 = smov (%p24_p0, %s23_s20), 0  ;;  %s1021_s21 = smov (!%p24_p0, %s26_s21), %s875_s18 }
   0x7   : > { %p203_p3 = pnand %p627_p1, %p202_p2  ;;  %p28_p4 = scmp.ge.s32.totalorder %s1021_s21, 2 }
   0x8   : > { %s628_s22 = sshll.u32 (!%p203_p3), %s863_s15, 3  ;;  %p249_p5 = scmp.lt.s32.totalorder (!%p203_p3), %s867_s16, 1  ;;  %v640_v36 = vld [vmem:[%s1011_s2] ss:$0 sm:$0xff] (!%p203_p3) }
   0x9   : > { %s1023_s21 = smov (%p28_p4, %s1021_s21), 0  ;;  %206 = sbr.rel (%p203_p3) target bundleno = 52 (0x34), region = 36 }
   0xa   : > { %p251_p6 = scmp.lt.s32.totalorder (!%p203_p3), %s628_s22, 15  ;;  %v641_v53 = vld [vmem:[%s1012_s3] ss:$0 sm:$0xff] (!%p203_p3) }
  0x10   : > { %s1025_s16 = smov (!%p249_p5, %s867_s16), 1  ;;  %s1027_s22 = smov (!%p251_p6, %s628_s22), 15 }
  0x11   : > { %s630_s23 = sshll.u32 %s1025_s16, 5  ;;  %s629_s24 = sshll.u32 %s1027_s22, 1 }
  0x12   : > { %s255_s25 = sadd.s32 %s630_s23, %s629_s24 }
  0x13   : > { %s936_s26 = sshll.u32 %s255_s25, 2 }
  0x14   : > { %s257_s29 = scalar_lea.vmem %s1009_s0, %s936_s26  ;;  %s946_s6 = scalar_lea.vmem %s1010_s1, %s936_s26 }
  0x15   : > { %v677_v0 = vld [vmem:[%s257_s29] sm:$0xff]   ;;  %v780_v1 = vld [vmem:[%s257_s29 + $0x8] sm:$0xff]   ;;  %v781_v2 = vld [vmem:[%s257_s29 + $0x10] sm:$0xff]   ;;  %s279_s13 = scalar_lea.vmem %s1013_s4, %s936_s26 }
  0x16   : > { %v678_v3 = vunpack.c.l.bf16 %v677_v0  ;;  %v679_v4 = vunpack.c.h.bf16 %v677_v0  ;;  %v682_v5 = vunpack.c.l.bf16 %v780_v1  ;;  %v683_v6 = vunpack.c.h.bf16 %v780_v1  ;;  %v782_v7 = vld [vmem:[%s257_s29 + $0x18] sm:$0xff]   ;;  %v783_v8 = vld [vmem:[%s257_s29 + $0x20] sm:$0xff]   ;;  %v784_v9 = vld [vmem:[%s257_s29 + $0x28] sm:$0xff]  }
  0x17   : > { %v686_v10 = vunpack.c.l.bf16 %v781_v2  ;;  %v687_v11 = vunpack.c.h.bf16 %v781_v2  ;;  %v690_v12 = vunpack.c.l.bf16 %v782_v7  ;;  %v691_v13 = vunpack.c.h.bf16 %v782_v7  ;;  %v785_v14 = vld [vmem:[%s257_s29 + $0x30] sm:$0xff]   ;;  %v786_v15 = vld [vmem:[%s257_s29 + $0x38] sm:$0xff]   ;;  %v949_v16 = vld [vmem:[%s946_s6] sm:$0xff]  }
  0x18   : > { %v694_v17 = vunpack.c.l.bf16 %v783_v8  ;;  %v695_v18 = vunpack.c.h.bf16 %v783_v8  ;;  %v698_v19 = vunpack.c.l.bf16 %v784_v9  ;;  %v699_v20 = vunpack.c.h.bf16 %v784_v9  ;;  %v952_v21 = vld [vmem:[%s946_s6 + $0x8] sm:$0xff]   ;;  %v955_v22 = vld [vmem:[%s946_s6 + $0x10] sm:$0xff]   ;;  %v958_v23 = vld [vmem:[%s946_s6 + $0x18] sm:$0xff]  }
  0x19   : > { %v702_v24 = vunpack.c.l.bf16 %v785_v14  ;;  %v703_v25 = vunpack.c.h.bf16 %v785_v14  ;;  %v706_v26 = vunpack.c.l.bf16 %v786_v15  ;;  %v707_v27 = vunpack.c.h.bf16 %v786_v15  ;;  %v961_v28 = vld [vmem:[%s946_s6 + $0x20] sm:$0xff]   ;;  %v964_v29 = vld [vmem:[%s946_s6 + $0x28] sm:$0xff]   ;;  %v792_v34 = vld [vmem:[%s946_s6 + $0x30] sm:$0xff]  }
  0x1a   : > { %v710_v30 = vunpack.c.l.bf16 %v949_v16  ;;  %v711_v31 = vunpack.c.h.bf16 %v949_v16  ;;  %v714_v32 = vunpack.c.l.bf16 %v952_v21  ;;  %v715_v33 = vunpack.c.h.bf16 %v952_v21  ;;  %v972_v35 = vld [vmem:[%s946_s6 + $0x38] sm:$0xff]  }
  0x1b   : > { %v718_v37 = vunpack.c.l.bf16 %v955_v22  ;;  %v719_v38 = vunpack.c.h.bf16 %v955_v22  ;;  %v722_v39 = vunpack.c.l.bf16 %v958_v23  ;;  %v723_v40 = vunpack.c.h.bf16 %v958_v23 }
  0x1c   : > { %v726_v41 = vunpack.c.l.bf16 %v961_v28  ;;  %v727_v42 = vunpack.c.h.bf16 %v961_v28  ;;  %v730_v43 = vunpack.c.l.bf16 %v964_v29  ;;  %v731_v44 = vunpack.c.h.bf16 %v964_v29 }
  0x1d   : > { %v734_v45 = vunpack.c.l.bf16 %v792_v34  ;;  %v735_v46 = vunpack.c.h.bf16 %v792_v34  ;;  %v738_v47 = vunpack.c.l.bf16 %v972_v35  ;;  %v739_v48 = vunpack.c.h.bf16 %v972_v35 }
  0x1e   : > { %v353_v49 = vmul.f32 %v678_v3, %v640_v36  ;;  %v354_v50 = vmul.f32 %v679_v4, %v640_v36  ;;  %v355_v51 = vmul.f32 %v682_v5, %v640_v36  ;;  %v356_v52 = vmul.f32 %v683_v6, %v640_v36 }
  0x1f   : > { %v357_v54 = vmul.f32 %v686_v10, %v640_v36  ;;  %v358_v55 = vmul.f32 %v687_v11, %v640_v36  ;;  %v359_v56 = vmul.f32 %v690_v12, %v640_v36  ;;  %v360_v57 = vmul.f32 %v691_v13, %v640_v36 }
  0x20   : > { %v361_v58 = vmul.f32 %v694_v17, %v640_v36  ;;  %v362_v59 = vmul.f32 %v695_v18, %v640_v36  ;;  %v363_v60 = vmul.f32 %v698_v19, %v640_v36  ;;  %v364_v61 = vmul.f32 %v699_v20, %v640_v36 }
  0x21   : > { %v365_v62 = vmul.f32 %v702_v24, %v640_v36  ;;  %v366_v63 = vmul.f32 %v703_v25, %v640_v36  ;;  %v367_v0 = vmul.f32 %v706_v26, %v640_v36  ;;  %v368_v1 = vmul.f32 %v707_v27, %v640_v36 }
  0x22   : > { %v375_v2 = vadd.f32 %v641_v53, %v353_v49  ;;  %v376_v3 = vadd.f32 %v641_v53, %v354_v50  ;;  %v377_v4 = vadd.f32 %v641_v53, %v355_v51  ;;  %v378_v5 = vadd.f32 %v641_v53, %v356_v52 }
  0x23   : > { %v379_v6 = vadd.f32 %v641_v53, %v357_v54  ;;  %v380_v7 = vadd.f32 %v641_v53, %v358_v55  ;;  %v381_v8 = vadd.f32 %v641_v53, %v359_v56  ;;  %v382_v9 = vadd.f32 %v641_v53, %v360_v57 }
  0x24   : > { %v383_v10 = vadd.f32 %v641_v53, %v361_v58  ;;  %v384_v11 = vadd.f32 %v641_v53, %v362_v59  ;;  %v385_v12 = vadd.f32 %v641_v53, %v363_v60  ;;  %v386_v13 = vadd.f32 %v641_v53, %v364_v61 }
  0x25   : > { %v387_v14 = vadd.f32 %v641_v53, %v365_v62  ;;  %v388_v15 = vadd.f32 %v641_v53, %v366_v63  ;;  %v389_v16 = vadd.f32 %v641_v53, %v367_v0  ;;  %v390_v17 = vadd.f32 %v641_v53, %v368_v1 }
  0x26   : > { %v391_v18 = vadd.f32 %v710_v30, %v375_v2  ;;  %v392_v19 = vadd.f32 %v711_v31, %v376_v3  ;;  %v393_v20 = vadd.f32 %v714_v32, %v377_v4  ;;  %v394_v21 = vadd.f32 %v715_v33, %v378_v5 }
  0x27   : > { %v395_v22 = vadd.f32 %v718_v37, %v379_v6  ;;  %v396_v23 = vadd.f32 %v719_v38, %v380_v7  ;;  %v397_v24 = vadd.f32 %v722_v39, %v381_v8  ;;  %v398_v25 = vadd.f32 %v723_v40, %v382_v9 }
  0x28   : > { %v399_v26 = vadd.f32 %v726_v41, %v383_v10  ;;  %v400_v27 = vadd.f32 %v727_v42, %v384_v11  ;;  %v401_v28 = vadd.f32 %v730_v43, %v385_v12  ;;  %v402_v29 = vadd.f32 %v731_v44, %v386_v13 }
  0x29   : > { %v403_v34 = vadd.f32 %v734_v45, %v387_v14  ;;  %v404_v35 = vadd.f32 %v735_v46, %v388_v15  ;;  %v405_v36 = vadd.f32 %v738_v47, %v389_v16  ;;  %v406_v49 = vadd.f32 %v739_v48, %v390_v17 }
  0x2a   : > { %v407_v50 = vmax.f32 %v391_v18, 0.0  ;;  %v408_v51 = vmax.f32 %v392_v19, 0.0  ;;  %v409_v52 = vmax.f32 %v393_v20, 0.0  ;;  %v410_v30 = vmax.f32 %v394_v21, 0.0 }
  0x2b   : > { %v411_v31 = vmax.f32 %v395_v22, 0.0  ;;  %v412_v32 = vmax.f32 %v396_v23, 0.0  ;;  %v413_v33 = vmax.f32 %v397_v24, 0.0  ;;  %v414_v37 = vmax.f32 %v398_v25, 0.0 }
  0x2c   : > { %v743_v38 = vpack.c.bf16 %v408_v51, %v407_v50  ;;  %v748_v39 = vpack.c.bf16 %v410_v30, %v409_v52  ;;  %v415_v40 = vmax.f32 %v399_v26, 0.0  ;;  %v416_v41 = vmax.f32 %v400_v27, 0.0 }
  0x2d   : > { %v753_v42 = vpack.c.bf16 %v412_v32, %v411_v31  ;;  %v758_v43 = vpack.c.bf16 %v414_v37, %v413_v33  ;;  %v417_v44 = vmax.f32 %v401_v28, 0.0  ;;  %v418_v45 = vmax.f32 %v402_v29, 0.0 }
  0x2e   : > { %744 = vst [vmem:[%s279_s13] sm:$0xff] %v743_v38   ;;  %794 = vst [vmem:[%s279_s13 + $0x8] sm:$0xff] %v748_v39   ;;  %v763_v46 = vpack.c.bf16 %v416_v41, %v415_v40  ;;  %v419_v47 = vmax.f32 %v403_v34, 0.0  ;;  %v420_v48 = vmax.f32 %v404_v35, 0.0  ;;  %v421_v53 = vmax.f32 %v405_v36, 0.0 }
  0x2f   : > { %795 = vst [vmem:[%s279_s13 + $0x10] sm:$0xff] %v753_v42   ;;  %796 = vst [vmem:[%s279_s13 + $0x18] sm:$0xff] %v758_v43   ;;  %v768_v54 = vpack.c.bf16 %v418_v45, %v417_v44  ;;  %v422_v55 = vmax.f32 %v406_v49, 0.0 }
  0x30   : > { %797 = vst [vmem:[%s279_s13 + $0x20] sm:$0xff] %v763_v46   ;;  %v773_v56 = vpack.c.bf16 %v420_v48, %v419_v47 }
  0x31   : > { %798 = vst [vmem:[%s279_s13 + $0x28] sm:$0xff] %v768_v54   ;;  %v778_v57 = vpack.c.bf16 %v422_v55, %v421_v53 }
  0x32   : > { %799 = vst [vmem:[%s279_s13 + $0x30] sm:$0xff] %v773_v56  }
  0x33   : > { %800 = vst [vmem:[%s279_s13 + $0x38] sm:$0xff] %v778_v57  }
  0x34 PF: > { %s14_s19 = sadd.s32 1, %s879_s19   ;;  %s1014_s15 = smov %s871_s17 }
  0x35   : > { %p11_p7 = scmp.ge.s32.totalorder %s14_s19, 6   ;;  %s1015_s16 = smov %s875_s18 }
  0x36   : > { %s1016_s17 = smov %s1019_s20  ;;  %s1017_s18 = smov %s1023_s21 }
  0x37   :  { %13 = sbr.rel (!%p11_p7) target bundleno = 3 (0x3), region = 69 }

// kernel: bottleneck_ibn_forward.5
= control target key start
LH: loop header
LB: loop body
LE: loop exit
PB: predicated region body
PF: predicated region fallthrough
CT: control target
= control target key end

     0   :  { %s8147_s18 = smov 0   ;;  %s10033_s0 = inlined_call_operand.vmem [shape: bf16[2,16,16,128], index: 0, kind: input, shape index: {}]   ;;  %s10034_s1 = inlined_call_operand.vmem [shape: f32[2,1,128], index: 1, kind: input, shape index: {}]   ;;  %s10035_s2 = inlined_call_operand.vmem [shape: f32[2,1,128], index: 2, kind: input, shape index: {}]   ;;  %s10036_s3 = inlined_call_operand.vmem [shape: bf16[3,3,128,128], index: 3, kind: input, shape index: {}]   ;;  %s10037_s4 = inlined_call_operand.vmem [shape: bf16[2,16,16,128], index: 4, kind: output, shape index: {0}]   ;;  %s10038_s5 = inlined_call_operand.vmem [shape: f32[2,1,2,128], index: 5, kind: output, shape index: {1}]  }
   0x1 LB: > { %s6260_s19 = sadd.s32 4294967295, %s8114_s18   ;;  %p6264_p0 = scmp.ge.s32.totalorder %s8114_s18, 1  ;;  %s8114_s18 = sphi %s8147_s18, %s16_s18  }
   0x2   : > { %p206_p1 = scmp.lt.s32.totalorder %s8114_s18, 3 }
   0x4   : > { %p207_p2 = pnand %p6264_p0, %p206_p1 }
   0x6   : > { %210 = sbr.rel (%p207_p2) target bundleno = 713 (0x2c9), region = 36 }
   0xd   : > { %v7899_v0 = vld [vmem:[%s10036_s3 + $0x40] sm:$0xff]   ;;  %v8116_v2 = vmov 0   ;;  %v7901_v3 = vld [vmem:[%s10036_s3 + $0x48] sm:$0xff]   ;;  %v7903_v5 = vld [vmem:[%s10036_s3 + $0x50] sm:$0xff]   ;;  %p244_p3 = scmp.lt.s32.totalorder %s6260_s19, 1  ;;  %vm463_vm2 = vcmask 1040384  }
   0xe   : > { %v7900_v1 = vld [vmem:[%s10036_s3 + $0x100] sm:$0xff]   ;;  %455 = vst [vmem:[#allocation2] sm:$0xf] %v8116_v2  ;;  %456 = vst [vmem:[#allocation2 + $0x4] sm:$0xf] %v8116_v2  ;;  %7186 = vmatprep.subr.bf16.mxu1 %v7899_v0  ;;  %v7902_v4 = vld [vmem:[%s10036_s3 + $0x108] sm:$0xff]  }
   0xf   : > { %457 = vst [vmem:[#allocation2 + $0x8] sm:$0x1] %v8116_v2  ;;  %459 = vst [vmem:[#allocation2 + $0xcc] sm:$0xf] %v8116_v2  ;;  %7378 = vmatprep.subr.bf16.mxu0 %v7900_v1  ;;  %7187 = vmatpush3.bf16.msra.mxu1 %v7899_v0  ;;  %v7904_v6 = vld [vmem:[%s10036_s3 + $0x110] sm:$0xff]   ;;  %v7905_v7 = vld [vmem:[%s10036_s3 + $0x58] sm:$0xff]  }
  0x10   : > { %460 = vst [vmem:[#allocation2 + $0xd0] sm:$0xf] %v8116_v2  ;;  %461 = vst [vmem:[#allocation2 + $0xd4] sm:$0x1] %v8116_v2  ;;  %7379 = vmatpush3.bf16.msra.mxu0 %v7900_v1  ;;  %7188 = vmatprep.subr.bf16.mxu1 %v7901_v3  ;;  %s10111_s19 = smov (!%p244_p3, %s6260_s19), 1  ;;  %v7906_v8 = vld [vmem:[%s10036_s3 + $0x118] sm:$0xff]  }
  0x11   : > { %7380 = vmatprep.subr.bf16.mxu0 %v7902_v4  ;;  %v7907_v9 = vld [vmem:[%s10036_s3 + $0x60] sm:$0xff]   ;;  %s6730_s13 = sshll.u32 %s10111_s19, 7  ;;  %v7909_v11 = vld [vmem:[%s10036_s3 + $0x68] sm:$0xff]   ;;  %s8205_s27 = scalar_lea.vmem %s10034_s1, %s10111_s19  ;;  %vm1144_vm0 = vsmask.f32 3328  ;;  %v7911_v18 = vld [vmem:[%s10036_s3 + $0x70] sm:$0xff]  }
  0x12   : > { %v7908_v10 = vld [vmem:[%s10036_s3 + $0x120] sm:$0xff]   ;;  %v7910_v12 = vld [vmem:[%s10036_s3 + $0x128] sm:$0xff]   ;;  %s8199_s24 = scalar_lea.vmem %s10033_s0, %s6730_s13  ;;  %s8211_s30 = scalar_lea.vmem %s10035_s2, %s10111_s19  ;;  %vm1145_vm1 = vsmask.f32 7440  ;;  %v7912_v29 = vld [vmem:[%s10036_s3 + $0x130] sm:$0xff]   ;;  %vm966_vm5 = vcmask 1043456  }
  0x13   : > { %7189 = vmatpush3.bf16.msra.mxu1 %v7901_v3  ;;  %v6797_v22 = vld [vmem:[%s8199_s24] sm:$0xff]   ;;  %vm8228_vm3 = vmor %vm1144_vm0, %vm1145_vm1  ;;  %vm464_vm4 = vsmask.f32 256  ;;  %v466_v38 = vld [vmem:[#allocation2 + $0xc] sm:$0x1]  ;;  %vm2174_vm12 = vcmask 1042432   ;;  %s10004_s23 = scalar_lea.vmem %s10037_s4, %s6730_s13 }
  0x14   : > { %7381 = vmatpush3.bf16.msra.mxu0 %v7902_v4  ;;  %7190 = vmatprep.subr.bf16.mxu1 %v7903_v5  ;;  %v6798_v25 = vunpack.c.l.bf16 %v6797_v22  ;;  %v6799_v26 = vunpack.c.h.bf16 %v6797_v22  ;;  %v8218_v27 = vld [vmem:[%s8205_s27] ss:$0 sm:$0xff]  ;;  %vm8236_vm6 = vmand %vm463_vm2, %vm464_vm4  ;;  %vm514_vm7 = vsmask.f32 7938  ;;  %v516_v39 = vld [vmem:[#allocation2 + $0x14] sm:$0x1] }
  0x15   : > { %7382 = vmatprep.subr.bf16.mxu0 %v7904_v6  ;;  %v1080_v13 = vld [vmem:[#allocation2] sm:$0xf]  ;;  %v1081_v14 = vld [vmem:[#allocation2 + $0x4] sm:$0xf]  ;;  %v467_v41 = vsel %vm8236_vm6, 0, %v466_v38  ;;  %vm8244_vm8 = vmand %vm463_vm2, %vm514_vm7  ;;  %vm2175_vm13 = vcmask 1046532  }
  0x16   : > { %v1128_v15 = vld [vmem:[#allocation2 + $0x8] sm:$0x1]  ;;  %v1148_v16 = vshrl.u32 %v1080_v13, 16  ;;  %v1151_v17 = vshll.u32 %v1080_v13, 16  ;;  %v1157_v19 = vshll.u32 %v1081_v14, 16  ;;  %v1161_v20 = vshrl.u32 %v1081_v14, 16  ;;  %vm8295_vm11 = vmand %vm966_vm5, %vm514_vm7 }
  0x17   : > { %7191 = vmatpush3.bf16.msra.mxu1 %v7903_v5  ;;  %v1167_v21 = vshll.u32 %v1128_v15, 16  ;;  %v8221_v28 = vld [vmem:[%s8211_s30] ss:$0 sm:$0xff]  ;;  %v337_v35 = vmul.f32 %v6798_v25, %v8218_v27  ;;  %v338_v36 = vmul.f32 %v6799_v26, %v8218_v27  ;;  %vm644_vm9 = vsmask.f32 4368  ;;  %v6940_v43 = vld [vmem:[%s8199_s24 + $0x8] sm:$0xff]   ;;  %vm8630_vm14 = vmor %vm2174_vm12, %vm2175_vm13 }
  0x18   : > { %7383 = vmatpush3.bf16.msra.mxu0 %v7904_v6  ;;  %7192 = vmatprep.subr.bf16.mxu1 %v7905_v7  ;;  %v1150_v23 = vrot.slane %v1148_v16, 4  ;;  %v1153_v24 = vrot.slane %v1151_v17, 5  ;;  %v1159_v31 = vrot.slane %v1157_v19, 5  ;;  %v1163_v32 = vrot.slane %v1161_v20, 4  ;;  %468 = vst [vmem:[#allocation2 + $0xc] sm:$0x1] %v467_v41  ;;  %vm8286_vm10 = vmor %vm464_vm4, %vm644_vm9 }
  0x19   : > { %7384 = vmatprep.subr.bf16.mxu0 %v7906_v8  ;;  %v1169_v33 = vrot.slane %v1167_v21, 5  ;;  %v375_v45 = vadd.f32 %v8221_v28, %v337_v35  ;;  %v376_v46 = vadd.f32 %v8221_v28, %v338_v36  ;;  %v517_v47 = vsel %vm8244_vm8, 0, %v516_v39  ;;  %v7913_v48 = vld [vmem:[%s10036_s3 + $0x78] sm:$0xff]   ;;  %v519_v58 = vld [vmem:[#allocation2 + $0x20] sm:$0x1]  ;;  %v6941_v0 = vld [vmem:[%s8199_s24 + $0x10] sm:$0xff]  }
  0x1a   : > { %v1154_v34 = vor.u32 %v1153_v24, %v1150_v23  ;;  %v1164_v40 = vor.u32 %v1163_v32, %v1159_v31  ;;  %518 = vst [vmem:[#allocation2 + $0x14] sm:$0x1] %v517_v47  ;;  %v6802_v50 = vunpack.c.l.bf16 %v6940_v43  ;;  %v6803_v51 = vunpack.c.h.bf16 %v6940_v43  ;;  %v469_v52 = vld [vmem:[#allocation2 + $0x18] sm:$0x1]  ;;  %v8268_v60 = vld [vmem:[%s10036_s3] sm:$0xff]   ;;  %v7959_v16 = vld [vmem:[%s10036_s3 + $0xa8] sm:$0xff]  }
  0x1b   : > { %7193 = vmatpush3.bf16.msra.mxu1 %v7905_v7  ;;  %v7914_v53 = vld [vmem:[%s10036_s3 + $0x138] sm:$0xff]   ;;  %v407_v55 = vmax.f32 %v375_v45, 0.0  ;;  %v408_v56 = vmax.f32 %v376_v46, 0.0  ;;  %v470_v57 = vsel %vm8236_vm6, 0, %v469_v52  ;;  %v520_v63 = vsel %vm8244_vm8, 0, %v519_v58  ;;  %v8278_v7 = vld [vmem:[%s10036_s3 + $0x140] sm:$0xff]  }
  0x1c   : > { %7385 = vmatpush3.bf16.msra.mxu0 %v7906_v8  ;;  %7194 = vmatprep.subr.bf16.mxu1 %v7907_v9  ;;  %v1155_v44 = vrot.slane %v1154_v34, 4  ;;  %v1165_v49 = vrot.slane %v1164_v40, 4  ;;  %v339_v61 = vmul.f32 %v6802_v50, %v8218_v27  ;;  %v340_v62 = vmul.f32 %v6803_v51, %v8218_v27  ;;  %471 = vst [vmem:[#allocation2 + $0x18] sm:$0x1] %v470_v57  ;;  %v472_v5 = vld [vmem:[#allocation2 + $0x24] sm:$0x1] }
  0x1d   : > { %7386 = vmatprep.subr.bf16.mxu0 %v7908_v10  ;;  %v6732_v2 = vpack.c.bf16 %v407_v55, %v407_v55  ;;  %v6733_v3 = vpack.c.bf16 %v408_v56, %v408_v56  ;;  %521 = vst [vmem:[#allocation2 + $0x20] sm:$0x1] %v520_v63  ;;  %v6806_v4 = vunpack.c.l.bf16 %v6941_v0  ;;  %v522_v6 = vld [vmem:[#allocation2 + $0x2c] sm:$0x1]  ;;  %v6942_v21 = vld [vmem:[%s8199_s24 + $0x18] sm:$0xff]   ;;  %v8318_v63 = vld [vmem:[%s8199_s24 + $0x20] sm:$0xff]  }
  0x1e   : > { %v1160_v54 = vsel %vm8228_vm3, %v1155_v44, %v1159_v31  ;;  %v1170_v59 = vsel %vm8228_vm3, %v1165_v49, %v1169_v33  ;;  %v377_v8 = vadd.f32 %v8221_v28, %v339_v61  ;;  %v523_v25 = vsel %vm8244_vm8, 0, %v522_v6  ;;  %v475_v41 = vld [vmem:[#allocation2 + $0x30] sm:$0x1]  ;;  %v525_v47 = vld [vmem:[#allocation2 + $0x38] sm:$0x1]  ;;  %s6269_s13 = sshll.u32 %s10111_s19, 1 }
  0x1f   : > { %7195 = vmatpush3.bf16.msra.mxu1 %v7907_v9  ;;  %v6320_v1 = vcombine.low %v1160_v54, %v1170_v59  ;;  %v378_v9 = vadd.f32 %v8221_v28, %v340_v62  ;;  %v650_v13 = vshll.u32 %v6732_v2, 16  ;;  %v655_v14 = vshrl.u32 %v6733_v3, 16  ;;  %524 = vst [vmem:[#allocation2 + $0x2c] sm:$0x1] %v523_v25  ;;  %v7965_v37 = vld [vmem:[%s10036_s3 + $0xb0] sm:$0xff]   ;;  %s263_s28 = scalar_lea.vmem %s10038_s5, %s6269_s13 }
  0x20   : > { %7387 = vmatpush3.bf16.msra.mxu0 %v7908_v10  ;;  %7196 = vmatprep.subr.bf16.mxu1 %v7909_v11  ;;  %v6807_v10 = vunpack.c.h.bf16 %v6941_v0  ;;  %v658_v15 = vshll.u32 %v6733_v3, 16  ;;  %v409_v17 = vmax.f32 %v377_v8, 0.0  ;;  %v341_v19 = vmul.f32 %v6806_v4, %v8218_v27 }
  0x21   : > { %7388 = vmatprep.subr.bf16.mxu0 %v7910_v12  ;;  %7202 = vmatprep.mubr.bf16.mxu1 %v6320_v1  ;;  %v657_v23 = vrot.slane %v655_v14, 7  ;;  %v6810_v26 = vunpack.c.l.bf16 %v6942_v21  ;;  %v972_v31 = vld [vmem:[#allocation2 + $0x14] sm:$0x1]  ;;  %v6811_v35 = vunpack.c.h.bf16 %v6942_v21  ;;  %v476_v61 = vsel %vm8236_vm6, 0, %v475_v41 }
  0x22   : > { %v342_v20 = vmul.f32 %v6807_v10, %v8218_v27  ;;  %v6734_v32 = vpack.c.bf16 %v409_v17, %v409_v17  ;;  %v379_v34 = vadd.f32 %v8221_v28, %v341_v19  ;;  %v526_v62 = vsel %vm8244_vm8, 0, %v525_v47  ;;  %477 = vst [vmem:[#allocation2 + $0x30] sm:$0x1] %v476_v61 }
  0x23   : > { %7197 = vmatpush3.bf16.msra.mxu1 %v7909_v11  ;;  %v473_v11 = vsel %vm8236_vm6, 0, %v472_v5  ;;  %v660_v39 = vor.u32 %v658_v15, %v657_v23  ;;  %v662_v40 = vrot.slane %v657_v23, 4  ;;  %v975_v51 = vld [vmem:[#allocation2 + $0x18] sm:$0xf]  ;;  %v343_v57 = vmul.f32 %v6810_v26, %v8218_v27  ;;  %527 = vst [vmem:[#allocation2 + $0x38] sm:$0x1] %v526_v62 }
  0x24   : > { %7389 = vmatpush3.bf16.msra.mxu0 %v7910_v12  ;;  %7198 = vmatprep.subr.bf16.mxu1 %v7911_v18  ;;  %v647_v12 = vshrl.u32 %v6732_v2, 16  ;;  %474 = vst [vmem:[#allocation2 + $0x24] sm:$0x1] %v473_v11  ;;  %v664_v43 = vshrl.u32 %v6734_v32, 16  ;;  %v667_v44 = vshll.u32 %v6734_v32, 16  ;;  %v380_v52 = vadd.f32 %v8221_v28, %v342_v20 }
  0x25   : > { %7390 = vmatprep.subr.bf16.mxu0 %v7912_v29  ;;  %v973_v50 = vsel %vm8236_vm6, %v662_v40, %v972_v31  ;;  %v979_v55 = vld [vmem:[#allocation2 + $0x20] sm:$0x1]  ;;  %v411_v56 = vmax.f32 %v379_v34, 0.0  ;;  %v344_v59 = vmul.f32 %v6811_v35, %v8218_v27  ;;  %v381_v6 = vadd.f32 %v8221_v28, %v343_v57 }
  0x26   : > { %v649_v22 = vrot.slane %v647_v12, 7  ;;  %974 = vst [vmem:[#allocation2 + $0x14] sm:$0x1] %v973_v50  ;;  %v412_v58 = vmax.f32 %v380_v52, 0.0  ;;  %v6814_v12 = vunpack.c.l.bf16 %v8318_v63  ;;  %v6815_v21 = vunpack.c.h.bf16 %v8318_v63 }
  0x27   : > { %7199 = vmatpush3.bf16.msra.mxu1 %v7911_v18  ;;  %v410_v18 = vmax.f32 %v378_v9, 0.0  ;;  %v8320_v4 = vpack.c.bf16 %v411_v56, %v411_v56  ;;  %v382_v8 = vadd.f32 %v8221_v28, %v344_v59  ;;  %v413_v19 = vmax.f32 %v381_v6, 0.0 }
  0x28   : > { %7391 = vmatpush3.bf16.msra.mxu0 %v7912_v29  ;;  %7200 = vmatprep.subr.bf16.mxu1 %v7913_v48  ;;  %v968_v29 = vld [vmem:[#allocation2 + $0xc] sm:$0xf]  ;;  %v652_v36 = vor.u32 %v650_v13, %v649_v22  ;;  %v653_v38 = vrot.slane %v649_v22, 4  ;;  %v8322_v5 = vpack.c.bf16 %v412_v58, %v412_v58  ;;  %v8342_v22 = vld [vmem:[%s8199_s24 + $0x30] sm:$0xff]  }
  0x29   : > { %7392 = vmatprep.subr.bf16.mxu0 %v7914_v53  ;;  %v6735_v33 = vpack.c.bf16 %v410_v18, %v410_v18  ;;  %v8334_v13 = vld [vmem:[%s8199_s24 + $0x28] sm:$0xff]   ;;  %v681_v14 = vshrl.u32 %v8320_v4, 16  ;;  %v684_v15 = vshll.u32 %v8320_v4, 16  ;;  %v414_v20 = vmax.f32 %v382_v8, 0.0 }
  0x2a   : > { %v969_v49 = vsel %vm8295_vm11, %v652_v36, %v968_v29  ;;  %v689_v17 = vshrl.u32 %v8322_v5, 16  ;;  %v692_v18 = vshll.u32 %v8322_v5, 16  ;;  %v8345_v29 = vmul.f32 %v6814_v12, %v8218_v27 }
  0x2b   : > { %7201 = vmatpush3.bf16.msra.mxu1 %v7913_v48  ;;  %v672_v45 = vshrl.u32 %v6735_v33, 16  ;;  %v675_v46 = vshll.u32 %v6735_v33, 16  ;;  %v661_v48 = vsel %vm8286_vm10, %v653_v38, %v660_v39  ;;  %970 = vst [vmem:[#allocation2 + $0xc] sm:$0xf] %v969_v49  ;;  %v6818_v31 = vunpack.c.l.bf16 %v8334_v13 }
  0x2c   : > { %7393 = vmatpush3.bf16.msra.mxu0 %v7914_v53  ;;  %7234 = vmatprep.subr.bf16.mxu1 %v8268_v60  ;;  %971 = vst [vmem:[#allocation2 + $0x10] sm:$0xf] %v661_v48  ;;  %v666_v53 = vrot.slane %v664_v43, 7  ;;  %v6819_v32 = vunpack.c.h.bf16 %v8334_v13  ;;  %v6822_v33 = vunpack.c.l.bf16 %v8342_v22 }
  0x2d   : > { %7426 = vmatprep.subr.bf16.mxu0 %v8278_v7  ;;  %v674_v54 = vrot.slane %v672_v45, 7  ;;  %v1129_v26 = vld [vmem:[#allocation2 + $0x14] sm:$0x1]  ;;  %v8354_v45 = vpack.c.bf16 %v414_v20, %v414_v20 }
  0x2e   : > { %v669_v0 = vor.u32 %v667_v44, %v666_v53  ;;  %v670_v1 = vrot.slane %v666_v53, 4  ;;  %v1191_v40 = vshll.u32 %v1129_v26, 16  ;;  %v8350_v43 = vld [vmem:[#allocation2 + $0x14] sm:$0x1]  ;;  %v8352_v44 = vpack.c.bf16 %v413_v19, %v413_v19 }
  0x2f   : > { %v677_v2 = vor.u32 %v675_v46, %v674_v54  ;;  %v679_v3 = vrot.slane %v674_v54, 4  ;;  %v6823_v46 = vunpack.c.h.bf16 %v8342_v22  ;;  %v3065_v58 = vshll.u32 %v8350_v43, 16 }
  0x30   : > { %v976_v10 = vsel %vm8295_vm11, %v669_v0, %v975_v51  ;;  %v1193_v51 = vrot.slane %v1191_v40, 5  ;;  %v698_v4 = vshrl.u32 %v8352_v44, 16 }
  0x31   : > { %v678_v9 = vsel %vm8286_vm10, %v670_v1, %v677_v2  ;;  %v980_v11 = vsel %vm8236_vm6, %v679_v3, %v979_v55  ;;  %977 = vst [vmem:[#allocation2 + $0x18] sm:$0xf] %v976_v10  ;;  %v3820_v2 = vrot.slane %v8350_v43, 5 }
  0x32   : > { %978 = vst [vmem:[#allocation2 + $0x1c] sm:$0xf] %v678_v9  ;;  %981 = vst [vmem:[#allocation2 + $0x20] sm:$0x1] %v980_v11  ;;  %v1082_v23 = vld [vmem:[#allocation2 + $0xc] sm:$0xf] }
  0x33   : > { %v1083_v25 = vld [vmem:[#allocation2 + $0x10] sm:$0xf]  ;;  %v1172_v34 = vshrl.u32 %v1082_v23, 16  ;;  %v1175_v35 = vshll.u32 %v1082_v23, 16  ;;  %v2997_v39 = vld [vmem:[#allocation2 + $0xc] sm:$0xf] }
  0x34   : > { %v1181_v36 = vshll.u32 %v1083_v25, 16  ;;  %v1185_v38 = vshrl.u32 %v1083_v25, 16  ;;  %v2998_v41 = vld [vmem:[#allocation2 + $0x10] sm:$0xf]  ;;  %v3046_v52 = vshrl.u32 %v2997_v39, 16  ;;  %v3049_v53 = vshll.u32 %v2997_v39, 16 }
  0x35   : > { %v1174_v47 = vrot.slane %v1172_v34, 4  ;;  %v1177_v48 = vrot.slane %v1175_v35, 5  ;;  %v3055_v54 = vshll.u32 %v2998_v41, 16  ;;  %v3059_v57 = vshrl.u32 %v2998_v41, 16 }
  0x36   : > { %v1183_v49 = vrot.slane %v1181_v36, 5  ;;  %v1187_v50 = vrot.slane %v1185_v38, 4  ;;  %v3048_v62 = vrot.slane %v3046_v52, 4  ;;  %v3051_v0 = vrot.slane %v3049_v53, 5 }
  0x37   : > { %v1178_v55 = vor.u32 %v1177_v48, %v1174_v47  ;;  %v3057_v1 = vrot.slane %v3055_v54, 5  ;;  %v3061_v8 = vrot.slane %v3059_v57, 4  ;;  %v3067_v9 = vrot.slane %v3065_v58, 5  ;;  %v7918_v47 = vld [vmem:[%s10036_s3 + $0x8] sm:$0xff]  }
  0x38   : > { %v1188_v56 = vor.u32 %v1187_v50, %v1183_v49  ;;  %v3000_v59 = vld [vmem:[#allocation2 + $0x18] sm:$0xf]  ;;  %v3052_v10 = vor.u32 %v3051_v0, %v3048_v62 }
  0x39   : > { %v8358_v61 = vld [vmem:[#allocation2 + $0x1c] sm:$0xf]  ;;  %v1179_v3 = vrot.slane %v1178_v55, 4  ;;  %v8361_v11 = vld [vmem:[#allocation2 + $0x20] sm:$0x1]  ;;  %v3070_v12 = vshrl.u32 %v3000_v59, 16  ;;  %v3062_v26 = vor.u32 %v3061_v8, %v3057_v1 }
  0x3a   : > { %v1189_v6 = vrot.slane %v1188_v56, 4  ;;  %v3073_v19 = vshll.u32 %v3000_v59, 16  ;;  %v3079_v20 = vshll.u32 %v8358_v61, 16  ;;  %v3083_v34 = vshrl.u32 %v8358_v61, 16  ;;  %v1084_v35 = vld [vmem:[#allocation2 + $0x18] sm:$0xf] }
  0x3b   : > { %v1184_v23 = vsel %vm8228_vm3, %v1179_v3, %v1183_v49  ;;  %v3053_v38 = vrot.slane %v3052_v10, 4  ;;  %v3072_v39 = vrot.slane %v3070_v12, 4  ;;  %v1085_v41 = vld [vmem:[#allocation2 + $0x1c] sm:$0xf]  ;;  %v3063_v48 = vrot.slane %v3062_v26, 4  ;;  %v7921_v8 = vld [vmem:[%s10036_s3 + $0x10] sm:$0xff]  }
  0x3c   : > { %v1194_v25 = vsel %vm8228_vm3, %v1189_v6, %v1193_v51  ;;  %v3075_v40 = vrot.slane %v3073_v19, 5  ;;  %v3081_v50 = vrot.slane %v3079_v20, 5  ;;  %v3085_v52 = vrot.slane %v3083_v34, 4  ;;  %v1130_v59 = vld [vmem:[#allocation2 + $0x20] sm:$0x1] }
  0x3d   : > { %v6321_v36 = vcombine.low %v1184_v23, %v1194_v25  ;;  %v3089_v49 = vshll.u32 %v8361_v11, 16  ;;  %v3058_v51 = vsel %vm8228_vm3, %v3053_v38, %v3057_v1  ;;  %v3824_v54 = vrot.slane %v8358_v61, 5  ;;  %v982_v26 = vld [vmem:[#allocation2 + $0x24] sm:$0xf] }
  0x3e   : > { %v3076_v53 = vor.u32 %v3075_v40, %v3072_v39  ;;  %v3827_v55 = vrot.slane %v8361_v11, 5  ;;  %v3068_v56 = vsel %vm8228_vm3, %v3063_v48, %v3067_v9  ;;  %v3086_v57 = vor.u32 %v3085_v52, %v3081_v50  ;;  %v986_v40 = vld [vmem:[#allocation2 + $0x2c] sm:$0x1]  ;;  %v7924_v52 = vld [vmem:[%s10036_s3 + $0x18] sm:$0xff]  }
  0x3f   : > { %7203 = vmatmul.mubr.bf16.vlgmr.msra.gmra.mrb[0].mxu1 %v6321_v36  ;;  %v3091_v58 = vrot.slane %v3089_v49, 5  ;;  %v1196_v62 = vshrl.u32 %v1084_v35, 16  ;;  %v6480_v0 = vcombine.low %v3058_v51, %v3068_v56  ;;  %v8382_v6 = vrot.slane %v3824_v54, 4 }
  0x40   : > { %7235 = vmatpush3.bf16.msra.mxu1 %v8268_v60  ;;  %v3077_v3 = vrot.slane %v3076_v53, 4  ;;  %v1199_v1 = vshll.u32 %v1084_v35, 16  ;;  %v3087_v10 = vrot.slane %v3086_v57, 4  ;;  %v1205_v12 = vshll.u32 %v1085_v41, 16  ;;  %v7917_v35 = vld [vmem:[%s10036_s3 + $0x148] sm:$0xff]  }
  0x41   : > { %7236 = vmatprep.subr.bf16.mxu1 %v7918_v47  ;;  %v1198_v9 = vrot.slane %v1196_v62, 4  ;;  %v1209_v60 = vshrl.u32 %v1085_v41, 16  ;;  %7394 = vmatprep.mubr.bf16.mxu0 %v6480_v0  ;;  %v1215_v23 = vshll.u32 %v1130_v59, 16  ;;  %v683_v25 = vrot.slane %v681_v14, 7  ;;  %v528_v0 = vld [vmem:[#allocation2 + $0x44] sm:$0x1] }
  0x42   : > { %v3082_v19 = vsel %vm8228_vm3, %v3077_v3, %v3081_v50  ;;  %v1201_v20 = vrot.slane %v1199_v1, 5  ;;  %v3092_v34 = vsel %vm8228_vm3, %v3087_v10, %v3091_v58  ;;  %v1207_v36 = vrot.slane %v1205_v12, 5  ;;  %v989_v1 = vld [vmem:[#allocation2 + $0x30] sm:$0xf] }
  0x43   : > { %v1211_v38 = vrot.slane %v1209_v60, 4  ;;  %v691_v39 = vrot.slane %v689_v17, 7  ;;  %v6481_v41 = vcombine.low %v3082_v19, %v3092_v34  ;;  %v1217_v50 = vrot.slane %v1215_v23, 5  ;;  %v478_v17 = vld [vmem:[#allocation2 + $0x3c] sm:$0x1] }
  0x44   : > { %7237 = vmatpush3.bf16.msra.mxu1 %v7918_v47  ;;  %v1202_v48 = vor.u32 %v1201_v20, %v1198_v9  ;;  %v686_v14 = vor.u32 %v684_v15, %v683_v25  ;;  %v687_v51 = vrot.slane %v683_v25, 4  ;;  %v701_v15 = vshll.u32 %v8352_v44, 16  ;;  %v481_v9 = vld [vmem:[#allocation2 + $0x48] sm:$0x1]  ;;  %v993_v60 = vld [vmem:[#allocation2 + $0x38] sm:$0x1] }
  0x45   : > { %7238 = vmatprep.subr.bf16.mxu1 %v7921_v8  ;;  %v1212_v49 = vor.u32 %v1211_v38, %v1207_v36  ;;  %v694_v53 = vor.u32 %v692_v18, %v691_v39  ;;  %v696_v56 = vrot.slane %v691_v39, 4  ;;  %7395 = vmatmul.mubr.bf16.vlgmr.msra.gmra.mrb[0].mxu0 %v6481_v41  ;;  %v7919_v18 = vld [vmem:[%s10036_s3 + $0x150] sm:$0xff]   ;;  %v706_v62 = vshrl.u32 %v8354_v45, 16 }
  0x46   : > { %v1203_v47 = vrot.slane %v1202_v48, 4  ;;  %v983_v57 = vsel %vm8295_vm11, %v686_v14, %v982_v26  ;;  %7427 = vmatpush3.bf16.msra.mxu0 %v8278_v7  ;;  %v700_v44 = vrot.slane %v698_v4, 7  ;;  %v709_v3 = vshll.u32 %v8354_v45, 16  ;;  %v531_v23 = vld [vmem:[#allocation2 + $0x50] sm:$0x1]  ;;  %v7927_v45 = vld [vmem:[%s10036_s3 + $0x20] sm:$0xff]  }
  0x47   : > { %v1213_v58 = vrot.slane %v1212_v49, 4  ;;  %v695_v59 = vsel %vm8286_vm10, %v687_v51, %v694_v53  ;;  %984 = vst [vmem:[#allocation2 + $0x24] sm:$0xf] %v983_v57  ;;  %v987_v5 = vsel %vm8236_vm6, %v696_v56, %v986_v40  ;;  %7428 = vmatprep.subr.bf16.mxu0 %v7917_v35  ;;  %v346_v10 = vmul.f32 %v6815_v21, %v8218_v27  ;;  %v7920_v40 = vld [vmem:[%s10036_s3 + $0x158] sm:$0xff]   ;;  %v7922_v53 = vld [vmem:[%s10036_s3 + $0x160] sm:$0xff]  }
  0x48   : > { %7239 = vmatpush3.bf16.msra.mxu1 %v7921_v8  ;;  %v1208_v7 = vsel %vm8228_vm3, %v1203_v47, %v1207_v36  ;;  %985 = vst [vmem:[#allocation2 + $0x28] sm:$0xf] %v695_v59  ;;  %988 = vst [vmem:[#allocation2 + $0x2c] sm:$0x1] %v987_v5  ;;  %v708_v8 = vrot.slane %v706_v62, 7  ;;  %v383_v19 = vadd.f32 %v8221_v28, %v8345_v29  ;;  %v479_v20 = vsel %vm8236_vm6, 0, %v478_v17 }
  0x49   : > { %7240 = vmatprep.subr.bf16.mxu1 %v7924_v52  ;;  %v1218_v12 = vsel %vm8228_vm3, %v1213_v58, %v1217_v50  ;;  %v703_v21 = vor.u32 %v701_v15, %v700_v44  ;;  %v704_v25 = vrot.slane %v700_v44, 4  ;;  %v384_v26 = vadd.f32 %v8221_v28, %v346_v10  ;;  %480 = vst [vmem:[#allocation2 + $0x3c] sm:$0x1] %v479_v20  ;;  %v7929_v50 = vld [vmem:[%s10036_s3 + $0x28] sm:$0xff]  }
  0x4a   : > { %v6322_v63 = vcombine.low %v1208_v7, %v1218_v12  ;;  %7429 = vmatpush3.bf16.msra.mxu0 %v7917_v35  ;;  %v711_v34 = vor.u32 %v709_v3, %v708_v8  ;;  %v713_v36 = vrot.slane %v708_v8, 4  ;;  %v415_v38 = vmax.f32 %v383_v19, 0.0 }
  0x4b   : > { %v529_v29 = vsel %vm8244_vm8, 0, %v528_v0  ;;  %7430 = vmatprep.subr.bf16.mxu0 %v7919_v18  ;;  %v990_v39 = vsel %vm8295_vm11, %v703_v21, %v989_v1  ;;  %v416_v41 = vmax.f32 %v384_v26, 0.0  ;;  %v347_v35 = vmul.f32 %v6818_v31, %v8218_v27 }
  0x4c   : > { %7241 = vmatpush3.bf16.msra.mxu1 %v7924_v52  ;;  %7206 = vmatprep.mubr.bf16.mxu1 %v6322_v63  ;;  %530 = vst [vmem:[#allocation2 + $0x44] sm:$0x1] %v529_v29  ;;  %v348_v48 = vmul.f32 %v6819_v32, %v8218_v27  ;;  %v712_v14 = vsel %vm8286_vm10, %v704_v25, %v711_v34  ;;  %991 = vst [vmem:[#allocation2 + $0x30] sm:$0xf] %v990_v39  ;;  %v482_v31 = vsel %vm8236_vm6, 0, %v481_v9  ;;  %v7923_v25 = vld [vmem:[%s10036_s3 + $0x168] sm:$0xff]  }
  0x4d   : > { %v994_v52 = vsel %vm8236_vm6, %v713_v36, %v993_v60  ;;  %v8454_v49 = vpack.c.bf16 %v415_v38, %v415_v38  ;;  %7242 = vmatprep.subr.bf16.mxu1 %v7927_v45  ;;  %992 = vst [vmem:[#allocation2 + $0x34] sm:$0xf] %v712_v14  ;;  %v8458_v32 = vpack.c.bf16 %v416_v41, %v416_v41  ;;  %483 = vst [vmem:[#allocation2 + $0x48] sm:$0x1] %v482_v31 }
  0x4e   : > { %v1086_v51 = vld [vmem:[#allocation2 + $0x24] sm:$0xf]  ;;  %995 = vst [vmem:[#allocation2 + $0x38] sm:$0x1] %v994_v52  ;;  %v8464_v56 = vadd.f32 %v8221_v28, %v347_v35  ;;  %v8467_v17 = vadd.f32 %v8221_v28, %v348_v48  ;;  %v532_v47 = vsel %vm8244_vm8, 0, %v531_v23  ;;  %7431 = vmatpush3.bf16.msra.mxu0 %v7919_v18  ;;  %v349_v59 = vmul.f32 %v6822_v33, %v8218_v27 }
  0x4f   : > { %v3003_v13 = vld [vmem:[#allocation2 + $0x24] sm:$0xf]  ;;  %v1087_v57 = vld [vmem:[#allocation2 + $0x28] sm:$0xf]  ;;  %v1131_v4 = vld [vmem:[#allocation2 + $0x2c] sm:$0x1]  ;;  %v350_v5 = vmul.f32 %v6823_v46, %v8218_v27  ;;  %7432 = vmatprep.subr.bf16.mxu0 %v7920_v40 }
  0x50   : > { %v1220_v15 = vshrl.u32 %v1086_v51, 16  ;;  %v1223_v58 = vshll.u32 %v1086_v51, 16  ;;  %533 = vst [vmem:[#allocation2 + $0x50] sm:$0x1] %v532_v47  ;;  %7243 = vmatpush3.bf16.msra.mxu1 %v7927_v45  ;;  %v1229_v62 = vshll.u32 %v1087_v57, 16  ;;  %v1233_v0 = vshrl.u32 %v1087_v57, 16 }
  0x51   : > { %v1239_v7 = vshll.u32 %v1131_v4, 16  ;;  %v3004_v44 = vld [vmem:[#allocation2 + $0x28] sm:$0xf]  ;;  %v3094_v3 = vshrl.u32 %v3003_v13, 16  ;;  %7244 = vmatprep.subr.bf16.mxu1 %v7929_v50  ;;  %v3005_v18 = vld [vmem:[#allocation2 + $0x2c] sm:$0x1]  ;;  %v8482_v26 = vadd.f32 %v8221_v28, %v349_v59  ;;  %v8485_v39 = vadd.f32 %v8221_v28, %v350_v5 }
  0x52   : > { %v1222_v1 = vrot.slane %v1220_v15, 4  ;;  %v1225_v10 = vrot.slane %v1223_v58, 5  ;;  %v3097_v9 = vshll.u32 %v3003_v13, 16  ;;  %v3103_v12 = vshll.u32 %v3004_v44, 16  ;;  %7433 = vmatpush3.bf16.msra.mxu0 %v7920_v40  ;;  %v7925_v58 = vld [vmem:[%s10036_s3 + $0x170] sm:$0xff]  }
  0x53   : > { %v1231_v8 = vrot.slane %v1229_v62, 5  ;;  %v1235_v60 = vrot.slane %v1233_v0, 4  ;;  %v1241_v33 = vrot.slane %v1239_v7, 5  ;;  %v3096_v19 = vrot.slane %v3094_v3, 4  ;;  %v3006_v63 = vld [vmem:[#allocation2 + $0x30] sm:$0xf]  ;;  %7434 = vmatprep.subr.bf16.mxu0 %v7922_v53 }
  0x54   : > { %v1226_v20 = vor.u32 %v1225_v10, %v1222_v1  ;;  %v3099_v22 = vrot.slane %v3097_v9, 5  ;;  %v3105_v27 = vrot.slane %v3103_v12, 5  ;;  %v3107_v46 = vshrl.u32 %v3004_v44, 16  ;;  %7245 = vmatpush3.bf16.msra.mxu1 %v7929_v50  ;;  %v3007_v29 = vld [vmem:[#allocation2 + $0x34] sm:$0xf] }
  0x55   : > { %v1236_v23 = vor.u32 %v1235_v60, %v1231_v8  ;;  %v3113_v45 = vshll.u32 %v3005_v18, 16  ;;  %v715_v21 = vshrl.u32 %v8454_v49, 16  ;;  %v3118_v35 = vshrl.u32 %v3006_v63, 16  ;;  %v3008_v31 = vld [vmem:[#allocation2 + $0x38] sm:$0x1] }
  0x56   : > { %v1227_v34 = vrot.slane %v1226_v20, 4  ;;  %v3100_v36 = vor.u32 %v3099_v22, %v3096_v19  ;;  %v3109_v38 = vrot.slane %v3107_v46, 4  ;;  %v3121_v48 = vshll.u32 %v3006_v63, 16  ;;  %v1088_v13 = vld [vmem:[#allocation2 + $0x30] sm:$0xf]  ;;  %7435 = vmatpush3.bf16.msra.mxu0 %v7922_v53 }
  0x57   : > { %v1237_v40 = vrot.slane %v1236_v23, 4  ;;  %v3115_v41 = vrot.slane %v3113_v45, 5  ;;  %v3127_v51 = vshll.u32 %v3007_v29, 16  ;;  %v3120_v57 = vrot.slane %v3118_v35, 4  ;;  %v1089_v15 = vld [vmem:[#allocation2 + $0x34] sm:$0xf]  ;;  %7436 = vmatprep.subr.bf16.mxu0 %v7923_v25 }
  0x58   : > { %v1232_v50 = vsel %vm8228_vm3, %v1227_v34, %v1231_v8  ;;  %v3101_v14 = vrot.slane %v3100_v36, 4  ;;  %v3110_v52 = vor.u32 %v3109_v38, %v3105_v27  ;;  %v3123_v4 = vrot.slane %v3121_v48, 5  ;;  %v1132_v3 = vld [vmem:[#allocation2 + $0x38] sm:$0x1] }
  0x59   : > { %v1242_v47 = vsel %vm8228_vm3, %v1237_v40, %v1241_v33  ;;  %v3131_v28 = vshrl.u32 %v3007_v29, 16  ;;  %v3129_v0 = vrot.slane %v3127_v51, 5  ;;  %v3137_v44 = vshll.u32 %v3008_v31, 16  ;;  %v7926_v8 = vld [vmem:[%s10036_s3 + $0x178] sm:$0xff]  }
  0x5a   : > { %v6323_v59 = vcombine.low %v1232_v50, %v1242_v47  ;;  %v3106_v5 = vsel %vm8228_vm3, %v3101_v14, %v3105_v27  ;;  %v3111_v62 = vrot.slane %v3110_v52, 4  ;;  %v3124_v7 = vor.u32 %v3123_v4, %v3120_v57  ;;  %7437 = vmatpush3.bf16.msra.mxu0 %v7923_v25  ;;  %v996_v52 = vld [vmem:[#allocation2 + $0x3c] sm:$0xf]  ;;  %v1000_v4 = vld [vmem:[#allocation2 + $0x44] sm:$0x1] }
  0x5b   : > { %v3133_v53 = vrot.slane %v3131_v28, 4  ;;  %v1244_v1 = vshrl.u32 %v1088_v13, 16  ;;  %v1247_v18 = vshll.u32 %v1088_v13, 16  ;;  %v1253_v9 = vshll.u32 %v1089_v15, 16  ;;  %7438 = vmatprep.subr.bf16.mxu0 %v7925_v58  ;;  %v534_v31 = vld [vmem:[#allocation2 + $0x5c] sm:$0x1] }
  0x5c   : > { %7207 = vmatmul.mubr.bf16.gmra.mrb[4].mxu1 %v6323_v59  ;;  %v3116_v10 = vsel %vm8228_vm3, %v3111_v62, %v3115_v41  ;;  %v1257_v12 = vshrl.u32 %v1089_v15, 16  ;;  %v3125_v33 = vrot.slane %v3124_v7, 4  ;;  %v3139_v20 = vrot.slane %v3137_v44, 5  ;;  %v7931_v41 = vld [vmem:[%s10036_s3 + $0x30] sm:$0xff]   ;;  %v6946_v44 = vld [vmem:[%s8199_s24 + $0x38] sm:$0xff]  }
  0x5d   : > { %v6482_v60 = vcombine.low %v3106_v5, %v3116_v10  ;;  %v3134_v19 = vor.u32 %v3133_v53, %v3129_v0  ;;  %v1246_v22 = vrot.slane %v1244_v1, 4  ;;  %v1249_v27 = vrot.slane %v1247_v18, 5  ;;  %7246 = vmatprep.subr.bf16.mxu1 %v7931_v41 }
  0x5e   : > { %v1255_v46 = vrot.slane %v1253_v9, 5  ;;  %v1259_v23 = vrot.slane %v1257_v12, 4  ;;  %v3130_v45 = vsel %vm8228_vm3, %v3125_v33, %v3129_v0  ;;  %v1263_v34 = vshll.u32 %v1132_v3, 16  ;;  %7439 = vmatpush3.bf16.msra.mxu0 %v7925_v58  ;;  %7247 = vmatpush3.bf16.msra.mxu1 %v7931_v41 }
  0x5f   : > { %7398 = vmatprep.mubr.bf16.mxu0 %v6482_v60  ;;  %v3135_v63 = vrot.slane %v3134_v19, 4  ;;  %v717_v25 = vrot.slane %v715_v21, 7  ;;  %v1250_v36 = vor.u32 %v1249_v27, %v1246_v22  ;;  %v718_v29 = vshll.u32 %v8454_v49, 16  ;;  %v484_v21 = vld [vmem:[#allocation2 + $0x54] sm:$0x1]  ;;  %7440 = vmatprep.subr.bf16.mxu0 %v7926_v8  ;;  %v8514_v49 = vld [vmem:[%s10036_s3 + $0x180] sm:$0xff]  }
  0x60   : > { %v1260_v38 = vor.u32 %v1259_v23, %v1255_v46  ;;  %v723_v40 = vshrl.u32 %v8458_v32, 16  ;;  %v1265_v48 = vrot.slane %v1263_v34, 5  ;;  %v726_v14 = vshll.u32 %v8458_v32, 16  ;;  %v1003_v22 = vld [vmem:[#allocation2 + $0x48] sm:$0xf] }
  0x61   : > { %v3140_v35 = vsel %vm8228_vm3, %v3135_v63, %v3139_v20  ;;  %v721_v50 = vrot.slane %v717_v25, 4  ;;  %v1251_v13 = vrot.slane %v1250_v36, 4  ;;  %v720_v57 = vor.u32 %v718_v29, %v717_v25  ;;  %v1007_v27 = vld [vmem:[#allocation2 + $0x50] sm:$0x1] }
  0x62   : > { %v6483_v51 = vcombine.low %v3130_v45, %v3140_v35  ;;  %v1261_v47 = vrot.slane %v1260_v38, 4  ;;  %v725_v28 = vrot.slane %v723_v40, 7  ;;  %v417_v15 = vmax.f32 %v8464_v56, 0.0  ;;  %7441 = vmatpush3.bf16.msra.mxu0 %v7926_v8  ;;  %v8543_v40 = vld [vmem:[%s8205_s27] ss:$0 sm:$0xff] }
  0x63   : > { %v418_v32 = vmax.f32 %v8467_v17, 0.0  ;;  %v419_v58 = vmax.f32 %v8482_v26, 0.0  ;;  %v1256_v59 = vsel %vm8228_vm3, %v1251_v13, %v1255_v46  ;;  %v997_v62 = vsel %vm8295_vm11, %v720_v57, %v996_v52  ;;  %7474 = vmatprep.subr.bf16.mxu0 %v8514_v49 }
  0x64   : > { %7399 = vmatmul.mubr.bf16.gmra.mrb[4].mxu0 %v6483_v51  ;;  %v1266_v5 = vsel %vm8228_vm3, %v1261_v47, %v1265_v48  ;;  %v420_v0 = vmax.f32 %v8485_v39, 0.0  ;;  %v728_v53 = vor.u32 %v726_v14, %v725_v28  ;;  %v730_v56 = vrot.slane %v725_v28, 4  ;;  %998 = vst [vmem:[#allocation2 + $0x3c] sm:$0xf] %v997_v62 }
  0x65   : > { %v6324_v7 = vcombine.low %v1256_v59, %v1266_v5  ;;  %v6742_v17 = vpack.c.bf16 %v417_v15, %v417_v15  ;;  %v6743_v26 = vpack.c.bf16 %v418_v32, %v418_v32  ;;  %v485_v3 = vsel %vm8236_vm6, 0, %v484_v21 }
  0x66   : > { %v535_v1 = vsel %vm8244_vm8, 0, %v534_v31  ;;  %v6744_v10 = vpack.c.bf16 %v419_v58, %v419_v58  ;;  %v729_v39 = vsel %vm8286_vm10, %v721_v50, %v728_v53  ;;  %v1001_v18 = vsel %vm8236_vm6, %v730_v56, %v1000_v4  ;;  %486 = vst [vmem:[#allocation2 + $0x54] sm:$0x1] %v485_v3  ;;  %v8558_v53 = vld [vmem:[%s8211_s30] ss:$0 sm:$0xff] }
  0x67   : > { %7210 = vmatprep.mubr.bf16.mxu1 %v6324_v7  ;;  %v732_v9 = vshrl.u32 %v6742_v17, 16  ;;  %v735_v12 = vshll.u32 %v6742_v17, 16  ;;  %536 = vst [vmem:[#allocation2 + $0x5c] sm:$0x1] %v535_v1  ;;  %999 = vst [vmem:[#allocation2 + $0x40] sm:$0xf] %v729_v39  ;;  %v8536_v33 = vpack.c.bf16 %v420_v0, %v420_v0  ;;  %v6826_v23 = vunpack.c.l.bf16 %v6946_v44 }
  0x68   : > { %1002 = vst [vmem:[#allocation2 + $0x44] sm:$0x1] %v1001_v18  ;;  %v740_v8 = vshrl.u32 %v6743_v26, 16  ;;  %v743_v60 = vshll.u32 %v6743_v26, 16  ;;  %v749_v19 = vshrl.u32 %v6744_v10, 16  ;;  %v752_v46 = vshll.u32 %v6744_v10, 16 }
  0x69   : > { %v734_v20 = vrot.slane %v732_v9, 7  ;;  %v6827_v45 = vunpack.c.h.bf16 %v6946_v44  ;;  %v757_v25 = vshrl.u32 %v8536_v33, 16  ;;  %v760_v36 = vshll.u32 %v8536_v33, 16 }
  0x6a   : > { %v742_v63 = vrot.slane %v740_v8, 7  ;;  %v8538_v34 = vrot.slane %v749_v19, 7  ;;  %v351_v41 = vmul.f32 %v8543_v40, %v6826_v23 }
  0x6b   : > { %v737_v38 = vor.u32 %v735_v12, %v734_v20  ;;  %v738_v29 = vrot.slane %v734_v20, 4  ;;  %v352_v35 = vmul.f32 %v8543_v40, %v6827_v45  ;;  %v1090_v48 = vld [vmem:[#allocation2 + $0x3c] sm:$0xf]  ;;  %v759_v32 = vrot.slane %v757_v25, 7 }
  0x6c   : > { %v3009_v50 = vld [vmem:[#allocation2 + $0x3c] sm:$0xf]  ;;  %v745_v14 = vor.u32 %v743_v60, %v742_v63  ;;  %v747_v52 = vrot.slane %v742_v63, 4  ;;  %v754_v21 = vor.u32 %v752_v46, %v8538_v34  ;;  %v755_v31 = vrot.slane %v8538_v34, 4 }
  0x6d   : > { %v1268_v51 = vshrl.u32 %v1090_v48, 16  ;;  %v1271_v13 = vshll.u32 %v1090_v48, 16  ;;  %v3142_v47 = vshrl.u32 %v3009_v50, 16  ;;  %v3145_v57 = vshll.u32 %v3009_v50, 16  ;;  %v1010_v58 = vld [vmem:[#allocation2 + $0x54] sm:$0xf] }
  0x6e   : > { %v746_v4 = vsel %vm8286_vm10, %v738_v29, %v745_v14  ;;  %v1004_v28 = vsel %vm8295_vm11, %v737_v38, %v1003_v22  ;;  %v1008_v15 = vsel %vm8236_vm6, %v747_v52, %v1007_v27  ;;  %v1091_v59 = vld [vmem:[#allocation2 + $0x40] sm:$0xf]  ;;  %v1011_v7 = vsel %vm8295_vm11, %v754_v21, %v1010_v58  ;;  %v1014_v8 = vld [vmem:[#allocation2 + $0x5c] sm:$0x1] }
  0x6f   : > { %v1133_v5 = vld [vmem:[#allocation2 + $0x44] sm:$0x1]  ;;  %v1270_v62 = vrot.slane %v1268_v51, 4  ;;  %v1273_v0 = vrot.slane %v1271_v13, 5  ;;  %1005 = vst [vmem:[#allocation2 + $0x48] sm:$0xf] %v1004_v28  ;;  %v8561_v56 = vadd.f32 %v8558_v53, %v351_v41  ;;  %v762_v34 = vor.u32 %v760_v36, %v759_v32 }
  0x70   : > { %1006 = vst [vmem:[#allocation2 + $0x4c] sm:$0xf] %v746_v4  ;;  %1009 = vst [vmem:[#allocation2 + $0x50] sm:$0x1] %v1008_v15  ;;  %v1277_v17 = vshll.u32 %v1091_v59, 16  ;;  %v1281_v44 = vshrl.u32 %v1091_v59, 16  ;;  %v8570_v48 = vadd.f32 %v8558_v53, %v352_v35 }
  0x71   : > { %v1287_v26 = vshll.u32 %v1133_v5, 16  ;;  %v8563_v3 = vld [vmem:[#allocation2 + $0x40] sm:$0xf]  ;;  %v3144_v1 = vrot.slane %v3142_v47, 4  ;;  %1012 = vst [vmem:[#allocation2 + $0x54] sm:$0xf] %v1011_v7  ;;  %v1274_v10 = vor.u32 %v1273_v0, %v1270_v62  ;;  %v763_v21 = vsel %vm8286_vm10, %v755_v31, %v762_v34 }
  0x72   : > { %v3011_v39 = vld [vmem:[#allocation2 + $0x44] sm:$0x1]  ;;  %v3147_v18 = vrot.slane %v3145_v57, 5  ;;  %v3151_v9 = vshll.u32 %v8563_v3, 16  ;;  %v3155_v12 = vshrl.u32 %v8563_v3, 16  ;;  %v1279_v60 = vrot.slane %v1277_v17, 5 }
  0x73   : > { %v1283_v33 = vrot.slane %v1281_v44, 4  ;;  %v1289_v19 = vrot.slane %v1287_v26, 5  ;;  %v3161_v20 = vshll.u32 %v3011_v39, 16  ;;  %v1275_v22 = vrot.slane %v1274_v10, 4  ;;  %1013 = vst [vmem:[#allocation2 + $0x58] sm:$0xf] %v763_v21 }
  0x74   : > { %v3148_v27 = vor.u32 %v3147_v18, %v3144_v1  ;;  %v3153_v46 = vrot.slane %v3151_v9, 5  ;;  %v3157_v23 = vrot.slane %v3155_v12, 4  ;;  %v764_v25 = vrot.slane %v759_v32, 4  ;;  %v7933_v59 = vld [vmem:[%s10036_s3 + $0x38] sm:$0xff]  }
  0x75   : > { %v1284_v45 = vor.u32 %v1283_v33, %v1279_v60  ;;  %v3163_v63 = vrot.slane %v3161_v20, 5  ;;  %v1280_v38 = vsel %vm8228_vm3, %v1275_v22, %v1279_v60  ;;  %v421_v36 = vmax.f32 %v8561_v56, 0.0  ;;  %7248 = vmatprep.subr.bf16.mxu1 %v7933_v59 }
  0x76   : > { %v3149_v29 = vrot.slane %v3148_v27, 4  ;;  %v3158_v41 = vor.u32 %v3157_v23, %v3153_v46  ;;  %v3012_v14 = vld [vmem:[#allocation2 + $0x48] sm:$0xf]  ;;  %v1015_v51 = vsel %vm8236_vm6, %v764_v25, %v1014_v8  ;;  %7249 = vmatpush3.bf16.msra.mxu1 %v7933_v59 }
  0x77   : > { %v1285_v50 = vrot.slane %v1284_v45, 4  ;;  %v3013_v52 = vld [vmem:[#allocation2 + $0x4c] sm:$0xf]  ;;  %v3014_v57 = vld [vmem:[#allocation2 + $0x50] sm:$0x1]  ;;  %v3166_v4 = vshrl.u32 %v3012_v14, 16 }
  0x78   : > { %v3154_v13 = vsel %vm8228_vm3, %v3149_v29, %v3153_v46  ;;  %v3159_v47 = vrot.slane %v3158_v41, 4  ;;  %v3169_v28 = vshll.u32 %v3012_v14, 16  ;;  %1016 = vst [vmem:[#allocation2 + $0x5c] sm:$0x1] %v1015_v51  ;;  %v3175_v15 = vshll.u32 %v3013_v52, 16 }
  0x79   : > { %v1290_v35 = vsel %vm8228_vm3, %v1285_v50, %v1289_v19  ;;  %v3179_v32 = vshrl.u32 %v3013_v52, 16  ;;  %v3185_v31 = vshll.u32 %v3014_v57, 16  ;;  %v1092_v58 = vld [vmem:[#allocation2 + $0x48] sm:$0xf]  ;;  %v3168_v0 = vrot.slane %v3166_v4, 4 }
  0x7a   : > { %v6325_v5 = vcombine.low %v1280_v38, %v1290_v35  ;;  %v3164_v62 = vsel %vm8228_vm3, %v3159_v47, %v3163_v63  ;;  %v3171_v7 = vrot.slane %v3169_v28, 5  ;;  %v1093_v17 = vld [vmem:[#allocation2 + $0x4c] sm:$0xf]  ;;  %v1134_v44 = vld [vmem:[#allocation2 + $0x50] sm:$0x1]  ;;  %v3177_v1 = vrot.slane %v3175_v15, 5 }
  0x7b   : > { %v6484_v26 = vcombine.low %v3154_v13, %v3164_v62  ;;  %v3181_v10 = vrot.slane %v3179_v32, 4  ;;  %v3187_v39 = vrot.slane %v3185_v31, 5  ;;  %v1094_v18 = vld [vmem:[#allocation2 + $0x54] sm:$0xf]  ;;  %v1292_v12 = vshrl.u32 %v1092_v58, 16  ;;  %v7937_v35 = vld [vmem:[%s10036_s3 + $0x80] sm:$0xff]  }
  0x7c   : > { %7211 = vmatmul.mubr.bf16.gmra.mrb[8].mxu1 %v6325_v5  ;;  %v3172_v9 = vor.u32 %v3171_v7, %v3168_v0  ;;  %v1295_v8 = vshll.u32 %v1092_v58, 16  ;;  %v1301_v60 = vshll.u32 %v1093_v17, 16  ;;  %v1305_v19 = vshrl.u32 %v1093_v17, 16  ;;  %v1095_v38 = vld [vmem:[#allocation2 + $0x58] sm:$0xf]  ;;  %7282 = vmatprep.subr.bf16.mxu1 %v7937_v35 }
  0x7d   : > { %7402 = vmatprep.mubr.bf16.mxu0 %v6484_v26  ;;  %v3182_v33 = vor.u32 %v3181_v10, %v3177_v1  ;;  %v1311_v20 = vshll.u32 %v1134_v44, 16  ;;  %v1316_v22 = vshrl.u32 %v1094_v18, 16  ;;  %v1294_v46 = vrot.slane %v1292_v12, 4  ;;  %v3015_v51 = vld [vmem:[#allocation2 + $0x54] sm:$0xf] }
  0x7e   : > { %v3173_v27 = vrot.slane %v3172_v9, 4  ;;  %v1297_v23 = vrot.slane %v1295_v8, 5  ;;  %v1303_v45 = vrot.slane %v1301_v60, 5  ;;  %v1307_v34 = vrot.slane %v1305_v19, 4  ;;  %v3016_v28 = vld [vmem:[#allocation2 + $0x58] sm:$0xf] }
  0x7f   : > { %v3183_v63 = vrot.slane %v3182_v33, 4  ;;  %v1313_v25 = vrot.slane %v1311_v20, 5  ;;  %v1318_v29 = vrot.slane %v1316_v22, 4  ;;  %v1135_v14 = vld [vmem:[#allocation2 + $0x5c] sm:$0x1]  ;;  %v1319_v52 = vshll.u32 %v1094_v18, 16 }
  0x80   : > { %v3178_v41 = vsel %vm8228_vm3, %v3173_v27, %v3177_v1  ;;  %v1298_v50 = vor.u32 %v1297_v23, %v1294_v46  ;;  %v1325_v21 = vshll.u32 %v1095_v38, 16  ;;  %v1308_v47 = vor.u32 %v1307_v34, %v1303_v45  ;;  %v3017_v59 = vld [vmem:[#allocation2 + $0x5c] sm:$0x1]  ;;  %v487_v12 = vld [vmem:[#allocation2 + $0x60] sm:$0x1] }
  0x81   : > { %v3188_v13 = vsel %vm8228_vm3, %v3183_v63, %v3187_v39  ;;  %v1329_v57 = vshrl.u32 %v1095_v38, 16  ;;  %v1335_v4 = vshll.u32 %v1135_v14, 16  ;;  %v1321_v31 = vrot.slane %v1319_v52, 5  ;;  %v537_v8 = vld [vmem:[#allocation2 + $0x68] sm:$0x1]  ;;  %v6947_v22 = vld [vmem:[%s8199_s24 + $0x40] sm:$0xff]  }
  0x82   : > { %v6485_v15 = vcombine.low %v3178_v41, %v3188_v13  ;;  %v1299_v32 = vrot.slane %v1298_v50, 4  ;;  %v1327_v58 = vrot.slane %v1325_v21, 5  ;;  %v1309_v5 = vrot.slane %v1308_v47, 4  ;;  %v540_v52 = vld [vmem:[#allocation2 + $0x74] sm:$0x1] }
  0x83   : > { %v1331_v62 = vrot.slane %v1329_v57, 4  ;;  %v1337_v0 = vrot.slane %v1335_v4, 5  ;;  %v3190_v7 = vshrl.u32 %v3015_v51, 16  ;;  %v1322_v44 = vor.u32 %v1321_v31, %v1318_v29  ;;  %v490_v29 = vld [vmem:[#allocation2 + $0x6c] sm:$0x1] }
  0x84   : > { %7403 = vmatmul.mubr.bf16.gmra.mrb[8].mxu0 %v6485_v15  ;;  %v1304_v17 = vsel %vm8228_vm3, %v1299_v32, %v1303_v45  ;;  %v3193_v26 = vshll.u32 %v3015_v51, 16  ;;  %v3199_v1 = vshll.u32 %v3016_v28, 16  ;;  %v1314_v10 = vsel %vm8228_vm3, %v1309_v5, %v1313_v25  ;;  %v6948_v15 = vld [vmem:[%s8199_s24 + $0x48] sm:$0xff]   ;;  %v8048_v24 = vld [vmem:[#allocation2 + $0x54] sm:$0xf] }
  0x85   : > { %v1332_v39 = vor.u32 %v1331_v62, %v1327_v58  ;;  %v3192_v18 = vrot.slane %v3190_v7, 4  ;;  %v3203_v9 = vshrl.u32 %v3016_v28, 16  ;;  %v6326_v60 = vcombine.low %v1304_v17, %v1314_v10 }
  0x86   : > { %v1323_v33 = vrot.slane %v1322_v44, 4  ;;  %v3195_v19 = vrot.slane %v3193_v26, 5  ;;  %v3201_v20 = vrot.slane %v3199_v1, 5  ;;  %v3209_v23 = vshll.u32 %v3017_v59, 16  ;;  %v3751_v59 = vld [vmem:[#allocation2 + $0xc] sm:$0xe] }
  0x87   : > { %v1333_v27 = vrot.slane %v1332_v39, 4  ;;  %v3205_v46 = vrot.slane %v3203_v9, 4  ;;  %v422_v45 = vmax.f32 %v8570_v48, 0.0  ;;  %7214 = vmatprep.mubr.bf16.mxu1 %v6326_v60  ;;  %v488_v25 = vsel %vm8236_vm6, 0, %v487_v12  ;;  %v3752_v1 = vld [vmem:[#allocation2 + $0x18] sm:$0xe] }
  0x88   : > { %v1328_v63 = vsel %vm8228_vm3, %v1323_v33, %v1327_v58  ;;  %v3196_v34 = vor.u32 %v3195_v19, %v3192_v18  ;;  %v538_v38 = vsel %vm8244_vm8, 0, %v537_v8  ;;  %v3211_v14 = vrot.slane %v3209_v23, 5  ;;  %489 = vst [vmem:[#allocation2 + $0x60] sm:$0x1] %v488_v25 }
  0x89   : > { %v1338_v41 = vsel %vm8228_vm3, %v1333_v27, %v1337_v0  ;;  %v3206_v50 = vor.u32 %v3205_v46, %v3201_v20  ;;  %539 = vst [vmem:[#allocation2 + $0x68] sm:$0x1] %v538_v38  ;;  %v6746_v48 = vpack.c.bf16 %v421_v36, %v421_v36  ;;  %v6747_v13 = vpack.c.bf16 %v422_v45, %v422_v45  ;;  %v493_v38 = vld [vmem:[#allocation2 + $0x78] sm:$0x1] }
  0x8a   : > { %v6327_v21 = vcombine.low %v1328_v63, %v1338_v41  ;;  %v3197_v51 = vrot.slane %v3196_v34, 4  ;;  %v6830_v47 = vunpack.c.l.bf16 %v6947_v22  ;;  %v6831_v35 = vunpack.c.h.bf16 %v6947_v22  ;;  %v8021_v34 = vld [vmem:[#allocation2 + $0x10] sm:$0xf] }
  0x8b   : > { %v3207_v57 = vrot.slane %v3206_v50, 4  ;;  %v766_v4 = vshrl.u32 %v6746_v48, 16  ;;  %v769_v28 = vshll.u32 %v6746_v48, 16  ;;  %v774_v31 = vshrl.u32 %v6747_v13, 16 }
  0x8c   : > { %7215 = vmatmul.mubr.bf16.gmra.mrb[12].mxu1 %v6327_v21  ;;  %v3202_v32 = vsel %vm8228_vm3, %v3197_v51, %v3201_v20  ;;  %v777_v58 = vshll.u32 %v6747_v13, 16  ;;  %v353_v56 = vmul.f32 %v8543_v40, %v6830_v47  ;;  %v354_v62 = vmul.f32 %v8543_v40, %v6831_v35 }
  0x8d   : > { %v3212_v36 = vsel %vm8228_vm3, %v3207_v57, %v3211_v14  ;;  %v768_v5 = vrot.slane %v766_v4, 7  ;;  %v491_v0 = vsel %vm8236_vm6, 0, %v490_v29  ;;  %v776_v17 = vrot.slane %v774_v31, 7 }
  0x8e   : > { %v6486_v7 = vcombine.low %v3202_v32, %v3212_v36  ;;  %v391_v44 = vadd.f32 %v8558_v53, %v353_v56  ;;  %492 = vst [vmem:[#allocation2 + $0x6c] sm:$0x1] %v491_v0  ;;  %v541_v26 = vsel %vm8244_vm8, 0, %v540_v52  ;;  %v392_v18 = vadd.f32 %v8558_v53, %v354_v62 }
  0x8f   : > { %v771_v10 = vor.u32 %v769_v28, %v768_v5  ;;  %v772_v39 = vrot.slane %v768_v5, 4  ;;  %542 = vst [vmem:[#allocation2 + $0x74] sm:$0x1] %v541_v26  ;;  %v779_v9 = vor.u32 %v777_v58, %v776_v17  ;;  %v781_v12 = vrot.slane %v776_v17, 4  ;;  %v1017_v8 = vld [vmem:[#allocation2 + $0x60] sm:$0xf] }
  0x90   : > { %7406 = vmatprep.mubr.bf16.mxu0 %v6486_v7  ;;  %v1021_v60 = vld [vmem:[#allocation2 + $0x68] sm:$0x1]  ;;  %v423_v33 = vmax.f32 %v391_v44, 0.0  ;;  %v6834_v19 = vunpack.c.l.bf16 %v6948_v15  ;;  %v424_v22 = vmax.f32 %v392_v18, 0.0  ;;  %v6504_v27 = vrot.slane %v3751_v59, 9 }
  0x91   : > { %v1018_v20 = vsel %vm8295_vm11, %v771_v10, %v1017_v8  ;;  %v780_v46 = vsel %vm8286_vm10, %v772_v39, %v779_v9  ;;  %v1022_v23 = vsel %vm8236_vm6, %v781_v12, %v1021_v60  ;;  %v3817_v25 = vrot.slane %v8021_v34, 5 }
  0x92   : > { %1019 = vst [vmem:[#allocation2 + $0x60] sm:$0xf] %v1018_v20  ;;  %v6748_v45 = vpack.c.bf16 %v423_v33, %v423_v33  ;;  %1020 = vst [vmem:[#allocation2 + $0x64] sm:$0xf] %v780_v46  ;;  %v6749_v29 = vpack.c.bf16 %v424_v22, %v424_v22  ;;  %v6505_v41 = vrot.slane %v3752_v1, 9  ;;  %v8639_v50 = vsel %vm8630_vm14, %v8382_v6, %v3827_v55 }
  0x93   : > { %1023 = vst [vmem:[#allocation2 + $0x68] sm:$0x1] %v1022_v23  ;;  %v6835_v14 = vunpack.c.h.bf16 %v6948_v15  ;;  %v8643_v21 = vsel %vm8630_vm14, %v6504_v27, %v3817_v25  ;;  %v3819_v51 = vrot.slane %v3817_v25, 4  ;;  %v355_v55 = vmul.f32 %v8543_v40, %v6834_v19  ;;  %v543_v6 = vld [vmem:[#allocation2 + $0x80] sm:$0x1]  ;;  %v8662_v15 = vld [vmem:[%s8199_s24 + $0x50] sm:$0xff]  }
  0x94   : > { %v783_v48 = vshrl.u32 %v6748_v45, 16  ;;  %v786_v52 = vshll.u32 %v6748_v45, 16  ;;  %v791_v13 = vshrl.u32 %v6749_v29, 16  ;;  %v794_v47 = vshll.u32 %v6749_v29, 16 }
  0x95   : > { %v8649_v11 = vsel %vm8630_vm14, %v6505_v41, %v3824_v54  ;;  %v1024_v4 = vld [vmem:[#allocation2 + $0x6c] sm:$0xf]  ;;  %v8656_v28 = vsel %vm8630_vm14, %v3819_v51, %v3820_v2  ;;  %v356_v61 = vmul.f32 %v8543_v40, %v6835_v14  ;;  %v393_v31 = vadd.f32 %v8558_v53, %v355_v55 }
  0x96   : > { %v785_v57 = vrot.slane %v783_v48, 7  ;;  %v6537_v35 = vcombine.low %v8649_v11, %v8639_v50  ;;  %v793_v54 = vrot.slane %v791_v13, 7  ;;  %v6536_v32 = vcombine.low %v8643_v21, %v8656_v28  ;;  %v1028_v18 = vld [vmem:[#allocation2 + $0x74] sm:$0x1] }
  0x97   : > { %v494_v43 = vsel %vm8236_vm6, 0, %v493_v38  ;;  %v394_v2 = vadd.f32 %v8558_v53, %v356_v61  ;;  %v544_v59 = vsel %vm8244_vm8, 0, %v543_v6  ;;  %v425_v7 = vmax.f32 %v393_v31, 0.0  ;;  %v8024_v11 = vld [vmem:[#allocation2 + $0x34] sm:$0xf] }
  0x98   : > { %v788_v58 = vor.u32 %v786_v52, %v785_v57  ;;  %v789_v56 = vrot.slane %v785_v57, 4  ;;  %495 = vst [vmem:[#allocation2 + $0x78] sm:$0x1] %v494_v43  ;;  %v796_v62 = vor.u32 %v794_v47, %v793_v54  ;;  %v798_v0 = vrot.slane %v793_v54, 4  ;;  %545 = vst [vmem:[#allocation2 + $0x80] sm:$0x1] %v544_v59 }
  0x99   : > { %v3018_v36 = vld [vmem:[#allocation2 + $0x60] sm:$0xf]  ;;  %v6838_v17 = vunpack.c.l.bf16 %v8662_v15  ;;  %v8673_v44 = vld [vmem:[#allocation2 + $0x64] sm:$0xf]  ;;  %v6839_v9 = vunpack.c.h.bf16 %v8662_v15  ;;  %v6750_v54 = vpack.c.bf16 %v425_v7, %v425_v7 }
  0x9a   : > { %v1096_v5 = vld [vmem:[#allocation2 + $0x60] sm:$0xf]  ;;  %v8675_v26 = vld [vmem:[#allocation2 + $0x68] sm:$0x1]  ;;  %v3214_v1 = vshrl.u32 %v3018_v36, 16  ;;  %v3217_v10 = vshll.u32 %v3018_v36, 16  ;;  %v1025_v39 = vsel %vm8295_vm11, %v788_v58, %v1024_v4  ;;  %v797_v13 = vsel %vm8286_vm10, %v789_v56, %v796_v62 }
  0x9b   : > { %v3223_v12 = vshll.u32 %v8673_v44, 16  ;;  %v3227_v8 = vshrl.u32 %v8673_v44, 16  ;;  %v3233_v60 = vshll.u32 %v8675_v26, 16  ;;  %v1097_v33 = vld [vmem:[#allocation2 + $0x64] sm:$0xf]  ;;  %v1340_v19 = vshrl.u32 %v1096_v5, 16 }
  0x9c   : > { %1026 = vst [vmem:[#allocation2 + $0x6c] sm:$0xf] %v1025_v39  ;;  %v3216_v20 = vrot.slane %v3214_v1, 4  ;;  %v3219_v22 = vrot.slane %v3217_v10, 5  ;;  %v1136_v27 = vld [vmem:[#allocation2 + $0x68] sm:$0x1]  ;;  %v1029_v47 = vsel %vm8236_vm6, %v798_v0, %v1028_v18  ;;  %v357_v31 = vmul.f32 %v8543_v40, %v6838_v17 }
  0x9d   : > { %v1343_v46 = vshll.u32 %v1096_v5, 16  ;;  %v1349_v23 = vshll.u32 %v1097_v33, 16  ;;  %v3225_v45 = vrot.slane %v3223_v12, 5  ;;  %v3229_v34 = vrot.slane %v3227_v8, 4  ;;  %1027 = vst [vmem:[#allocation2 + $0x70] sm:$0xf] %v797_v13 }
  0x9e   : > { %v3235_v25 = vrot.slane %v3233_v60, 5  ;;  %v1342_v38 = vrot.slane %v1340_v19, 4  ;;  %v3220_v29 = vor.u32 %v3219_v22, %v3216_v20  ;;  %v1353_v48 = vshrl.u32 %v1097_v33, 16  ;;  %1030 = vst [vmem:[#allocation2 + $0x74] sm:$0x1] %v1029_v47 }
  0x9f   : > { %v1345_v41 = vrot.slane %v1343_v46, 5  ;;  %v1351_v14 = vrot.slane %v1349_v23, 5  ;;  %v3230_v52 = vor.u32 %v3229_v34, %v3225_v45  ;;  %v1359_v51 = vshll.u32 %v1136_v27, 16  ;;  %v1031_v17 = vld [vmem:[#allocation2 + $0x78] sm:$0xf] }
  0xa0   : > { %v3221_v55 = vrot.slane %v3220_v29, 4  ;;  %v1355_v57 = vrot.slane %v1353_v48, 4  ;;  %v426_v4 = vmax.f32 %v394_v2, 0.0  ;;  %v800_v1 = vshrl.u32 %v6750_v54, 16  ;;  %v496_v27 = vld [vmem:[#allocation2 + $0x84] sm:$0x1] }
  0xa1   : > { %v1346_v6 = vor.u32 %v1345_v41, %v1342_v38  ;;  %v3231_v61 = vrot.slane %v3230_v52, 4  ;;  %v1361_v15 = vrot.slane %v1359_v51, 5  ;;  %v803_v39 = vshll.u32 %v6750_v54, 16  ;;  %v546_v52 = vld [vmem:[#allocation2 + $0x8c] sm:$0x1] }
  0xa2   : > { %v3226_v43 = vsel %vm8228_vm3, %v3221_v55, %v3225_v45  ;;  %v1356_v59 = vor.u32 %v1355_v57, %v1351_v14  ;;  %v6751_v36 = vpack.c.bf16 %v426_v4, %v426_v4  ;;  %v802_v8 = vrot.slane %v800_v1, 7  ;;  %v3753_v55 = vld [vmem:[#allocation2 + $0x24] sm:$0xe]  ;;  %v7930_v4 = vld [vmem:[%s10036_s3 + $0x188] sm:$0xff]  }
  0xa3   : > { %v1347_v58 = vrot.slane %v1346_v6, 4  ;;  %v1098_v56 = vld [vmem:[#allocation2 + $0x6c] sm:$0xf]  ;;  %v3236_v5 = vsel %vm8228_vm3, %v3231_v61, %v3235_v25  ;;  %v358_v20 = vmul.f32 %v8543_v40, %v6839_v9  ;;  %v395_v22 = vadd.f32 %v8558_v53, %v357_v31  ;;  %v8022_v1 = vld [vmem:[#allocation2 + $0x28] sm:$0xf] }
  0xa4   : > { %v1364_v62 = vshrl.u32 %v1098_v56, 16  ;;  %v1367_v0 = vshll.u32 %v1098_v56, 16  ;;  %v6487_v10 = vcombine.low %v3226_v43, %v3236_v5  ;;  %v1357_v7 = vrot.slane %v1356_v59, 4  ;;  %v1099_v23 = vld [vmem:[#allocation2 + $0x70] sm:$0xf] }
  0xa5   : > { %v1352_v2 = vsel %vm8228_vm3, %v1347_v58, %v1351_v14  ;;  %v808_v60 = vshrl.u32 %v6751_v36, 16  ;;  %v811_v19 = vshll.u32 %v6751_v36, 16  ;;  %v1137_v45 = vld [vmem:[#allocation2 + $0x74] sm:$0x1]  ;;  %v805_v25 = vor.u32 %v803_v39, %v802_v8  ;;  %v3754_v43 = vld [vmem:[#allocation2 + $0x30] sm:$0xe] }
  0xa6   : > { %v1366_v18 = vrot.slane %v1364_v62, 4  ;;  %v1369_v12 = vrot.slane %v1367_v0, 5  ;;  %7407 = vmatmul.mubr.bf16.gmra.mrb[12].mxu0 %v6487_v10  ;;  %v1362_v33 = vsel %vm8228_vm3, %v1357_v7, %v1361_v15  ;;  %v806_v38 = vrot.slane %v802_v8, 4 }
  0xa7   : > { %v6328_v46 = vcombine.low %v1352_v2, %v1362_v33  ;;  %7442 = vmatprep.mubr.bf16.mxu0 %v6536_v32  ;;  %v1373_v29 = vshll.u32 %v1099_v23, 16  ;;  %v1377_v41 = vshrl.u32 %v1099_v23, 16  ;;  %v1383_v14 = vshll.u32 %v1137_v45, 16  ;;  %v1035_v32 = vld [vmem:[#allocation2 + $0x80] sm:$0x1] }
  0xa8   : > { %v1370_v34 = vor.u32 %v1369_v12, %v1366_v18  ;;  %v810_v48 = vrot.slane %v808_v60, 7  ;;  %v1032_v51 = vsel %vm8295_vm11, %v805_v25, %v1031_v17  ;;  %v396_v13 = vadd.f32 %v8558_v53, %v358_v20  ;;  %v8023_v17 = vld [vmem:[#allocation2 + $0x2c] sm:$0x1]  ;;  %v8025_v45 = vld [vmem:[#allocation2 + $0x38] sm:$0x1] }
  0xa9   : > { %7218 = vmatprep.mubr.bf16.mxu1 %v6328_v46  ;;  %v427_v47 = vmax.f32 %v395_v22, 0.0  ;;  %v1375_v6 = vrot.slane %v1373_v29, 5  ;;  %v1379_v57 = vrot.slane %v1377_v41, 4  ;;  %v1385_v21 = vrot.slane %v1383_v14, 5  ;;  %1033 = vst [vmem:[#allocation2 + $0x78] sm:$0xf] %v1032_v51 }
  0xaa   : > { %v1371_v9 = vrot.slane %v1370_v34, 4  ;;  %v813_v28 = vor.u32 %v811_v19, %v810_v48  ;;  %v815_v61 = vrot.slane %v810_v48, 4  ;;  %v428_v15 = vmax.f32 %v396_v13, 0.0  ;;  %v7932_v22 = vld [vmem:[%s10036_s3 + $0x190] sm:$0xff]  }
  0xab   : > { %v497_v54 = vsel %vm8236_vm6, 0, %v496_v27  ;;  %v547_v31 = vsel %vm8244_vm8, 0, %v546_v52  ;;  %v1380_v59 = vor.u32 %v1379_v57, %v1375_v6  ;;  %v6752_v36 = vpack.c.bf16 %v427_v47, %v427_v47  ;;  %v6950_v47 = vld [vmem:[%s8199_s24 + $0x58] sm:$0xff]  }
  0xac   : > { %v1376_v58 = vsel %vm8228_vm3, %v1371_v9, %v1375_v6  ;;  %v814_v56 = vsel %vm8286_vm10, %v806_v38, %v813_v28  ;;  %498 = vst [vmem:[#allocation2 + $0x84] sm:$0x1] %v497_v54  ;;  %548 = vst [vmem:[#allocation2 + $0x8c] sm:$0x1] %v547_v31  ;;  %v1036_v5 = vsel %vm8236_vm6, %v815_v61, %v1035_v32  ;;  %v6506_v0 = vrot.slane %v3753_v55, 9 }
  0xad   : > { %1034 = vst [vmem:[#allocation2 + $0x7c] sm:$0xf] %v814_v56  ;;  %v6753_v62 = vpack.c.bf16 %v428_v15, %v428_v15  ;;  %v3831_v10 = vrot.slane %v8022_v1, 5  ;;  %v1381_v2 = vrot.slane %v1380_v59, 4  ;;  %1037 = vst [vmem:[#allocation2 + $0x80] sm:$0x1] %v1036_v5 }
  0xae   : > { %7443 = vmatmul.mubr.bf16.vlgmr.msra.gmra.mrb[0].mxu0 %v6537_v35  ;;  %v817_v7 = vshrl.u32 %v6752_v36, 16  ;;  %v820_v39 = vshll.u32 %v6752_v36, 16  ;;  %v3834_v18 = vrot.slane %v8023_v17, 5  ;;  %v6507_v50 = vrot.slane %v3754_v43, 9  ;;  %v499_v55 = vld [vmem:[#allocation2 + $0x90] sm:$0x1] }
  0xaf   : > { %7475 = vmatpush3.bf16.msra.mxu0 %v8514_v49  ;;  %v825_v12 = vshrl.u32 %v6753_v62, 16  ;;  %v828_v8 = vshll.u32 %v6753_v62, 16  ;;  %v3832_v60 = vsel %vm8630_vm14, %v6506_v0, %v3831_v10  ;;  %v3833_v33 = vrot.slane %v3831_v10, 4  ;;  %v549_v61 = vld [vmem:[#allocation2 + $0x98] sm:$0x1]  ;;  %v6951_v0 = vld [vmem:[%s8199_s24 + $0x60] sm:$0xff]  }
  0xb0   : > { %v1386_v19 = vsel %vm8228_vm3, %v1381_v2, %v1385_v21  ;;  %v819_v20 = vrot.slane %v817_v7, 7  ;;  %7476 = vmatprep.subr.bf16.mxu0 %v7930_v4  ;;  %v3838_v35 = vrot.slane %v8024_v11, 5  ;;  %v1100_v49 = vld [vmem:[#allocation2 + $0x78] sm:$0xf]  ;;  %v3841_v34 = vrot.slane %v8025_v45, 5 }
  0xb1   : > { %v6329_v27 = vcombine.low %v1376_v58, %v1386_v19  ;;  %v827_v46 = vrot.slane %v825_v12, 7  ;;  %v3835_v23 = vsel %vm8630_vm14, %v3833_v33, %v3834_v18  ;;  %v1388_v25 = vshrl.u32 %v1100_v49, 16  ;;  %v7934_v15 = vld [vmem:[%s10036_s3 + $0x198] sm:$0xff]   ;;  %v552_v1 = vld [vmem:[#allocation2 + $0xa4] sm:$0x1] }
  0xb2   : > { %v1391_v38 = vshll.u32 %v1100_v49, 16  ;;  %v822_v29 = vor.u32 %v820_v39, %v819_v20  ;;  %v823_v41 = vrot.slane %v819_v20, 4  ;;  %v6538_v51 = vcombine.low %v3832_v60, %v3835_v23  ;;  %v502_v59 = vld [vmem:[#allocation2 + $0x9c] sm:$0x1]  ;;  %v7938_v60 = vld [vmem:[%s10036_s3 + $0x1a0] sm:$0xff]  }
  0xb3   : > { %7219 = vmatmul.mubr.bf16.gmra.mrb[16].mxu1 %v6329_v27  ;;  %v830_v14 = vor.u32 %v828_v8, %v827_v46  ;;  %v832_v48 = vrot.slane %v827_v46, 4  ;;  %v1038_v52 = vld [vmem:[#allocation2 + $0x84] sm:$0xf]  ;;  %v1042_v9 = vld [vmem:[#allocation2 + $0x8c] sm:$0x1]  ;;  %v3839_v13 = vsel %vm8630_vm14, %v6507_v50, %v3838_v35  ;;  %7477 = vmatpush3.bf16.msra.mxu0 %v7930_v4  ;;  %v1390_v57 = vrot.slane %v1388_v25, 4 }
  0xb4   : > { %v1101_v6 = vld [vmem:[#allocation2 + $0x7c] sm:$0xf]  ;;  %v1393_v21 = vrot.slane %v1391_v38, 5  ;;  %v1039_v28 = vsel %vm8295_vm11, %v822_v29, %v1038_v52  ;;  %v3840_v32 = vrot.slane %v3838_v35, 4  ;;  %7478 = vmatprep.subr.bf16.mxu0 %v7932_v22  ;;  %v1138_v54 = vld [vmem:[#allocation2 + $0x80] sm:$0x1]  ;;  %7446 = vmatprep.mubr.bf16.mxu0 %v6538_v51  ;;  %v6842_v62 = vunpack.c.l.bf16 %v6950_v47 }
  0xb5   : > { %v1397_v31 = vshll.u32 %v1101_v6, 16  ;;  %v1401_v43 = vshrl.u32 %v1101_v6, 16  ;;  %v831_v4 = vsel %vm8286_vm10, %v823_v41, %v830_v14  ;;  %1040 = vst [vmem:[#allocation2 + $0x84] sm:$0xf] %v1039_v28  ;;  %v1043_v58 = vsel %vm8236_vm6, %v832_v48, %v1042_v9  ;;  %v3755_v11 = vld [vmem:[#allocation2 + $0x3c] sm:$0xe] }
  0xb6   : > { %v1394_v56 = vor.u32 %v1393_v21, %v1390_v57  ;;  %v1407_v36 = vshll.u32 %v1138_v54, 16  ;;  %1041 = vst [vmem:[#allocation2 + $0x88] sm:$0xf] %v831_v4  ;;  %1044 = vst [vmem:[#allocation2 + $0x8c] sm:$0x1] %v1043_v58  ;;  %v3842_v5 = vsel %vm8630_vm14, %v3840_v32, %v3841_v34  ;;  %v6843_v39 = vunpack.c.h.bf16 %v6950_v47  ;;  %v7942_v48 = vld [vmem:[%s10036_s3 + $0x1a8] sm:$0xff]  }
  0xb7   : > { %v1399_v10 = vrot.slane %v1397_v31, 5  ;;  %v1403_v2 = vrot.slane %v1401_v43, 4  ;;  %v6539_v7 = vcombine.low %v3839_v13, %v3842_v5  ;;  %7479 = vmatpush3.bf16.msra.mxu0 %v7932_v22  ;;  %v359_v12 = vmul.f32 %v8543_v40, %v6842_v62  ;;  %v7946_v4 = vld [vmem:[%s10036_s3 + $0x1b0] sm:$0xff]  }
  0xb8   : > { %v1395_v17 = vrot.slane %v1394_v56, 4  ;;  %v1409_v18 = vrot.slane %v1407_v36, 5  ;;  %v500_v8 = vsel %vm8236_vm6, 0, %v499_v55  ;;  %7480 = vmatprep.subr.bf16.mxu0 %v7934_v15  ;;  %v360_v19 = vmul.f32 %v8543_v40, %v6843_v39 }
  0xb9   : > { %v1404_v33 = vor.u32 %v1403_v2, %v1399_v10  ;;  %7447 = vmatmul.mubr.bf16.gmra.mrb[4].mxu0 %v6539_v7  ;;  %501 = vst [vmem:[#allocation2 + $0x90] sm:$0x1] %v500_v8  ;;  %v550_v20 = vsel %vm8244_vm8, 0, %v549_v61  ;;  %v6846_v50 = vunpack.c.l.bf16 %v6951_v0  ;;  %v397_v22 = vadd.f32 %v8558_v53, %v359_v12 }
  0xba   : > { %v1400_v35 = vsel %vm8228_vm3, %v1395_v17, %v1399_v10  ;;  %551 = vst [vmem:[#allocation2 + $0x98] sm:$0x1] %v550_v20  ;;  %v6847_v27 = vunpack.c.h.bf16 %v6951_v0  ;;  %v503_v49 = vsel %vm8236_vm6, 0, %v502_v59  ;;  %v398_v23 = vadd.f32 %v8558_v53, %v360_v19 }
  0xbb   : > { %v1405_v46 = vrot.slane %v1404_v33, 4  ;;  %v361_v45 = vmul.f32 %v8543_v40, %v6846_v50  ;;  %504 = vst [vmem:[#allocation2 + $0x9c] sm:$0x1] %v503_v49  ;;  %v553_v34 = vsel %vm8244_vm8, 0, %v552_v1  ;;  %7481 = vmatpush3.bf16.msra.mxu0 %v7934_v15  ;;  %v429_v38 = vmax.f32 %v397_v22, 0.0  ;;  %v7950_v33 = vld [vmem:[%s10036_s3 + $0x1b8] sm:$0xff]  }
  0xbc   : > { %v1102_v25 = vld [vmem:[#allocation2 + $0x84] sm:$0xf]  ;;  %v362_v29 = vmul.f32 %v8543_v40, %v6847_v27  ;;  %554 = vst [vmem:[#allocation2 + $0xa4] sm:$0x1] %v553_v34  ;;  %v6508_v41 = vrot.slane %v3755_v11, 9  ;;  %v3845_v14 = vrot.slane %v8563_v3, 5  ;;  %7482 = vmatprep.subr.bf16.mxu0 %v7938_v60 }
  0xbd   : > { %v1410_v52 = vsel %vm8228_vm3, %v1405_v46, %v1409_v18  ;;  %v1103_v9 = vld [vmem:[#allocation2 + $0x88] sm:$0xf]  ;;  %v1139_v51 = vld [vmem:[#allocation2 + $0x8c] sm:$0x1]  ;;  %v1412_v13 = vshrl.u32 %v1102_v25, 16  ;;  %v1415_v47 = vshll.u32 %v1102_v25, 16  ;;  %v399_v55 = vadd.f32 %v8558_v53, %v361_v45 }
  0xbe   : > { %v6330_v6 = vcombine.low %v1400_v35, %v1410_v52  ;;  %v1421_v40 = vshll.u32 %v1103_v9, 16  ;;  %v1425_v57 = vshrl.u32 %v1103_v9, 16  ;;  %v1431_v21 = vshll.u32 %v1139_v51, 16  ;;  %v8026_v52 = vld [vmem:[#allocation2 + $0x44] sm:$0x1]  ;;  %v6952_v51 = vld [vmem:[%s8199_s24 + $0x68] sm:$0xff]  }
  0xbf   : > { %v1414_v28 = vrot.slane %v1412_v13, 4  ;;  %v1417_v3 = vrot.slane %v1415_v47, 5  ;;  %v430_v32 = vmax.f32 %v398_v23, 0.0  ;;  %v6754_v61 = vpack.c.bf16 %v429_v38, %v429_v38  ;;  %7483 = vmatpush3.bf16.msra.mxu0 %v7938_v60  ;;  %v3756_v60 = vld [vmem:[#allocation2 + $0x48] sm:$0xe] }
  0xc0   : > { %7222 = vmatprep.mubr.bf16.mxu1 %v6330_v6  ;;  %v1423_v15 = vrot.slane %v1421_v40, 5  ;;  %v1427_v54 = vrot.slane %v1425_v57, 4  ;;  %v1433_v31 = vrot.slane %v1431_v21, 5  ;;  %v400_v43 = vadd.f32 %v8558_v53, %v362_v29  ;;  %7484 = vmatprep.subr.bf16.mxu0 %v7942_v48  ;;  %v1045_v17 = vld [vmem:[#allocation2 + $0x90] sm:$0xf]  ;;  %v8791_v29 = vld [vmem:[%s10036_s3 + $0x1c0] sm:$0xff]  }
  0xc1   : > { %v1418_v58 = vor.u32 %v1417_v3, %v1414_v28  ;;  %v6755_v59 = vpack.c.bf16 %v430_v32, %v430_v32  ;;  %v834_v56 = vshrl.u32 %v6754_v61, 16  ;;  %v837_v36 = vshll.u32 %v6754_v61, 16  ;;  %v1049_v35 = vld [vmem:[#allocation2 + $0x98] sm:$0x1]  ;;  %v505_v13 = vld [vmem:[#allocation2 + $0xa8] sm:$0x1] }
  0xc2   : > { %v1428_v5 = vor.u32 %v1427_v54, %v1423_v15  ;;  %v431_v62 = vmax.f32 %v399_v55, 0.0  ;;  %v432_v0 = vmax.f32 %v400_v43, 0.0  ;;  %v8777_v1 = vsel %vm8630_vm14, %v6508_v41, %v3845_v14  ;;  %v1052_v38 = vld [vmem:[#allocation2 + $0x9c] sm:$0xf]  ;;  %v8027_v57 = vld [vmem:[#allocation2 + $0x4c] sm:$0xf] }
  0xc3   : > { %v1419_v10 = vrot.slane %v1418_v58, 4  ;;  %v836_v2 = vrot.slane %v834_v56, 7  ;;  %v842_v7 = vshrl.u32 %v6755_v59, 16  ;;  %v845_v53 = vshll.u32 %v6755_v59, 16  ;;  %7485 = vmatpush3.bf16.msra.mxu0 %v7942_v48  ;;  %v1056_v6 = vld [vmem:[#allocation2 + $0xa4] sm:$0x1] }
  0xc4   : > { %v1429_v39 = vrot.slane %v1428_v5, 4  ;;  %v6756_v18 = vpack.c.bf16 %v431_v62, %v431_v62  ;;  %v6757_v12 = vpack.c.bf16 %v432_v0, %v432_v0  ;;  %v3847_v8 = vrot.slane %v3845_v14, 4  ;;  %7486 = vmatprep.subr.bf16.mxu0 %v7946_v4  ;;  %v555_v28 = vld [vmem:[#allocation2 + $0xb0] sm:$0x1]  ;;  %v558_v43 = vld [vmem:[#allocation2 + $0xbc] sm:$0x1] }
  0xc5   : > { %v1424_v19 = vsel %vm8228_vm3, %v1419_v10, %v1423_v15  ;;  %v839_v20 = vor.u32 %v837_v36, %v836_v2  ;;  %v840_v50 = vrot.slane %v836_v2, 4  ;;  %v844_v11 = vrot.slane %v842_v7, 7  ;;  %v6953_v3 = vld [vmem:[%s8199_s24 + $0x70] sm:$0xff]  }
  0xc6   : > { %v1434_v22 = vsel %vm8228_vm3, %v1429_v39, %v1433_v31  ;;  %v851_v27 = vshrl.u32 %v6756_v18, 16  ;;  %v854_v49 = vshll.u32 %v6756_v18, 16  ;;  %v859_v46 = vshrl.u32 %v6757_v12, 16  ;;  %v508_v31 = vld [vmem:[#allocation2 + $0xb4] sm:$0x1] }
  0xc7   : > { %v6331_v23 = vcombine.low %v1424_v19, %v1434_v22  ;;  %v847_v45 = vor.u32 %v845_v53, %v844_v11  ;;  %v849_v34 = vrot.slane %v844_v11, 4  ;;  %v1046_v25 = vsel %vm8295_vm11, %v839_v20, %v1045_v17  ;;  %7487 = vmatpush3.bf16.msra.mxu0 %v7946_v4  ;;  %v8028_v56 = vld [vmem:[#allocation2 + $0x50] sm:$0x1]  ;;  %v8815_v17 = vld [vmem:[#allocation2 + $0x54] sm:$0xe] }
  0xc8   : > { %1047 = vst [vmem:[#allocation2 + $0x90] sm:$0xf] %v1046_v25  ;;  %v853_v41 = vrot.slane %v851_v27, 7  ;;  %v861_v14 = vrot.slane %v859_v46, 7  ;;  %v862_v48 = vshll.u32 %v6757_v12, 16  ;;  %v3848_v9 = vrot.slane %v8026_v52, 5  ;;  %7488 = vmatprep.subr.bf16.mxu0 %v7950_v33 }
  0xc9   : > { %7223 = vmatmul.mubr.bf16.gmra.mrb[20].mxu1 %v6331_v23  ;;  %v848_v47 = vsel %vm8286_vm10, %v840_v50, %v847_v45  ;;  %v1050_v55 = vsel %vm8236_vm6, %v849_v34, %v1049_v35  ;;  %v6509_v40 = vrot.slane %v3756_v60, 9  ;;  %v3852_v21 = vrot.slane %v8027_v57, 5  ;;  %v8837_v45 = vld [vmem:[%s8211_s30] ss:$0 sm:$0xff] }
  0xca   : > { %1048 = vst [vmem:[#allocation2 + $0x94] sm:$0xf] %v848_v47  ;;  %1051 = vst [vmem:[#allocation2 + $0x98] sm:$0x1] %v1050_v55  ;;  %v856_v32 = vor.u32 %v854_v49, %v853_v41  ;;  %v857_v61 = vrot.slane %v853_v41, 4  ;;  %v864_v15 = vor.u32 %v862_v48, %v861_v14  ;;  %v866_v54 = vrot.slane %v861_v14, 4 }
  0xcb   : > { %v3849_v4 = vsel %vm8630_vm14, %v3847_v8, %v3848_v9  ;;  %v3853_v58 = vsel %vm8630_vm14, %v6509_v40, %v3852_v21  ;;  %v3854_v59 = vrot.slane %v3852_v21, 4  ;;  %v3855_v36 = vrot.slane %v8028_v56, 5  ;;  %7489 = vmatpush3.bf16.msra.mxu0 %v7950_v33  ;;  %v8822_v33 = vld [vmem:[%s8205_s27] ss:$0 sm:$0xff]  ;;  %v8842_v41 = vld [vmem:[#allocation2 + $0x58] sm:$0xf] }
  0xcc   : > { %v865_v5 = vsel %vm8286_vm10, %v857_v61, %v864_v15  ;;  %v1053_v62 = vsel %vm8295_vm11, %v856_v32, %v1052_v38  ;;  %v1057_v0 = vsel %vm8236_vm6, %v866_v54, %v1056_v6  ;;  %v6540_v10 = vcombine.low %v8777_v1, %v3849_v4  ;;  %7522 = vmatprep.subr.bf16.mxu0 %v8791_v29 }
  0xcd   : > { %1054 = vst [vmem:[#allocation2 + $0x9c] sm:$0xf] %v1053_v62  ;;  %1055 = vst [vmem:[#allocation2 + $0xa0] sm:$0xf] %v865_v5  ;;  %v3856_v2 = vsel %vm8630_vm14, %v3854_v59, %v3855_v36  ;;  %v6850_v7 = vunpack.c.l.bf16 %v6952_v51  ;;  %v6851_v53 = vunpack.c.h.bf16 %v6952_v51  ;;  %v506_v39 = vsel %vm8236_vm6, 0, %v505_v13 }
  0xce   : > { %1058 = vst [vmem:[#allocation2 + $0xa4] sm:$0x1] %v1057_v0  ;;  %7450 = vmatprep.mubr.bf16.mxu0 %v6540_v10  ;;  %v6541_v18 = vcombine.low %v3853_v58, %v3856_v2  ;;  %507 = vst [vmem:[#allocation2 + $0xa8] sm:$0x1] %v506_v39  ;;  %v556_v1 = vsel %vm8244_vm8, 0, %v555_v28  ;;  %v6854_v12 = vunpack.c.l.bf16 %v6953_v3  ;;  %v6855_v8 = vunpack.c.h.bf16 %v6953_v3 }
  0xcf   : > { %v8819_v60 = vld [vmem:[#allocation2 + $0x90] sm:$0xf]  ;;  %v363_v19 = vmul.f32 %v8822_v33, %v6850_v7  ;;  %v364_v20 = vmul.f32 %v8822_v33, %v6851_v53  ;;  %557 = vst [vmem:[#allocation2 + $0xb0] sm:$0x1] %v556_v1  ;;  %v509_v50 = vsel %vm8236_vm6, 0, %v508_v31  ;;  %v559_v11 = vsel %vm8244_vm8, 0, %v558_v43 }
  0xd0   : > { %v1436_v35 = vshrl.u32 %v8819_v60, 16  ;;  %v1439_v22 = vshll.u32 %v8819_v60, 16  ;;  %7451 = vmatmul.mubr.bf16.gmra.mrb[8].mxu0 %v6541_v18  ;;  %v365_v27 = vmul.f32 %v8822_v33, %v6854_v12  ;;  %v366_v49 = vmul.f32 %v8822_v33, %v6855_v8  ;;  %510 = vst [vmem:[#allocation2 + $0xb4] sm:$0x1] %v509_v50  ;;  %560 = vst [vmem:[#allocation2 + $0xbc] sm:$0x1] %v559_v11 }
  0xd1   : > { %v8834_v46 = vld [vmem:[#allocation2 + $0x94] sm:$0xf]  ;;  %v1140_v23 = vld [vmem:[#allocation2 + $0x98] sm:$0x1]  ;;  %v401_v34 = vadd.f32 %v8837_v45, %v363_v19  ;;  %v402_v25 = vadd.f32 %v8837_v45, %v364_v20  ;;  %v6510_v38 = vrot.slane %v8815_v17, 9  ;;  %v3859_v14 = vrot.slane %v8842_v41, 5 }
  0xd2   : > { %v1438_v48 = vrot.slane %v1436_v35, 4  ;;  %v1441_v52 = vrot.slane %v1439_v22, 5  ;;  %v1445_v9 = vshll.u32 %v8834_v46, 16  ;;  %v1449_v51 = vshrl.u32 %v8834_v46, 16  ;;  %v3030_v63 = vld [vmem:[#allocation2 + $0x90] sm:$0xf] }
  0xd3   : > { %v1455_v13 = vshll.u32 %v1140_v23, 16  ;;  %v433_v47 = vmax.f32 %v401_v34, 0.0  ;;  %v434_v55 = vmax.f32 %v402_v25, 0.0  ;;  %v403_v6 = vadd.f32 %v8837_v45, %v365_v27 }
  0xd4   : > { %v1442_v40 = vor.u32 %v1441_v52, %v1438_v48  ;;  %v1447_v57 = vrot.slane %v1445_v9, 5  ;;  %v1451_v21 = vrot.slane %v1449_v51, 4  ;;  %v8848_v28 = vld [vmem:[#allocation2 + $0x9c] sm:$0xf]  ;;  %v8850_v3 = vld [vmem:[#allocation2 + $0xa0] sm:$0xf]  ;;  %v404_v32 = vadd.f32 %v8837_v45, %v366_v49 }
  0xd5   : > { %v1457_v61 = vrot.slane %v1455_v13, 5  ;;  %v1141_v15 = vld [vmem:[#allocation2 + $0xa4] sm:$0x1]  ;;  %v1460_v54 = vshrl.u32 %v8848_v28, 16  ;;  %v1463_v31 = vshll.u32 %v8848_v28, 16  ;;  %v1469_v43 = vshll.u32 %v8850_v3, 16 }
  0xd6   : > { %v1443_v4 = vrot.slane %v1442_v40, 4  ;;  %v1452_v58 = vor.u32 %v1451_v21, %v1447_v57  ;;  %v1473_v59 = vshrl.u32 %v8850_v3, 16  ;;  %v1479_v56 = vshll.u32 %v1141_v15, 16  ;;  %v1059_v20 = vld [vmem:[#allocation2 + $0xa8] sm:$0xf] }
  0xd7   : > { %v1462_v36 = vrot.slane %v1460_v54, 4  ;;  %v1465_v5 = vrot.slane %v1463_v31, 5  ;;  %v1471_v62 = vrot.slane %v1469_v43, 5  ;;  %v6758_v0 = vpack.c.bf16 %v433_v47, %v433_v47 }
  0xd8   : > { %v1448_v10 = vsel %vm8228_vm3, %v1443_v4, %v1447_v57  ;;  %v1453_v2 = vrot.slane %v1452_v58, 4  ;;  %v1475_v7 = vrot.slane %v1473_v59, 4  ;;  %v1481_v53 = vrot.slane %v1479_v56, 5  ;;  %v3758_v58 = vld [vmem:[#allocation2 + $0x60] sm:$0xe] }
  0xd9   : > { %v1466_v39 = vor.u32 %v1465_v5, %v1462_v36  ;;  %v6759_v18 = vpack.c.bf16 %v434_v55, %v434_v55  ;;  %v868_v1 = vshrl.u32 %v6758_v0, 16  ;;  %v871_v12 = vshll.u32 %v6758_v0, 16  ;;  %v1063_v55 = vld [vmem:[#allocation2 + $0xb0] sm:$0x1]  ;;  %v1066_v36 = vld [vmem:[#allocation2 + $0xb4] sm:$0xf] }
  0xda   : > { %v1458_v8 = vsel %vm8228_vm3, %v1453_v2, %v1457_v61  ;;  %v1476_v19 = vor.u32 %v1475_v7, %v1471_v62  ;;  %v435_v50 = vmax.f32 %v403_v6, 0.0  ;;  %v436_v11 = vmax.f32 %v404_v32, 0.0  ;;  %v1070_v5 = vld [vmem:[#allocation2 + $0xbc] sm:$0x1] }
  0xdb   : > { %v6332_v35 = vcombine.low %v1448_v10, %v1458_v8  ;;  %v1467_v22 = vrot.slane %v1466_v39, 4  ;;  %v870_v27 = vrot.slane %v868_v1, 7  ;;  %v876_v49 = vshrl.u32 %v6759_v18, 16  ;;  %v8032_v0 = vld [vmem:[#allocation2 + $0x5c] sm:$0x1] }
  0xdc   : > { %v1477_v23 = vrot.slane %v1476_v19, 4  ;;  %v879_v34 = vshll.u32 %v6759_v18, 16  ;;  %v6760_v25 = vpack.c.bf16 %v435_v50, %v435_v50  ;;  %v6761_v48 = vpack.c.bf16 %v436_v11, %v436_v11  ;;  %v3022_v8 = vld [vmem:[#allocation2 + $0x70] sm:$0xf]  ;;  %v3023_v50 = vld [vmem:[#allocation2 + $0x74] sm:$0x1] }
  0xdd   : > { %7226 = vmatprep.mubr.bf16.mxu1 %v6332_v35  ;;  %v1472_v52 = vsel %vm8228_vm3, %v1467_v22, %v1471_v62  ;;  %v873_v9 = vor.u32 %v871_v12, %v870_v27  ;;  %v874_v51 = vrot.slane %v870_v27, 4  ;;  %v878_v13 = vrot.slane %v876_v49, 7 }
  0xde   : > { %v1482_v47 = vsel %vm8228_vm3, %v1477_v23, %v1481_v53  ;;  %v885_v6 = vshrl.u32 %v6760_v25, 16  ;;  %v888_v40 = vshll.u32 %v6760_v25, 16  ;;  %v893_v57 = vshrl.u32 %v6761_v48, 16  ;;  %v3759_v53 = vld [vmem:[#allocation2 + $0x6c] sm:$0xe] }
  0xdf   : > { %v6333_v21 = vcombine.low %v1472_v52, %v1482_v47  ;;  %v881_v32 = vor.u32 %v879_v34, %v878_v13  ;;  %v883_v61 = vrot.slane %v878_v13, 4  ;;  %v1060_v15 = vsel %vm8295_vm11, %v873_v9, %v1059_v20 }
  0xe0   : > { %1061 = vst [vmem:[#allocation2 + $0xa8] sm:$0xf] %v1060_v15  ;;  %v887_v54 = vrot.slane %v885_v6, 7  ;;  %v895_v31 = vrot.slane %v893_v57, 7  ;;  %v896_v43 = vshll.u32 %v6761_v48, 16  ;;  %v3860_v4 = vsel %vm8630_vm14, %v6510_v38, %v3859_v14 }
  0xe1   : > { %7227 = vmatmul.mubr.bf16.gmra.mrb[24].mxu1 %v6333_v21  ;;  %v882_v59 = vsel %vm8286_vm10, %v874_v51, %v881_v32  ;;  %v1064_v56 = vsel %vm8236_vm6, %v883_v61, %v1063_v55  ;;  %v3861_v62 = vrot.slane %v3859_v14, 4  ;;  %v3862_v10 = vrot.slane %v8032_v0, 5  ;;  %v3760_v21 = vld [vmem:[#allocation2 + $0x78] sm:$0xe] }
  0xe2   : > { %1062 = vst [vmem:[#allocation2 + $0xac] sm:$0xf] %v882_v59  ;;  %1065 = vst [vmem:[#allocation2 + $0xb0] sm:$0x1] %v1064_v56  ;;  %v890_v17 = vor.u32 %v888_v40, %v887_v54  ;;  %v891_v2 = vrot.slane %v887_v54, 4  ;;  %v898_v38 = vor.u32 %v896_v43, %v895_v31  ;;  %v900_v7 = vrot.slane %v895_v31, 4 }
  0xe3   : > { %v3863_v39 = vsel %vm8630_vm14, %v3861_v62, %v3862_v10  ;;  %v6511_v18 = vrot.slane %v3758_v58, 9  ;;  %v3866_v1 = vrot.slane %v8673_v44, 5  ;;  %v3869_v12 = vrot.slane %v8675_v26, 5  ;;  %v8911_v58 = vld [vmem:[#allocation2 + $0x80] sm:$0x1] }
  0xe4   : > { %v899_v41 = vsel %vm8286_vm10, %v891_v2, %v898_v38  ;;  %v1067_v14 = vsel %vm8295_vm11, %v890_v17, %v1066_v36  ;;  %v1071_v19 = vsel %vm8236_vm6, %v900_v7, %v1070_v5  ;;  %v6542_v20 = vcombine.low %v3860_v4, %v3863_v39  ;;  %v8909_v4 = vld [vmem:[#allocation2 + $0x7c] sm:$0xf]  ;;  %v3028_v38 = vld [vmem:[#allocation2 + $0x88] sm:$0xf] }
  0xe5   : > { %1068 = vst [vmem:[#allocation2 + $0xb4] sm:$0xf] %v1067_v14  ;;  %1069 = vst [vmem:[#allocation2 + $0xb8] sm:$0xf] %v899_v41  ;;  %v3867_v44 = vsel %vm8630_vm14, %v6511_v18, %v3866_v1  ;;  %v3868_v11 = vrot.slane %v3866_v1, 4  ;;  %v6512_v26 = vrot.slane %v3759_v53, 9 }
  0xe6   : > { %1072 = vst [vmem:[#allocation2 + $0xbc] sm:$0x1] %v1071_v19  ;;  %7454 = vmatprep.mubr.bf16.mxu0 %v6542_v20  ;;  %v3873_v35 = vrot.slane %v3022_v8, 5  ;;  %v3876_v49 = vrot.slane %v3023_v50, 5  ;;  %v6513_v18 = vrot.slane %v3760_v21, 9 }
  0xe7   : > { %v8891_v22 = vld [vmem:[#allocation2 + $0xa8] sm:$0xf]  ;;  %v3870_v27 = vsel %vm8630_vm14, %v3868_v11, %v3869_v12  ;;  %v3029_v1 = vld [vmem:[#allocation2 + $0x8c] sm:$0x1]  ;;  %v3761_v12 = vld [vmem:[#allocation2 + $0x84] sm:$0xe] }
  0xe8   : > { %v1484_v23 = vshrl.u32 %v8891_v22, 16  ;;  %v1487_v34 = vshll.u32 %v8891_v22, 16  ;;  %v6543_v25 = vcombine.low %v3867_v44, %v3870_v27  ;;  %v3874_v9 = vsel %vm8630_vm14, %v6512_v26, %v3873_v35  ;;  %v8033_v19 = vld [vmem:[#allocation2] sm:$0xf]  ;;  %v8919_v20 = vld [vmem:[#allocation2 + $0x4] sm:$0xf] }
  0xe9   : > { %v8897_v48 = vld [vmem:[#allocation2 + $0xac] sm:$0xf]  ;;  %v1142_v52 = vld [vmem:[#allocation2 + $0xb0] sm:$0x1]  ;;  %v3875_v51 = vrot.slane %v3873_v35, 4  ;;  %v6344_v50 = vcombine.low %v8033_v19, %v8919_v20  ;;  %v3880_v27 = vrot.slane %v8909_v4, 5 }
  0xea   : > { %v1486_v13 = vrot.slane %v1484_v23, 4  ;;  %v1489_v47 = vrot.slane %v1487_v34, 5  ;;  %v1493_v55 = vshll.u32 %v8897_v48, 16  ;;  %v1497_v6 = vshrl.u32 %v8897_v48, 16  ;;  %7455 = vmatmul.mubr.bf16.gmra.mrb[12].mxu0 %v6543_v25  ;;  %v3031_v44 = vld [vmem:[#allocation2 + $0x94] sm:$0xf] }
  0xeb   : > { %v1503_v40 = vshll.u32 %v1142_v52, 16  ;;  %v3877_v57 = vsel %vm8630_vm14, %v3875_v51, %v3876_v49  ;;  %v3762_v11 = vld [vmem:[#allocation2 + $0x90] sm:$0xe]  ;;  %v3883_v49 = vrot.slane %v8911_v58, 5  ;;  %v6514_v25 = vrot.slane %v3761_v12, 9 }
  0xec   : > { %v1490_v32 = vor.u32 %v1489_v47, %v1486_v13  ;;  %v1495_v61 = vrot.slane %v1493_v55, 5  ;;  %v1499_v15 = vrot.slane %v1497_v6, 4  ;;  %v8905_v54 = vld [vmem:[#allocation2 + $0xb4] sm:$0xf]  ;;  %v8907_v31 = vld [vmem:[#allocation2 + $0xb8] sm:$0xf]  ;;  %v6544_v43 = vcombine.low %v3874_v9, %v3877_v57 }
  0xed   : > { %v1505_v59 = vrot.slane %v1503_v40, 5  ;;  %v1143_v56 = vld [vmem:[#allocation2 + $0xbc] sm:$0x1]  ;;  %v1508_v36 = vshrl.u32 %v8905_v54, 16  ;;  %v1511_v5 = vshll.u32 %v8905_v54, 16  ;;  %v1517_v62 = vshll.u32 %v8907_v31, 16 }
  0xee   : > { %v1491_v0 = vrot.slane %v1490_v32, 4  ;;  %v1500_v10 = vor.u32 %v1499_v15, %v1495_v61  ;;  %v1521_v17 = vshrl.u32 %v8907_v31, 16  ;;  %v1527_v2 = vshll.u32 %v1143_v56, 16  ;;  %7458 = vmatprep.mubr.bf16.mxu0 %v6544_v43  ;;  %v3032_v55 = vld [vmem:[#allocation2 + $0x98] sm:$0x1] }
  0xef   : > { %v1510_v7 = vrot.slane %v1508_v36, 4  ;;  %v1513_v53 = vrot.slane %v1511_v5, 5  ;;  %v1519_v39 = vrot.slane %v1517_v62, 5  ;;  %v3887_v52 = vrot.slane %v3028_v38, 5  ;;  %v3763_v56 = vld [vmem:[#allocation2 + $0x9c] sm:$0xe] }
  0xf0   : > { %v1496_v8 = vsel %vm8228_vm3, %v1491_v0, %v1495_v61  ;;  %v1501_v41 = vrot.slane %v1500_v10, 4  ;;  %v1523_v14 = vrot.slane %v1521_v17, 4  ;;  %v1529_v35 = vrot.slane %v1527_v2, 5  ;;  %v3035_v10 = vld [vmem:[#allocation2 + $0xa4] sm:$0x1] }
  0xf1   : > { %v1514_v26 = vor.u32 %v1513_v53, %v1510_v7  ;;  %v3881_v13 = vsel %vm8630_vm14, %v6513_v18, %v3880_v27  ;;  %v3882_v47 = vrot.slane %v3880_v27, 4  ;;  %v3888_v40 = vsel %vm8630_vm14, %v6514_v25, %v3887_v52  ;;  %v3037_v17 = vld [vmem:[#allocation2 + $0xac] sm:$0xf]  ;;  %v3764_v18 = vld [vmem:[#allocation2 + $0xa8] sm:$0xe] }
  0xf2   : > { %v1506_v23 = vsel %vm8228_vm3, %v1501_v41, %v1505_v59  ;;  %v1524_v34 = vor.u32 %v1523_v14, %v1519_v39  ;;  %v3889_v57 = vrot.slane %v3887_v52, 4  ;;  %v3890_v21 = vrot.slane %v3029_v1, 5  ;;  %v3034_v59 = vld [vmem:[#allocation2 + $0xa0] sm:$0xf]  ;;  %v3038_v41 = vld [vmem:[#allocation2 + $0xb0] sm:$0x1] }
  0xf3   : > { %v6334_v9 = vcombine.low %v1496_v8, %v1506_v23  ;;  %v1515_v51 = vrot.slane %v1514_v26, 4  ;;  %v3884_v61 = vsel %vm8630_vm14, %v3882_v47, %v3883_v49  ;;  %v6515_v15 = vrot.slane %v3762_v11, 9  ;;  %v3040_v19 = vld [vmem:[#allocation2 + $0xb8] sm:$0xf]  ;;  %v8035_v27 = vld [vmem:[#allocation2 + $0xc] sm:$0xf] }
  0xf4   : > { %v1525_v6 = vrot.slane %v1524_v34, 4  ;;  %v3894_v43 = vrot.slane %v3031_v44, 5  ;;  %v6545_v5 = vcombine.low %v3881_v13, %v3884_v61  ;;  %v3891_v62 = vsel %vm8630_vm14, %v3889_v57, %v3890_v21  ;;  %v6954_v26 = vld [vmem:[%s8199_s24 + $0x78] sm:$0xff]   ;;  %v8945_v49 = vld [vmem:[#allocation2 + $0x10] sm:$0xf] }
  0xf5   : > { %7230 = vmatprep.mubr.bf16.mxu1 %v6334_v9  ;;  %v1520_v32 = vsel %vm8228_vm3, %v1515_v51, %v1519_v39  ;;  %v3897_v0 = vrot.slane %v3032_v55, 5  ;;  %v6546_v38 = vcombine.low %v3888_v40, %v3891_v62  ;;  %v6516_v53 = vrot.slane %v3763_v56, 9  ;;  %v8037_v34 = vld [vmem:[#allocation2 + $0x18] sm:$0xf]  ;;  %v8948_v25 = vld [vmem:[#allocation2 + $0x1c] sm:$0xf] }
  0xf6   : > { %v1530_v36 = vsel %vm8228_vm3, %v1525_v6, %v1529_v35  ;;  %v3896_v7 = vrot.slane %v3894_v43, 4  ;;  %7459 = vmatmul.mubr.bf16.gmra.mrb[16].mxu0 %v6545_v5  ;;  %v3901_v39 = vrot.slane %v3034_v59, 5  ;;  %v3895_v1 = vsel %vm8630_vm14, %v6515_v15, %v3894_v43  ;;  %v511_v35 = vld [vmem:[#allocation2 + $0xc0] sm:$0x1]  ;;  %v3041_v51 = vld [vmem:[#allocation2 + $0xbc] sm:$0x1] }
  0xf7   : > { %v6335_v2 = vcombine.low %v1520_v32, %v1530_v36  ;;  %7462 = vmatprep.mubr.bf16.mxu0 %v6546_v38  ;;  %v3904_v8 = vrot.slane %v3035_v10, 5  ;;  %v3908_v14 = vrot.slane %v3037_v17, 5  ;;  %v6345_v23 = vcombine.low %v8035_v27, %v8945_v49  ;;  %v3765_v13 = vld [vmem:[#allocation2 + $0xb4] sm:$0xe]  ;;  %v561_v40 = vld [vmem:[#allocation2 + $0xc8] sm:$0x1] }
  0xf8   : > { %v3898_v12 = vsel %vm8630_vm14, %v3896_v7, %v3897_v0  ;;  %v3902_v44 = vsel %vm8630_vm14, %v6516_v53, %v3901_v39  ;;  %v3903_v11 = vrot.slane %v3901_v39, 4  ;;  %v6346_v52 = vcombine.low %v8037_v34, %v8948_v25  ;;  %v7941_v36 = vld [vmem:[%s10036_s3 + $0x88] sm:$0xff]   ;;  %v7945_v53 = vld [vmem:[%s10036_s3 + $0x90] sm:$0xff]  }
  0xf9   : > { %7231 = vmatmul.mubr.bf16.gmra.mrb[28].mxu1 %v6335_v2  ;;  %v6517_v9 = vrot.slane %v3764_v18, 9  ;;  %v3911_v55 = vrot.slane %v3038_v41, 5  ;;  %v3915_v6 = vrot.slane %v3040_v19, 5  ;;  %v3910_v21 = vrot.slane %v3908_v14, 4 }
  0xfa   : > { %7250 = vmatprep.mubr.bf16.mxu1 %v6344_v50  ;;  %v6547_v50 = vcombine.low %v3895_v1, %v3898_v12  ;;  %v3905_v47 = vsel %vm8630_vm14, %v3903_v11, %v3904_v8  ;;  %v6858_v32 = vunpack.c.l.bf16 %v6954_v26  ;;  %v6859_v61 = vunpack.c.h.bf16 %v6954_v26  ;;  %v8040_v1 = vld [vmem:[#allocation2 + $0x24] sm:$0xf]  ;;  %v8978_v12 = vld [vmem:[#allocation2 + $0x28] sm:$0xf]  ;;  %v8981_v11 = vld [vmem:[#allocation2 + $0x34] sm:$0xf] }
  0xfb   : > { %v6548_v57 = vcombine.low %v3902_v44, %v3905_v47  ;;  %v6518_v15 = vrot.slane %v3765_v13, 9  ;;  %v3917_v43 = vrot.slane %v3915_v6, 4  ;;  %v3918_v59 = vrot.slane %v3041_v51, 5  ;;  %v8042_v44 = vld [vmem:[#allocation2 + $0x30] sm:$0xf] }
  0xfc   : > { %v512_v56 = vsel %vm8236_vm6, 0, %v511_v35  ;;  %v367_v5 = vmul.f32 %v8822_v33, %v6858_v32  ;;  %v368_v62 = vmul.f32 %v8822_v33, %v6859_v61  ;;  %v562_v0 = vsel %vm8244_vm8, 0, %v561_v40  ;;  %v8039_v33 = vld [vmem:[%s10036_s3 + $0x80] sm:$0xff]   ;;  %v7949_v35 = vld [vmem:[%s10036_s3 + $0x98] sm:$0xff]  }
  0xfd   : > { %513 = vst [vmem:[#allocation2 + $0xc0] sm:$0x1] %v512_v56  ;;  %v3909_v10 = vsel %vm8630_vm14, %v6517_v9, %v3908_v14  ;;  %563 = vst [vmem:[#allocation2 + $0xc8] sm:$0x1] %v562_v0  ;;  %v3912_v17 = vsel %vm8630_vm14, %v3910_v21, %v3911_v55  ;;  %v3916_v42 = vsel %vm8630_vm14, %v6518_v15, %v3915_v6  ;;  %v8044_v21 = vld [vmem:[#allocation2 + $0x3c] sm:$0xf] }
  0xfe   : > { %7463 = vmatmul.mubr.bf16.gmra.mrb[20].mxu0 %v6547_v50  ;;  %v405_v2 = vadd.f32 %v8837_v45, %v367_v5  ;;  %v406_v38 = vadd.f32 %v8837_v45, %v368_v62  ;;  %v3919_v7 = vsel %vm8630_vm14, %v3917_v43, %v3918_v59  ;;  %v6549_v45 = vcombine.low %v3909_v10, %v3912_v17  ;;  %v8990_v32 = vld [vmem:[#allocation2 + $0x40] sm:$0xf]  ;;  %v8046_v56 = vld [vmem:[#allocation2 + $0x48] sm:$0xf]  ;;  %v9008_v62 = vld [vmem:[#allocation2 + $0x58] sm:$0xf] }
  0xff   : > { %7466 = vmatprep.mubr.bf16.mxu0 %v6548_v57  ;;  %v6347_v8 = vcombine.low %v8040_v1, %v8978_v12  ;;  %v6550_v41 = vcombine.low %v3916_v42, %v3919_v7  ;;  %v6348_v26 = vcombine.low %v8042_v44, %v8981_v11  ;;  %v7953_v57 = vld [vmem:[%s10036_s3 + $0xa0] sm:$0xff]   ;;  %v6349_v61 = vcombine.low %v8044_v21, %v8990_v32 }
 0x100   : > { %v437_v39 = vmax.f32 %v405_v2, 0.0  ;;  %v438_v18 = vmax.f32 %v406_v38, 0.0  ;;  %v6351_v0 = vcombine.low %v8048_v24, %v9008_v62  ;;  %v8050_v7 = vld [vmem:[#allocation2 + $0x60] sm:$0xf] }
 0x101   : > { %7251 = vmatmul.mubr.bf16.vlgmr.msra.gmra.mrb[0].mxu1 %v6345_v23  ;;  %v2126_v44 = vld [vmem:[#allocation2] sm:$0xe] }
 0x102   : > { %7283 = vmatpush3.bf16.msra.mxu1 %v8039_v33  ;;  %7254 = vmatprep.mubr.bf16.mxu1 %v6346_v52  ;;  %v6762_v14 = vpack.c.bf16 %v437_v39, %v437_v39  ;;  %v6763_v19 = vpack.c.bf16 %v438_v18, %v438_v18  ;;  %v7971_v18 = vld [vmem:[%s10036_s3 + $0xb8] sm:$0xff]  }
 0x103   : > { %7284 = vmatprep.subr.bf16.mxu1 %v7941_v36 }
 0x104   : > { %v902_v27 = vshrl.u32 %v6762_v14, 16  ;;  %v905_v23 = vshll.u32 %v6762_v14, 16  ;;  %v910_v34 = vshrl.u32 %v6763_v19, 16  ;;  %v913_v52 = vshll.u32 %v6763_v19, 16  ;;  %v1073_v13 = vld [vmem:[#allocation2 + $0xc0] sm:$0xf] }
 0x105   : > { %v1077_v50 = vld [vmem:[#allocation2 + $0xc8] sm:$0x1]  ;;  %v3275_v14 = vshrl.u32 %v8909_v4, 16 }
 0x106   : > { %7285 = vmatpush3.bf16.msra.mxu1 %v7941_v36  ;;  %7467 = vmatmul.mubr.bf16.gmra.mrb[24].mxu0 %v6549_v45  ;;  %v904_v9 = vrot.slane %v902_v27, 7  ;;  %v912_v51 = vrot.slane %v910_v34, 7  ;;  %v8999_v36 = vld [vmem:[#allocation2 + $0x4c] sm:$0xf]  ;;  %v2179_v27 = vrot.slane %v8919_v20, 5  ;;  %v9028_v34 = vld [vmem:[%s10036_s3 + $0xc0] sm:$0xff]  }
 0x107   : > { %7286 = vmatprep.subr.bf16.mxu1 %v7945_v53  ;;  %7470 = vmatprep.mubr.bf16.mxu0 %v6550_v41  ;;  %v6350_v5 = vcombine.low %v8046_v56, %v8999_v36  ;;  %v3271_v41 = vshll.u32 %v8909_v4, 16  ;;  %v9038_v21 = vrot.slane %v3275_v14, 4  ;;  %v7961_v14 = vld [vmem:[%s10036_s3 + $0x1c8] sm:$0xff]  }
 0x108   : > { %v907_v47 = vor.u32 %v905_v23, %v904_v9  ;;  %v908_v55 = vrot.slane %v904_v9, 4  ;;  %v915_v6 = vor.u32 %v913_v52, %v912_v51  ;;  %v917_v40 = vrot.slane %v912_v51, 4  ;;  %v8052_v52 = vld [vmem:[#allocation2 + $0x8] sm:$0x1]  ;;  %v2128_v9 = vld [vmem:[#allocation2 + $0x18] sm:$0xe] }
 0x109   : > { %7255 = vmatmul.mubr.bf16.gmra.mrb[4].mxu1 %v6347_v8  ;;  %v7954_v8 = vld [vmem:[#allocation2 + $0x18] sm:$0xff]   ;;  %v2186_v23 = vrot.slane %v8945_v49, 5  ;;  %v2182_v4 = vrot.slane %v8052_v52, 5  ;;  %v2193_v51 = vrot.slane %v8948_v25, 5  ;;  %v2129_v49 = vld [vmem:[#allocation2 + $0x24] sm:$0xe] }
 0x10a   : > { %7258 = vmatprep.mubr.bf16.mxu1 %v6348_v26  ;;  %7287 = vmatpush3.bf16.msra.mxu1 %v7945_v53  ;;  %v916_v15 = vsel %vm8286_vm10, %v908_v55, %v915_v6  ;;  %v1074_v43 = vsel %vm8295_vm11, %v907_v47, %v1073_v13  ;;  %v1078_v59 = vsel %vm8236_vm6, %v917_v40, %v1077_v50  ;;  %v9011_v53 = vld [vmem:[#allocation2 + $0x64] sm:$0xf]  ;;  %v2127_v26 = vld [vmem:[#allocation2 + $0xc] sm:$0xe]  ;;  %v8053_v13 = vld [vmem:[#allocation2 + $0x14] sm:$0x1] }
 0x10b   : > { %7288 = vmatprep.subr.bf16.mxu1 %v7949_v35  ;;  %1075 = vst [vmem:[#allocation2 + $0xc0] sm:$0xf] %v1074_v43  ;;  %1076 = vst [vmem:[#allocation2 + $0xc4] sm:$0xf] %v916_v15  ;;  %v6352_v39 = vcombine.low %v8050_v7, %v9011_v53  ;;  %v2189_v50 = vrot.slane %v8053_v13, 5  ;;  %v2200_v40 = vrot.slane %v8978_v12, 5 }
 0x10c   : > { %1079 = vst [vmem:[#allocation2 + $0xc8] sm:$0x1] %v1078_v59  ;;  %v8054_v55 = vld [vmem:[#allocation2 + $0x6c] sm:$0xf]  ;;  %v9032_v6 = vld [vmem:[#allocation2 + $0x70] sm:$0xf] }
 0x10d   : > { %v6353_v20 = vcombine.low %v8054_v55, %v9032_v6  ;;  %v9040_v25 = vld [vmem:[#allocation2 + $0x7c] sm:$0xf]  ;;  %v6368_v43 = vrot.slane %v2126_v44, 9  ;;  %v7956_v59 = vld [vmem:[#allocation2 + $0x24] sm:$0xff]   ;;  %v2181_v56 = vrot.slane %v2179_v27, 4  ;;  %v2195_v24 = vrot.slane %v2193_v51, 4 }
 0x10e   : > { %7289 = vmatpush3.bf16.msra.mxu1 %v7949_v35  ;;  %v2130_v12 = vld [vmem:[#allocation2 + $0x30] sm:$0xe]  ;;  %v2214_v52 = vrot.slane %v8990_v32, 5  ;;  %v4641_v55 = vld [vmem:[#allocation2 + $0x2c] sm:$0x1] }
 0x10f   : > { %7290 = vmatprep.subr.bf16.mxu1 %v7953_v57 }
 0x111   : > { %7259 = vmatmul.mubr.bf16.gmra.mrb[8].mxu1 %v6349_v61  ;;  %v8056_v61 = vld [vmem:[#allocation2 + $0x78] sm:$0xf] }
 0x112   : > { %7262 = vmatprep.mubr.bf16.mxu1 %v6350_v5  ;;  %7291 = vmatpush3.bf16.msra.mxu1 %v7953_v57  ;;  %v3043_v10 = vld [vmem:[#allocation2 + $0xc4] sm:$0xf]  ;;  %v3766_v2 = vld [vmem:[#allocation2 + $0xc0] sm:$0xe]  ;;  %v9036_v57 = vrot.slane %v3271_v41, 5  ;;  %v6354_v15 = vcombine.low %v8056_v61, %v9040_v25  ;;  %v6369_v5 = vrot.slane %v2127_v26, 9 }
 0x113   : > { %7292 = vmatprep.subr.bf16.mxu1 %v7959_v16  ;;  %v3044_v17 = vld [vmem:[#allocation2 + $0xc8] sm:$0x1]  ;;  %v6519_v38 = vrot.slane %v3766_v2, 9  ;;  %v3922_v33 = vrot.slane %v3043_v10, 5  ;;  %v2207_v2 = vrot.slane %v8981_v11, 5  ;;  %v9054_v11 = vsel %vm8630_vm14, %v6368_v43, %v2179_v27  ;;  %v7962_v61 = vld [vmem:[#allocation2 + $0x3c] sm:$0xff]  }
 0x114   : > { %v3925_v42 = vrot.slane %v3044_v17, 5  ;;  %10062 = vst [vmem:[#allocation3_spill] sm:$0xff] %v9036_v57  ;;  %v6371_v17 = vrot.slane %v2129_v49, 9  ;;  %v2131_v41 = vld [vmem:[#allocation2 + $0x3c] sm:$0xe]  ;;  %v9065_v44 = vsel %vm8630_vm14, %v6369_v5, %v2186_v23  ;;  %v2221_v49 = vrot.slane %v8999_v36, 5 }
 0x115   : > { %v3923_v45 = vsel %vm8630_vm14, %v6519_v38, %v3922_v33  ;;  %v3924_v1 = vrot.slane %v3922_v33, 4  ;;  %v2202_v38 = vrot.slane %v2200_v40, 4  ;;  %v8059_v33 = vld [vmem:[#allocation2 + $0x2c] sm:$0x1]  ;;  %v2209_v27 = vrot.slane %v2207_v2, 4 }
 0x116   : > { %7293 = vmatpush3.bf16.msra.mxu1 %v7959_v16  ;;  %v2188_v16 = vrot.slane %v2186_v23, 4  ;;  %v9084_v23 = vsel %vm8630_vm14, %v6371_v17, %v2200_v40  ;;  %v4636_v40 = vld [vmem:[#allocation2 + $0x18] sm:$0xf]  ;;  %v9111_v5 = vld [vmem:[#allocation2 + $0x54] sm:$0xe]  ;;  %v10064_v36 = vcombine.low %v8891_v22, %v8897_v48 }
 0x117   : > { %7294 = vmatprep.subr.bf16.mxu1 %v7965_v37  ;;  %v3926_v19 = vsel %vm8630_vm14, %v3924_v1, %v3925_v42  ;;  %v2203_v42 = vrot.slane %v8059_v33, 5  ;;  %v7960_v1 = vld [vmem:[#allocation2 + $0x30] sm:$0xff]   ;;  %v7973_v33 = vld [vmem:[%s10036_s3 + $0x1d8] sm:$0xff]  }
 0x118   : > { %v6551_v35 = vcombine.low %v3923_v45, %v3926_v19  ;;  %v9061_v19 = vsel %vm8630_vm14, %v2181_v56, %v2182_v4  ;;  %v9080_v4 = vld [vmem:[#allocation2 + $0x48] sm:$0xe] }
 0x119   : > { %7263 = vmatmul.mubr.bf16.gmra.mrb[12].mxu1 %v6351_v0  ;;  %v8058_v0 = vld [vmem:[#allocation2 + $0x20] sm:$0x1]  ;;  %v6374_v17 = vrot.slane %v9080_v4, 9  ;;  %v8064_v4 = vld [vmem:[#allocation2 + $0x50] sm:$0x1] }
 0x11a   : > { %7266 = vmatprep.mubr.bf16.mxu1 %v6352_v39  ;;  %7295 = vmatpush3.bf16.msra.mxu1 %v7965_v37  ;;  %v6370_v37 = vrot.slane %v2128_v9, 9  ;;  %v2196_v10 = vrot.slane %v8058_v0, 5  ;;  %v8060_v39 = vld [vmem:[#allocation2 + $0x84] sm:$0xf]  ;;  %v9088_v9 = vsel %vm8630_vm14, %v2202_v38, %v2203_v42 }
 0x11b   : > { %7296 = vmatprep.subr.bf16.mxu1 %v7971_v18  ;;  %7471 = vmatmul.mubr.bf16.gmra.mrb[28].mxu0 %v6551_v35  ;;  %v8063_v0 = vld [vmem:[#allocation2 + $0x44] sm:$0x1] }
 0x11c   : > { %7490 = vmatprep.mubr.bf16.mxu0 %v7954_v8  ;;  %v6356_v8 = vcombine.low %v8819_v60, %v8834_v46  ;;  %v9069_v60 = vsel %vm8630_vm14, %v2188_v16, %v2189_v50  ;;  %v6372_v46 = vrot.slane %v2130_v12, 9  ;;  %v9073_v26 = vsel %vm8630_vm14, %v6370_v37, %v2193_v51  ;;  %v8062_v51 = vld [vmem:[#allocation2 + $0x38] sm:$0x1]  ;;  %v4637_v16 = vld [vmem:[#allocation2 + $0x1c] sm:$0xf]  ;;  %v7966_v37 = vld [vmem:[#allocation2 + $0x48] sm:$0xff]  }
 0x11d   : > { %v9077_v35 = vsel %vm8630_vm14, %v2195_v24, %v2196_v10  ;;  %v2210_v13 = vrot.slane %v8062_v51, 5  ;;  %v6373_v50 = vrot.slane %v2131_v41, 9  ;;  %v2216_v24 = vrot.slane %v2214_v52, 4  ;;  %v4639_v38 = vld [vmem:[#allocation2 + $0x24] sm:$0xf] }
 0x11e   : > { %7297 = vmatpush3.bf16.msra.mxu1 %v7971_v18  ;;  %v9047_v18 = vld [vmem:[#allocation2 + $0x88] sm:$0xf]  ;;  %v9109_v56 = vsel %vm8630_vm14, %v6372_v46, %v2207_v2  ;;  %v2217_v10 = vrot.slane %v8063_v0, 5  ;;  %v4688_v41 = vshll.u32 %v4636_v40, 16  ;;  %v2224_v51 = vrot.slane %v8064_v4, 5 }
 0x11f   : > { %7330 = vmatprep.subr.bf16.mxu1 %v9028_v34  ;;  %v6355_v45 = vcombine.low %v8060_v39, %v9047_v18  ;;  %v9121_v2 = vsel %vm8630_vm14, %v2209_v27, %v2210_v13  ;;  %v9125_v42 = vsel %vm8630_vm14, %v6373_v50, %v2214_v52  ;;  %v9127_v39 = vld [vmem:[#allocation2 + $0x60] sm:$0xe]  ;;  %v4640_v46 = vld [vmem:[#allocation2 + $0x28] sm:$0xf]  ;;  %v9131_v0 = vld [vmem:[#allocation2 + $0x6c] sm:$0xe] }
 0x120   : > { %v4694_v27 = vshll.u32 %v4637_v16, 16  ;;  %v4698_v13 = vshrl.u32 %v4637_v16, 16  ;;  %v6375_v52 = vrot.slane %v9111_v5, 9  ;;  %v2228_v50 = vrot.slane %v9008_v62, 5  ;;  %v7977_v16 = vld [vmem:[%s10036_s3 + $0x1e0] sm:$0xff]  }
 0x121   : > { %7267 = vmatmul.mubr.bf16.gmra.mrb[16].mxu1 %v6353_v20  ;;  %v4709_v7 = vshrl.u32 %v4639_v38, 16  ;;  %v4712_v47 = vshll.u32 %v4639_v38, 16  ;;  %v4718_v12 = vshll.u32 %v4640_v46, 16  ;;  %v2235_v4 = vrot.slane %v9011_v53, 5  ;;  %v4638_v62 = vld [vmem:[#allocation2 + $0x20] sm:$0x1] }
 0x122   : > { %7270 = vmatprep.mubr.bf16.mxu1 %v6354_v15  ;;  %v7967_v15 = vld [vmem:[%s10036_s3 + $0x1d0] sm:$0xff]   ;;  %v2242_v5 = vrot.slane %v9032_v6, 5  ;;  %v4690_v38 = vrot.slane %v4688_v41, 5  ;;  %v6377_v20 = vrot.slane %v9131_v0, 9  ;;  %v6404_v6 = vcombine.low %v9109_v56, %v9121_v2 }
 0x123   : > { %7491 = vmatmul.mubr.bf16.vlgmr.msra.gmra.mrb[0].mxu0 %v7956_v59  ;;  %v4722_v59 = vshrl.u32 %v4640_v46, 16  ;;  %v2230_v46 = vrot.slane %v2228_v50, 4  ;;  %v4711_v53 = vrot.slane %v4709_v7, 4  ;;  %v4714_v32 = vrot.slane %v4712_v47, 5  ;;  %v7968_v41 = vld [vmem:[#allocation2 + $0x54] sm:$0xff]  }
 0x124   : > { %7523 = vmatpush3.bf16.msra.mxu0 %v8791_v29  ;;  %7494 = vmatprep.mubr.bf16.mxu0 %v7960_v1  ;;  %v4685_v1 = vshrl.u32 %v4636_v40, 16  ;;  %v9145_v29 = vrot.slane %v4694_v27, 5  ;;  %v2237_v0 = vrot.slane %v2235_v4, 4  ;;  %v2244_v7 = vrot.slane %v2242_v5, 4  ;;  %v8067_v47 = vld [vmem:[#allocation2 + $0x74] sm:$0x1] }
 0x125   : > { %7524 = vmatprep.subr.bf16.mxu0 %v7961_v14  ;;  %v2245_v27 = vrot.slane %v8067_v47, 5  ;;  %v9176_v22 = vsel %vm8630_vm14, %v6375_v52, %v2228_v50  ;;  %v4715_v48 = vor.u32 %v4714_v32, %v4711_v53 }
 0x126   : > { %v4687_v43 = vrot.slane %v4685_v1, 4  ;;  %v10063_v1 = vcombine.low %v8848_v28, %v8850_v3  ;;  %v4728_v28 = vshll.u32 %v4641_v55, 16  ;;  %v7981_v3 = vld [vmem:[%s10036_s3 + $0x1e8] sm:$0xff]  }
 0x127   : > { %v9199_v52 = vsel %vm8630_vm14, %v2244_v7, %v2245_v27  ;;  %v8069_v7 = vld [vmem:[#allocation2 + $0x8c] sm:$0x1]  ;;  %v10065_v27 = vcombine.low %v8905_v54, %v8907_v31  ;;  %v9275_v54 = vld [vmem:[#allocation2 + $0x58] sm:$0xf] }
 0x128   : > { %7525 = vmatpush3.bf16.msra.mxu0 %v7961_v14  ;;  %v9137_v14 = vsel %vm8630_vm14, %v2216_v24, %v2217_v10  ;;  %v6376_v24 = vrot.slane %v9127_v39, 9  ;;  %v8066_v10 = vld [vmem:[#allocation2 + $0x68] sm:$0x1]  ;;  %v4724_v39 = vrot.slane %v4722_v59, 4  ;;  %v2259_v47 = vrot.slane %v8069_v7, 5  ;;  %10068 = vst [vmem:[#allocation4_spill] sm:$0xff] %v9275_v54 }
 0x129   : > { %7271 = vmatmul.mubr.bf16.gmra.mrb[20].mxu1 %v6355_v45  ;;  %v2223_v45 = vrot.slane %v2221_v49, 4  ;;  %7526 = vmatprep.subr.bf16.mxu0 %v7967_v15 }
 0x12a   : > { %7274 = vmatprep.mubr.bf16.mxu1 %v6356_v8  ;;  %v8065_v8 = vld [vmem:[#allocation2 + $0x5c] sm:$0x1] }
 0x12b   : > { %v2231_v40 = vrot.slane %v8065_v8, 5  ;;  %7495 = vmatmul.mubr.bf16.gmra.mrb[4].mxu0 %v7962_v61  ;;  %v2238_v8 = vrot.slane %v8066_v10, 5  ;;  %v4700_v61 = vrot.slane %v4698_v13, 4  ;;  %v4691_v13 = vor.u32 %v4690_v38, %v4687_v43  ;;  %v7972_v10 = vld [vmem:[#allocation2 + $0x60] sm:$0xff]  }
 0x12c   : > { %7498 = vmatprep.mubr.bf16.mxu0 %v7966_v37  ;;  %7527 = vmatpush3.bf16.msra.mxu0 %v7967_v15  ;;  %v9154_v15 = vsel %vm8630_vm14, %v6374_v17, %v2221_v49  ;;  %v9156_v37 = vrot.slane %v4718_v12, 5  ;;  %v4704_v12 = vshll.u32 %v4638_v62, 16  ;;  %v9172_v43 = vsel %vm8630_vm14, %v2223_v45, %v2224_v51  ;;  %v2136_v17 = vld [vmem:[#allocation2 + $0x78] sm:$0xe]  ;;  %v2137_v45 = vld [vmem:[#allocation2 + $0x84] sm:$0xe] }
 0x12d   : > { %7528 = vmatprep.subr.bf16.mxu0 %v7973_v33  ;;  %v4701_v59 = vor.u32 %v4700_v61, %v9145_v29  ;;  %v9181_v55 = vsel %vm8630_vm14, %v2230_v46, %v2231_v40  ;;  %v9185_v62 = vsel %vm8630_vm14, %v6376_v24, %v2235_v4  ;;  %v2256_v51 = vrot.slane %v9047_v18, 5  ;;  %v4642_v40 = vld [vmem:[#allocation2 + $0x30] sm:$0xf]  ;;  %v8068_v46 = vld [vmem:[#allocation2 + $0x80] sm:$0x1] }
 0x12e   : > { %v4725_v38 = vor.u32 %v4724_v39, %v9156_v37  ;;  %v9191_v32 = vsel %vm8630_vm14, %v2237_v0, %v2238_v8  ;;  %v9201_v50 = vrot.slane %v4691_v13, 4  ;;  %v7985_v18 = vld [vmem:[%s10036_s3 + $0x1f0] sm:$0xff]   ;;  %v4706_v24 = vrot.slane %v4704_v12, 5  ;;  %v7982_v49 = vld [vmem:[#allocation2 + $0x9c] sm:$0xff]  }
 0x12f   : > { %v4702_v4 = vrot.slane %v4701_v59, 4  ;;  %v4730_v8 = vrot.slane %v4728_v28, 5  ;;  %v6378_v61 = vrot.slane %v2136_v17, 9  ;;  %v2252_v53 = vrot.slane %v8068_v46, 5  ;;  %v7974_v13 = vld [vmem:[#allocation2 + $0x6c] sm:$0xff]  }
 0x130   : > { %7529 = vmatpush3.bf16.msra.mxu0 %v7973_v33  ;;  %v2249_v33 = vrot.slane %v9040_v25, 5  ;;  %v9195_v25 = vsel %vm8630_vm14, %v6377_v20, %v2242_v5  ;;  %v4716_v20 = vrot.slane %v4715_v48, 4  ;;  %v6379_v39 = vrot.slane %v2137_v45, 9  ;;  %v4644_v17 = vld [vmem:[#allocation2 + $0x38] sm:$0x1] }
 0x131   : > { %7275 = vmatmul.mubr.bf16.gmra.mrb[24].mxu1 %v10063_v1  ;;  %7530 = vmatprep.subr.bf16.mxu0 %v7977_v16  ;;  %v4643_v1 = vld [vmem:[#allocation2 + $0x34] sm:$0xf]  ;;  %v2258_v0 = vrot.slane %v2256_v51, 4  ;;  %v4736_v28 = vshll.u32 %v4642_v40, 16  ;;  %v10066_v48 = vcombine.low %v9054_v11, %v9061_v19  ;;  %v4697_v31 = vsel %vm8228_vm3, %v9201_v50, %v9145_v29  ;;  %v4645_v46 = vld [vmem:[#allocation2 + $0x3c] sm:$0xf] }
 0x132   : > { %7278 = vmatprep.mubr.bf16.mxu1 %v10064_v36  ;;  %v2251_v5 = vrot.slane %v2249_v33, 4  ;;  %v7976_v36 = vld [vmem:[#allocation2 + $0x78] sm:$0xff]   ;;  %v4746_v45 = vshrl.u32 %v4643_v1, 16  ;;  %v4707_v11 = vsel %vm8228_vm3, %v4702_v4, %v4706_v24  ;;  %v9231_v19 = vsel %vm8630_vm14, %v6378_v61, %v2249_v33  ;;  %v4646_v50 = vld [vmem:[#allocation2 + $0x40] sm:$0xf] }
 0x133   : > { %7499 = vmatmul.mubr.bf16.gmra.mrb[8].mxu0 %v7968_v41  ;;  %v4726_v41 = vrot.slane %v4725_v38, 4  ;;  %v4742_v38 = vshll.u32 %v4643_v1, 16  ;;  %v9239_v29 = vsel %vm8630_vm14, %v6379_v39, %v2256_v51  ;;  %v4721_v1 = vsel %vm8228_vm3, %v4716_v20, %v9156_v37  ;;  %v4648_v61 = vld [vmem:[#allocation2 + $0x48] sm:$0xf]  ;;  %v9250_v39 = vld [vmem:[#allocation2 + $0x4c] sm:$0xf] }
 0x134   : > { %7502 = vmatprep.mubr.bf16.mxu0 %v7972_v10  ;;  %7531 = vmatpush3.bf16.msra.mxu0 %v7977_v16  ;;  %v4733_v16 = vshrl.u32 %v4642_v40, 16  ;;  %v7989_v40 = vld [vmem:[%s10036_s3 + $0x1f8] sm:$0xff]   ;;  %v9248_v33 = vsel %vm8630_vm14, %v2258_v0, %v2259_v47  ;;  %v4757_v7 = vshrl.u32 %v4645_v46, 16  ;;  %v4760_v51 = vshll.u32 %v4645_v46, 16  ;;  %v4647_v20 = vld [vmem:[#allocation2 + $0x44] sm:$0x1] }
 0x135   : > { %7532 = vmatprep.subr.bf16.mxu0 %v7981_v3  ;;  %v4731_v4 = vsel %vm8228_vm3, %v4726_v41, %v4730_v8  ;;  %v4748_v37 = vrot.slane %v4746_v45, 4  ;;  %v4766_v8 = vshll.u32 %v4646_v50, 16  ;;  %v4770_v41 = vshrl.u32 %v4646_v50, 16  ;;  %v7979_v0 = vld [vmem:[%s10036_s3 + $0xc8] sm:$0xff]   ;;  %v2139_v10 = vld [vmem:[#allocation2 + $0x9c] sm:$0xe] }
 0x136   : > { %v4735_v24 = vrot.slane %v4733_v16, 4  ;;  %v9257_v47 = vcombine.low %v4697_v31, %v4707_v11  ;;  %v4794_v31 = vshrl.u32 %v9250_v39, 16  ;;  %v10067_v45 = vcombine.low %v9065_v44, %v9069_v60  ;;  %v7978_v46 = vld [vmem:[#allocation2 + $0x84] sm:$0xff]  }
 0x137   : > { %v4759_v50 = vrot.slane %v4757_v7, 4  ;;  %v4776_v16 = vshll.u32 %v4647_v20, 16  ;;  %v9284_v44 = vrot.slane %v4766_v8, 5  ;;  %v4772_v60 = vrot.slane %v4770_v41, 4 }
 0x138   : > { %7533 = vmatpush3.bf16.msra.mxu0 %v7981_v3  ;;  %v9235_v3 = vsel %vm8630_vm14, %v2251_v5, %v2252_v53  ;;  %v4738_v5 = vrot.slane %v4736_v28, 5  ;;  %v4752_v53 = vshll.u32 %v4644_v17, 16  ;;  %v4784_v28 = vshll.u32 %v4648_v61, 16 }
 0x139   : > { %7279 = vmatmul.mubr.bf16.gmra.mrb[28].mxu1 %v10065_v27  ;;  %7534 = vmatprep.subr.bf16.mxu0 %v7985_v18  ;;  %v9252_v27 = vrot.slane %v4742_v38, 5  ;;  %v4790_v17 = vshll.u32 %v9250_v39, 16  ;;  %v4651_v38 = vld [vmem:[#allocation2 + $0x54] sm:$0xf]  ;;  %v4818_v20 = vshrl.u32 %v9275_v54, 16 }
 0x13a   : > { %7298 = vmatprep.mubr.bf16.mxu1 %v10066_v48  ;;  %v4739_v11 = vor.u32 %v4738_v5, %v4735_v24  ;;  %v9282_v12 = vrot.slane %v4752_v53, 5  ;;  %v2138_v24 = vld [vmem:[#allocation2 + $0x90] sm:$0xe]  ;;  %v4786_v7 = vrot.slane %v4784_v28, 5  ;;  %v4796_v53 = vrot.slane %v4794_v31, 4 }
 0x13b   : > { %7503 = vmatmul.mubr.bf16.gmra.mrb[12].mxu0 %v7974_v13  ;;  %v4781_v13 = vshrl.u32 %v4648_v61, 16  ;;  %v4762_v61 = vrot.slane %v4760_v51, 5  ;;  %v4749_v48 = vor.u32 %v4748_v37, %v9252_v27  ;;  %v7983_v5 = vld [vmem:[%s10036_s3 + $0xd0] sm:$0xff]   ;;  %v4805_v51 = vshrl.u32 %v4651_v38, 16 }
 0x13c   : > { %7506 = vmatprep.mubr.bf16.mxu0 %v7976_v36  ;;  %7535 = vmatpush3.bf16.msra.mxu0 %v7985_v18  ;;  %v9264_v18 = vld [vmem:[%s10036_s3 + $0x200] sm:$0xff]   ;;  %v9266_v36 = vcombine.low %v4721_v1, %v4731_v4  ;;  %v10069_v1 = vcombine.low %v9073_v26, %v9077_v35  ;;  %v7980_v4 = vld [vmem:[#allocation2 + $0x90] sm:$0xff]   ;;  %v4808_v26 = vshll.u32 %v4651_v38, 16  ;;  %v9290_v35 = vrot.slane %v4790_v17, 5 }
 0x13d   : > { %7536 = vmatprep.subr.bf16.mxu0 %v7989_v40  ;;  %v4814_v37 = vshll.u32 %v9275_v54, 16  ;;  %v9294_v8 = vrot.slane %v4739_v11, 4  ;;  %v4763_v41 = vor.u32 %v4762_v61, %v4759_v50  ;;  %v9300_v28 = vrot.slane %v4749_v48, 4  ;;  %v8070_v31 = vld [vmem:[#allocation2 + $0x94] sm:$0xf] }
 0x13e   : > { %v4773_v17 = vor.u32 %v4772_v60, %v9284_v44  ;;  %v2263_v38 = vrot.slane %v8070_v31, 5  ;;  %v4807_v61 = vrot.slane %v4805_v51, 4  ;;  %v9308_v60 = vld [vmem:[#allocation2 + $0x5c] sm:$0x1]  ;;  %v4820_v31 = vrot.slane %v4818_v20, 4 }
 0x13f   : > { %10070 = vst [vmem:[#allocation5_spill] sm:$0xff] %v9308_v60  ;;  %v6381_v51 = vrot.slane %v2139_v10, 9  ;;  %v2140_v54 = vld [vmem:[#allocation2 + $0xa8] sm:$0xe]  ;;  %v7991_v10 = vld [vmem:[%s10036_s3 + $0xe0] sm:$0xff]   ;;  %v4824_v2 = vshll.u32 %v9308_v60, 16 }
 0x140   : > { %7537 = vmatpush3.bf16.msra.mxu0 %v7989_v40  ;;  %v6380_v40 = vrot.slane %v2138_v24, 9  ;;  %v9310_v24 = vrot.slane %v4814_v37, 5  ;;  %v7984_v37 = vld [vmem:[#allocation2 + $0xa8] sm:$0xff]   ;;  %v4774_v20 = vrot.slane %v4773_v17, 4 }
 0x141   : > { %7299 = vmatmul.mubr.bf16.vlgmr.msra.gmra.mrb[0].mxu1 %v10067_v45  ;;  %7570 = vmatprep.subr.bf16.mxu0 %v9264_v18  ;;  %v9296_v45 = vrot.slane %v4776_v16, 5  ;;  %v7987_v16 = vld [vmem:[%s10036_s3 + $0xd8] sm:$0xff]  }
 0x142   : > { %7331 = vmatpush3.bf16.msra.mxu1 %v9028_v34  ;;  %7302 = vmatprep.mubr.bf16.mxu1 %v10069_v1  ;;  %v4783_v34 = vrot.slane %v4781_v13, 4  ;;  %v9298_v13 = vld [vmem:[#allocation2 + $0x50] sm:$0x1]  ;;  %v8071_v1 = vld [vmem:[#allocation2 + $0x98] sm:$0x1] }
 0x143   : > { %7332 = vmatprep.subr.bf16.mxu1 %v7979_v0  ;;  %7507 = vmatmul.mubr.bf16.gmra.mrb[16].mxu0 %v7978_v46  ;;  %v2266_v59 = vrot.slane %v8071_v1, 5  ;;  %v8072_v46 = vld [vmem:[#allocation2 + $0xa0] sm:$0xf]  ;;  %v4800_v48 = vshll.u32 %v9298_v13, 16  ;;  %v10071_v1 = vcombine.low %v9084_v23, %v9088_v9  ;;  %v9324_v23 = vsel %vm8630_vm14, %v6380_v40, %v2263_v38 }
 0x144   : > { %7510 = vmatprep.mubr.bf16.mxu0 %v7980_v4  ;;  %v2270_v11 = vrot.slane %v8072_v46, 5  ;;  %v4787_v50 = vor.u32 %v4786_v7, %v4783_v34  ;;  %v4810_v4 = vrot.slane %v4808_v26, 5  ;;  %v4745_v34 = vsel %vm8228_vm3, %v9294_v8, %v9252_v27  ;;  %v8073_v26 = vld [vmem:[#allocation2 + $0xac] sm:$0xf]  ;;  %v8074_v46 = vld [vmem:[#allocation2 + $0xa4] sm:$0x1] }
 0x145   : > { %v4764_v7 = vrot.slane %v4763_v41, 4  ;;  %v2265_v9 = vrot.slane %v2263_v38, 4  ;;  %v4802_v41 = vrot.slane %v4800_v48, 5  ;;  %v4821_v40 = vor.u32 %v4820_v31, %v9310_v24  ;;  %v8076_v31 = vld [vmem:[#allocation2 + $0xb8] sm:$0xf] }
 0x146   : > { %7333 = vmatpush3.bf16.msra.mxu1 %v7979_v0  ;;  %v4797_v0 = vor.u32 %v4796_v53, %v9290_v35  ;;  %v2277_v53 = vrot.slane %v8073_v26, 5  ;;  %v2272_v27 = vrot.slane %v2270_v11, 4  ;;  %v4788_v8 = vrot.slane %v4787_v50, 4  ;;  %v8075_v50 = vld [vmem:[#allocation2 + $0xb0] sm:$0x1] }
 0x147   : > { %7334 = vmatprep.subr.bf16.mxu1 %v7983_v5  ;;  %v4811_v56 = vor.u32 %v4810_v4, %v4807_v61  ;;  %v4769_v17 = vsel %vm8228_vm3, %v4764_v7, %v9284_v44  ;;  %v6382_v38 = vrot.slane %v2140_v54, 9  ;;  %v2280_v61 = vrot.slane %v8075_v50, 5  ;;  %v2141_v4 = vld [vmem:[#allocation2 + $0xb4] sm:$0xe]  ;;  %v4654_v44 = vld [vmem:[#allocation2 + $0x60] sm:$0xf] }
 0x148   : > { %v2279_v26 = vrot.slane %v2277_v53, 4  ;;  %v9351_v54 = vsel %vm8630_vm14, %v6381_v51, %v2270_v11  ;;  %v6383_v48 = vrot.slane %v2141_v4, 9  ;;  %v2284_v7 = vrot.slane %v8076_v31, 5  ;;  %v9426_v4 = vld [vmem:[#allocation2 + $0x7c] sm:$0xf] }
 0x149   : > { %7303 = vmatmul.mubr.bf16.gmra.mrb[4].mxu1 %v10071_v1  ;;  %v2273_v1 = vrot.slane %v8074_v46, 5  ;;  %v10072_v46 = vshll.u32 %v8911_v58, 16  ;;  %v7993_v58 = vld [vmem:[%s10036_s3 + $0xe8] sm:$0xff]   ;;  %v10074_v51 = vcombine.low %v9125_v42, %v9137_v14  ;;  %v10077_v42 = vcombine.low %v9154_v15, %v9172_v43  ;;  %v7988_v14 = vld [vmem:[#allocation2 + $0xc0] sm:$0xff]   ;;  %v7995_v15 = vld [vmem:[%s10036_s3 + $0xf0] sm:$0xff]   ;;  %10080 = vst [vmem:[#allocation10_spill] sm:$0xff] %v9426_v4 }
 0x14a   : > { %7306 = vmatprep.mubr.bf16.mxu1 %v6404_v6  ;;  %7335 = vmatpush3.bf16.msra.mxu1 %v7983_v5  ;;  %v4755_v6 = vsel %vm8228_vm3, %v9300_v28, %v9282_v12  ;;  %v4798_v5 = vrot.slane %v4797_v0, 4  ;;  %v4779_v12 = vsel %vm8228_vm3, %v4774_v20, %v9296_v45  ;;  %v4793_v45 = vsel %vm8228_vm3, %v4788_v8, %v9290_v35  ;;  %v9430_v31 = vld [vmem:[#allocation2 + $0x88] sm:$0xf] }
 0x14b   : > { %7336 = vmatprep.subr.bf16.mxu1 %v7987_v16  ;;  %7511 = vmatmul.mubr.bf16.gmra.mrb[20].mxu0 %v7982_v49  ;;  %v9340_v60 = vrot.slane %v10072_v46, 5  ;;  %v9347_v49 = vsel %vm8630_vm14, %v2265_v9, %v2266_v59  ;;  %v9358_v28 = vsel %vm8630_vm14, %v2272_v27, %v2273_v1  ;;  %v9363_v59 = vrot.slane %v4811_v56, 4  ;;  %v4663_v46 = vld [vmem:[#allocation2 + $0x84] sm:$0xf]  ;;  %10081 = vst [vmem:[#allocation11_spill] sm:$0xff] %v9430_v31 }
 0x14c   : > { %7514 = vmatprep.mubr.bf16.mxu0 %v7984_v37  ;;  %v4803_v11 = vsel %vm8228_vm3, %v4798_v5, %v4802_v41  ;;  %v9369_v0 = vrot.slane %v4821_v40, 4  ;;  %v7986_v37 = vld [vmem:[#allocation2 + $0xb4] sm:$0xff]   ;;  %v9376_v35 = vsel %vm8630_vm14, %v6382_v38, %v2277_v53  ;;  %v9380_v20 = vsel %vm8630_vm14, %v2279_v26, %v2280_v61  ;;  %v9396_v5 = vld [vmem:[#allocation2 + $0x64] sm:$0xf]  ;;  %v4657_v41 = vld [vmem:[#allocation2 + $0x6c] sm:$0xf] }
 0x14d   : > { %10073 = vst [vmem:[#allocation6_spill] sm:$0xff] %v9340_v60  ;;  %v4829_v9 = vshrl.u32 %v4654_v44, 16  ;;  %v4832_v1 = vshll.u32 %v4654_v44, 16  ;;  %v10075_v27 = vor.u32 %v9038_v21, %v9036_v57  ;;  %v9390_v56 = vcombine.low %v4745_v34, %v4755_v6  ;;  %10078 = vst [vmem:[#allocation8_spill] sm:$0xff] %v9396_v5  ;;  %v9412_v40 = vld [vmem:[#allocation2 + $0x70] sm:$0xf] }
 0x14e   : > { %7337 = vmatpush3.bf16.msra.mxu1 %v7987_v16  ;;  %v9365_v16 = vrot.slane %v4824_v2, 5  ;;  %v9392_v53 = vcombine.low %v4769_v17, %v4779_v12  ;;  %v9403_v43 = vcombine.low %v4793_v45, %v4803_v11  ;;  %10079 = vst [vmem:[#allocation9_spill] sm:$0xff] %v9412_v40  ;;  %v4660_v17 = vld [vmem:[#allocation2 + $0x78] sm:$0xf]  ;;  %v9422_v50 = vsel %vm8630_vm14, %v6383_v48, %v2284_v7  ;;  %v7990_v2 = vld [vmem:[#allocation2 + $0xcc] sm:$0xff]  }
 0x14f   : > { %7338 = vmatprep.subr.bf16.mxu1 %v7991_v10  ;;  %v9385_v8 = vrot.slane %v10075_v27, 4  ;;  %v9424_v61 = vrot.slane %v2284_v7, 4  ;;  %v4831_v12 = vrot.slane %v4829_v9, 4  ;;  %v4834_v44 = vrot.slane %v4832_v1, 5  ;;  %v9449_v60 = vld [vmem:[#allocation2 + $0x74] sm:$0x1] }
 0x150   : > { %v4838_v45 = vshll.u32 %v9396_v5, 16  ;;  %v4842_v11 = vshrl.u32 %v9396_v5, 16  ;;  %v4853_v48 = vshrl.u32 %v4657_v41, 16  ;;  %v4856_v27 = vshll.u32 %v4657_v41, 16 }
 0x151   : > { %7307 = vmatmul.mubr.bf16.gmra.mrb[8].mxu1 %v10074_v51  ;;  %10076 = vst [vmem:[#allocation7_spill] sm:$0xff] %v9385_v8  ;;  %v9432_v51 = vld [vmem:[#allocation2 + $0x68] sm:$0x1]  ;;  %v4862_v7 = vshll.u32 %v9412_v40, 16  ;;  %v4877_v9 = vshrl.u32 %v4660_v17, 16  ;;  %v4880_v1 = vshll.u32 %v4660_v17, 16  ;;  %v10083_v38 = vcombine.low %v9176_v22, %v9181_v55 }
 0x152   : > { %7310 = vmatprep.mubr.bf16.mxu1 %v10077_v42  ;;  %7339 = vmatpush3.bf16.msra.mxu1 %v7991_v10  ;;  %v9409_v10 = vld [vmem:[#allocation2 + $0xbc] sm:$0x1]  ;;  %10082 = vst [vmem:[#allocation12_spill] sm:$0xff] %v9432_v51  ;;  %v4866_v42 = vshrl.u32 %v9412_v40, 16  ;;  %v4886_v26 = vshll.u32 %v9426_v4, 16  ;;  %v4904_v21 = vshll.u32 %v4663_v46, 16  ;;  %v4835_v6 = vor.u32 %v4834_v44, %v4831_v12 }
 0x153   : > { %7340 = vmatprep.subr.bf16.mxu1 %v7993_v58  ;;  %7515 = vmatmul.mubr.bf16.gmra.mrb[24].mxu0 %v7986_v37  ;;  %v7997_v37 = vld [vmem:[%s10036_s3 + $0xf8] sm:$0xff]   ;;  %v4910_v34 = vshll.u32 %v9430_v31, 16  ;;  %v4914_v41 = vshrl.u32 %v9430_v31, 16  ;;  %v9446_v57 = vrot.slane %v4838_v45, 5  ;;  %v4844_v8 = vrot.slane %v4842_v11, 4 }
 0x154   : > { %7518 = vmatprep.mubr.bf16.mxu0 %v7988_v14  ;;  %v4890_v14 = vshrl.u32 %v9426_v4, 16  ;;  %v4848_v17 = vshll.u32 %v9432_v51, 16  ;;  %v4855_v4 = vrot.slane %v4853_v48, 4  ;;  %v4858_v31 = vrot.slane %v4856_v27, 5  ;;  %v4666_v55 = vld [vmem:[#allocation2 + $0x90] sm:$0xf] }
 0x155   : > { %v9454_v40 = vrot.slane %v4862_v7, 5  ;;  %v4868_v22 = vrot.slane %v4866_v42, 4  ;;  %v4882_v12 = vrot.slane %v4880_v1, 5  ;;  %v9456_v44 = vrot.slane %v4886_v26, 5  ;;  %v9458_v11 = vld [vmem:[#allocation2 + $0x94] sm:$0xf] }
 0x156   : > { %7341 = vmatpush3.bf16.msra.mxu1 %v7993_v58  ;;  %v4901_v58 = vshrl.u32 %v4663_v46, 16  ;;  %v10084_v46 = vcombine.low %v9185_v62, %v9191_v32  ;;  %v4892_v45 = vrot.slane %v4890_v14, 4  ;;  %10085 = vst [vmem:[#allocation13_spill] sm:$0xff] %v9458_v11  ;;  %v9460_v51 = vld [vmem:[#allocation2 + $0x80] sm:$0x1]  ;;  %v4906_v62 = vrot.slane %v4904_v21, 5 }
 0x157   : > { %7342 = vmatprep.subr.bf16.mxu1 %v7995_v15  ;;  %v9462_v32 = vrot.slane %v4910_v34, 5  ;;  %v4845_v48 = vor.u32 %v4844_v8, %v9446_v57  ;;  %v9465_v27 = vrot.slane %v4848_v17, 5  ;;  %v9467_v7 = vld [vmem:[#allocation2 + $0x8c] sm:$0x1]  ;;  %v4925_v42 = vshrl.u32 %v4666_v55, 16 }
 0x158   : > { %v4903_v5 = vrot.slane %v4901_v58, 4  ;;  %10086 = vst [vmem:[#allocation14_spill] sm:$0xff] %v9467_v7  ;;  %v4928_v26 = vshll.u32 %v4666_v55, 16  ;;  %v4872_v1 = vshll.u32 %v9449_v60, 16  ;;  %v4934_v21 = vshll.u32 %v9458_v11, 16  ;;  %v9479_v58 = vld [vmem:[%s10036_s3 + $0x100] sm:$0xff]  }
 0x159   : > { %7311 = vmatmul.mubr.bf16.gmra.mrb[12].mxu1 %v10083_v38  ;;  %v4879_v38 = vrot.slane %v4877_v9, 4  ;;  %v9470_v9 = vrot.slane %v4835_v6, 4  ;;  %v4938_v34 = vshrl.u32 %v9458_v11, 16  ;;  %v4859_v14 = vor.u32 %v4858_v31, %v4855_v4  ;;  %10087 = vst [vmem:[#allocation15_spill] sm:$0xff] %v9479_v58 }
 0x15a   : > { %7314 = vmatprep.mubr.bf16.mxu1 %v10084_v46  ;;  %7343 = vmatpush3.bf16.msra.mxu1 %v7995_v15  ;;  %v4916_v15 = vrot.slane %v4914_v41, 4  ;;  %v4869_v8 = vor.u32 %v4868_v22, %v9454_v40  ;;  %v4896_v6 = vshll.u32 %v9460_v51, 16  ;;  %v4907_v41 = vor.u32 %v4906_v62, %v4903_v5  ;;  %v7994_v5 = vld [vmem:[%s10036_s3 + $0x208] sm:$0xff]  }
 0x15b   : > { %7344 = vmatprep.subr.bf16.mxu1 %v7997_v37  ;;  %7519 = vmatmul.mubr.bf16.gmra.mrb[28].mxu0 %v7990_v2  ;;  %v4669_v2 = vld [vmem:[#allocation2 + $0x9c] sm:$0xf]  ;;  %v4920_v46 = vshll.u32 %v9467_v7, 16  ;;  %v10088_v4 = vcombine.low %v9195_v25, %v9199_v52  ;;  %v4927_v31 = vrot.slane %v4925_v42, 4  ;;  %v4930_v22 = vrot.slane %v4928_v26, 5 }
 0x15c   : > { %7538 = vmatprep.mubr.bf16.mxu0 %v9257_v47  ;;  %v4883_v47 = vor.u32 %v4882_v12, %v4879_v38  ;;  %v4917_v17 = vor.u32 %v4916_v15, %v9462_v32  ;;  %v4949_v55 = vshrl.u32 %v4669_v2, 16  ;;  %v4952_v11 = vshll.u32 %v4669_v2, 16  ;;  %v9497_v26 = vld [vmem:[#allocation2 + $0x98] sm:$0x1] }
 0x15d   : > { %v10089_v38 = vcombine.low %v9231_v19, %v9235_v3  ;;  %v4846_v12 = vrot.slane %v4845_v48, 4  ;;  %v9495_v62 = vrot.slane %v4934_v21, 5  ;;  %v4940_v15 = vrot.slane %v4938_v34, 4  ;;  %v9499_v3 = vld [vmem:[#allocation2 + $0xa0] sm:$0xf] }
 0x15e   : > { %7345 = vmatpush3.bf16.msra.mxu1 %v7997_v37  ;;  %v4893_v37 = vor.u32 %v4892_v45, %v9456_v44  ;;  %v4874_v45 = vrot.slane %v4872_v1, 5  ;;  %v4870_v25 = vrot.slane %v4869_v8, 4  ;;  %v4884_v52 = vrot.slane %v4883_v47, 4  ;;  %v4672_v47 = vld [vmem:[#allocation2 + $0xa8] sm:$0xf] }
 0x15f   : > { %7618 = vmatprep.subr.bf16.mxu1 %v9479_v58  ;;  %v4860_v58 = vrot.slane %v4859_v14, 4  ;;  %v4898_v42 = vrot.slane %v4896_v6, 5  ;;  %v4918_v7 = vrot.slane %v4917_v17, 4  ;;  %v4922_v19 = vrot.slane %v4920_v46, 5  ;;  %v9547_v46 = vld [vmem:[#allocation2 + $0xa4] sm:$0x1] }
 0x160   : > { %v4894_v2 = vrot.slane %v4893_v37, 4  ;;  %v10090_v48 = vrot.slane %v9409_v10, 5  ;;  %v4931_v21 = vor.u32 %v4930_v22, %v4927_v31  ;;  %v4951_v34 = vrot.slane %v4949_v55, 4 }
 0x161   : > { %7315 = vmatmul.mubr.bf16.gmra.mrb[16].mxu1 %v10088_v4  ;;  %v4908_v4 = vrot.slane %v4907_v41, 4  ;;  %v4954_v14 = vrot.slane %v4952_v11, 5  ;;  %v4841_v8 = vsel %vm8228_vm3, %v9470_v9, %v9446_v57  ;;  %v4941_v10 = vor.u32 %v4940_v15, %v9495_v62  ;;  %v9530_v9 = vld [vmem:[#allocation2 + $0xac] sm:$0xf] }
 0x162   : > { %7318 = vmatprep.mubr.bf16.mxu1 %v10089_v38  ;;  %v9507_v1 = vsel %vm8630_vm14, %v9424_v61, %v10090_v48  ;;  %v4944_v61 = vshll.u32 %v9497_v26, 16  ;;  %v4875_v57 = vsel %vm8228_vm3, %v4870_v25, %v4874_v45  ;;  %v4958_v11 = vshll.u32 %v9499_v3, 16 }
 0x163   : > { %7539 = vmatmul.mubr.bf16.vlgmr.msra.gmra.mrb[0].mxu0 %v9266_v36  ;;  %v4851_v36 = vsel %vm8228_vm3, %v4846_v12, %v9465_v27  ;;  %v4962_v27 = vshrl.u32 %v9499_v3, 16  ;;  %v4889_v6 = vsel %vm8228_vm3, %v4884_v52, %v9456_v44  ;;  %v4899_v37 = vsel %vm8228_vm3, %v4894_v2, %v4898_v42  ;;  %v9583_v52 = vld [vmem:[#allocation2 + $0xb0] sm:$0x1]  ;;  %v9585_v42 = vld [vmem:[#allocation2 + $0xb4] sm:$0xf] }
 0x164   : > { %7571 = vmatpush3.bf16.msra.mxu0 %v9264_v18  ;;  %7542 = vmatprep.mubr.bf16.mxu0 %v9390_v56  ;;  %v7996_v18 = vld [vmem:[%s10036_s3 + $0x210] sm:$0xff]   ;;  %v4865_v56 = vsel %vm8228_vm3, %v4860_v58, %v9454_v40  ;;  %v4913_v40 = vsel %vm8228_vm3, %v4908_v4, %v9462_v32  ;;  %v4923_v58 = vsel %vm8228_vm3, %v4918_v7, %v4922_v19  ;;  %v9545_v17 = vrot.slane %v4931_v21, 4 }
 0x165   : > { %7572 = vmatprep.subr.bf16.mxu0 %v7994_v5  ;;  %v10091_v41 = vcombine.low %v9239_v29, %v9248_v33  ;;  %v4955_v31 = vor.u32 %v4954_v14, %v4951_v34  ;;  %v4973_v44 = vshrl.u32 %v4672_v47, 16  ;;  %v4976_v22 = vshll.u32 %v4672_v47, 16  ;;  %v5395_v21 = vld [vmem:[#allocation2 + $0x54] sm:$0xe] }
 0x166   : > { %v10092_v55 = vcombine.low %v9324_v23, %v9347_v49  ;;  %v10093_v32 = vsel %vm8228_vm3, %v9369_v0, %v9365_v16  ;;  %v10094_v29 = vsel %vm8228_vm3, %v9363_v59, %v9310_v24  ;;  %v9562_v7 = vrot.slane %v4941_v10, 4  ;;  %v7998_v16 = vld [vmem:[%s10036_s3 + $0x218] sm:$0xff]   ;;  %v5394_v24 = vld [vmem:[#allocation2 + $0x48] sm:$0xe] }
 0x167   : > { %v6621_v33 = vcombine.low %v10094_v29, %v10093_v32  ;;  %v9564_v38 = vrot.slane %v4944_v61, 5  ;;  %v6415_v23 = vcombine.low %v9422_v50, %v9507_v1  ;;  %v6622_v49 = vcombine.low %v4841_v8, %v4851_v36  ;;  %v8001_v36 = vld [vmem:[%s10036_s3 + $0x220] sm:$0xff]   ;;  %v10104_v50 = vld [vmem:[#allocation10_spill] sm:$0xff] }
 0x168   : > { %7573 = vmatpush3.bf16.msra.mxu0 %v7994_v5  ;;  %v4982_v5 = vshll.u32 %v9530_v9, 16  ;;  %v9572_v0 = vrot.slane %v4958_v11, 5  ;;  %v9574_v12 = vrot.slane %v4962_v27, 4  ;;  %v9576_v59 = vcombine.low %v4865_v56, %v4875_v57  ;;  %v10095_v57 = vld [vmem:[#allocation4_spill] sm:$0xff]  ;;  %v10096_v27 = vld [vmem:[#allocation5_spill] sm:$0xff] }
 0x169   : > { %7319 = vmatmul.mubr.bf16.gmra.mrb[20].mxu1 %v10091_v41  ;;  %7574 = vmatprep.subr.bf16.mxu0 %v7996_v18  ;;  %v9578_v45 = vcombine.low %v4889_v6, %v4899_v37  ;;  %v9580_v15 = vcombine.low %v4913_v40, %v4923_v58  ;;  %v4968_v25 = vshll.u32 %v9547_v46, 16  ;;  %v4937_v2 = vsel %vm8228_vm3, %v9545_v17, %v9495_v62  ;;  %v5396_v62 = vld [vmem:[#allocation2 + $0x60] sm:$0xe]  ;;  %v5397_v37 = vld [vmem:[#allocation2 + $0x6c] sm:$0xe] }
 0x16a   : > { %7322 = vmatprep.mubr.bf16.mxu1 %v10092_v55  ;;  %v9592_v4 = vrot.slane %v4955_v31, 4  ;;  %v9594_v19 = vrot.slane %v4973_v44, 4  ;;  %v4978_v48 = vrot.slane %v4976_v22, 5  ;;  %v4947_v34 = vsel %vm8228_vm3, %v9562_v7, %v9564_v38  ;;  %v8004_v55 = vld [vmem:[%s10036_s3 + $0x228] sm:$0xff]  }
 0x16b   : > { %7543 = vmatmul.mubr.bf16.gmra.mrb[4].mxu0 %v9392_v53  ;;  %v9601_v53 = vrot.slane %v4982_v5, 5  ;;  %v4986_v14 = vshrl.u32 %v9530_v9, 16  ;;  %v6644_v8 = vrot.slane %v5394_v24, 9  ;;  %v4992_v10 = vshll.u32 %v9583_v52, 16  ;;  %v10101_v7 = vld [vmem:[#allocation9_spill] sm:$0xff] }
 0x16c   : > { %7546 = vmatprep.mubr.bf16.mxu0 %v9403_v43  ;;  %7575 = vmatpush3.bf16.msra.mxu0 %v7996_v18  ;;  %v4965_v43 = vor.u32 %v9574_v12, %v9572_v0  ;;  %v4997_v61 = vshrl.u32 %v9585_v42, 16  ;;  %v5484_v47 = vrot.slane %v9250_v39, 5  ;;  %v5487_v18 = vrot.slane %v9298_v13, 5 }
 0x16d   : > { %7576 = vmatprep.subr.bf16.mxu0 %v7998_v16  ;;  %v6645_v56 = vrot.slane %v5395_v21, 9  ;;  %v5491_v11 = vrot.slane %v10095_v57, 5  ;;  %v5494_v6 = vrot.slane %v10096_v27, 5  ;;  %v10097_v40 = vcombine.low %v9351_v54, %v9358_v28  ;;  %v10099_v28 = vld [vmem:[#allocation8_spill] sm:$0xff]  ;;  %v3024_v57 = vld [vmem:[#allocation2 + $0x78] sm:$0xf] }
 0x16e   : > { %v4979_v58 = vor.u32 %v4978_v48, %v9594_v19  ;;  %v9621_v41 = vsel %vm8630_vm14, %v6644_v8, %v5484_v47  ;;  %v5486_v17 = vrot.slane %v5484_v47, 4  ;;  %v6646_v39 = vrot.slane %v5396_v62, 9  ;;  %v7999_v8 = vld [vmem:[#allocation2 + $0xc] sm:$0xff]  }
 0x16f   : > { %v10098_v13 = vcombine.low %v9376_v35, %v9380_v20  ;;  %v9626_v31 = vrot.slane %v4986_v14, 4  ;;  %v9630_v44 = vsel %vm8630_vm14, %v6645_v56, %v5491_v11  ;;  %v5493_v54 = vrot.slane %v5491_v11, 4  ;;  %v10100_v35 = vld [vmem:[#allocation12_spill] sm:$0xff] }
 0x170   : > { %7577 = vmatpush3.bf16.msra.mxu0 %v7998_v16  ;;  %v5498_v22 = vrot.slane %v10099_v28, 5  ;;  %v9638_v32 = vsel %vm8630_vm14, %v5486_v17, %v5487_v18  ;;  %v5501_v20 = vrot.slane %v10100_v35, 5  ;;  %v6647_v29 = vrot.slane %v5397_v37, 9  ;;  %v9667_v18 = vld [vmem:[#allocation2 + $0xb8] sm:$0xf] }
 0x171   : > { %7323 = vmatmul.mubr.bf16.gmra.mrb[24].mxu1 %v10097_v40  ;;  %7578 = vmatprep.subr.bf16.mxu0 %v8001_v36  ;;  %v5505_v38 = vrot.slane %v10101_v7, 5  ;;  %v6676_v5 = vcombine.low %v9621_v41, %v9638_v32  ;;  %v9646_v16 = vsel %vm8630_vm14, %v5493_v54, %v5494_v6  ;;  %v5508_v14 = vrot.slane %v9449_v60, 5  ;;  %v4678_v6 = vld [vmem:[#allocation2 + $0xc0] sm:$0xf] }
 0x172   : > { %7326 = vmatprep.mubr.bf16.mxu1 %v10098_v13  ;;  %v9650_v12 = vsel %vm8630_vm14, %v6646_v39, %v5498_v22  ;;  %v5500_v24 = vrot.slane %v5498_v22, 4  ;;  %v6677_v19 = vcombine.low %v9630_v44, %v9646_v16  ;;  %v9659_v62 = vcombine.low %v4937_v2, %v4947_v34  ;;  %v5399_v39 = vld [vmem:[#allocation2 + $0x84] sm:$0xe]  ;;  %v10103_v13 = vld [vmem:[#allocation7_spill] sm:$0xff] }
 0x173   : > { %7547 = vmatmul.mubr.bf16.gmra.mrb[8].mxu0 %v6621_v33  ;;  %v9656_v48 = vsel %vm8630_vm14, %v6647_v29, %v5505_v38  ;;  %v5507_v21 = vrot.slane %v5505_v38, 4  ;;  %v4961_v33 = vsel %vm8228_vm3, %v9592_v4, %v9572_v0  ;;  %v9665_v47 = vrot.slane %v4968_v25, 5 }
 0x174   : > { %7550 = vmatprep.mubr.bf16.mxu0 %v6622_v49  ;;  %7579 = vmatpush3.bf16.msra.mxu0 %v8001_v36  ;;  %v9671_v56 = vsel %vm8630_vm14, %v5500_v24, %v5501_v20  ;;  %v9673_v60 = vrot.slane %v4965_v43, 4  ;;  %v8007_v49 = vld [vmem:[%s10036_s3 + $0x230] sm:$0xff]   ;;  %v5000_v2 = vshll.u32 %v9585_v42, 16  ;;  %v5398_v36 = vld [vmem:[#allocation2 + $0x78] sm:$0xe]  ;;  %v9685_v11 = vrot.slane %v4979_v58, 4 }
 0x175   : > { %7580 = vmatprep.subr.bf16.mxu0 %v8004_v55  ;;  %v6678_v25 = vcombine.low %v9650_v12, %v9671_v56  ;;  %v9683_v34 = vsel %vm8630_vm14, %v5507_v21, %v5508_v14  ;;  %v9687_v27 = vrot.slane %v4992_v10, 5  ;;  %v9689_v43 = vrot.slane %v4997_v61, 4  ;;  %v10102_v61 = vld [vmem:[#allocation6_spill] sm:$0xff]  ;;  %v9711_v20 = vld [vmem:[#allocation2 + $0xc4] sm:$0xf]  ;;  %v8000_v21 = vld [vmem:[#allocation2 + $0x18] sm:$0xff]  }
 0x176   : > { %v6679_v37 = vcombine.low %v9656_v48, %v9683_v34  ;;  %v4989_v42 = vor.u32 %v9626_v31, %v9601_v53  ;;  %v5006_v40 = vshll.u32 %v9667_v18, 16  ;;  %v3262_v17 = vshrl.u32 %v3024_v57, 16  ;;  %v8010_v31 = vld [vmem:[%s10036_s3 + $0x238] sm:$0xff]   ;;  %v8104_v34 = vld [vmem:[#allocation2 + $0xb0] sm:$0x1] }
 0x177   : > { %v3265_v58 = vshll.u32 %v3024_v57, 16  ;;  %v5010_v10 = vshrl.u32 %v9667_v18, 16  ;;  %v3284_v54 = vsel %vm8228_vm3, %v10103_v13, %v10102_v61  ;;  %v6648_v28 = vrot.slane %v5398_v36, 9  ;;  %v10105_v36 = vld [vmem:[#allocation11_spill] sm:$0xff] }
 0x178   : > { %7581 = vmatpush3.bf16.msra.mxu0 %v8004_v55  ;;  %v5512_v1 = vrot.slane %v10104_v50, 5  ;;  %v3264_v22 = vrot.slane %v3262_v17, 4  ;;  %v5515_v55 = vrot.slane %v9460_v51, 5  ;;  %v5021_v29 = vshrl.u32 %v4678_v6, 16  ;;  %v8002_v17 = vld [vmem:[#allocation2 + $0x24] sm:$0xff]  }
 0x179   : > { %7327 = vmatmul.mubr.bf16.gmra.mrb[28].mxu1 %v6415_v23  ;;  %7582 = vmatprep.subr.bf16.mxu0 %v8007_v49  ;;  %v9705_v23 = vrot.slane %v5000_v2, 5  ;;  %v3267_v35 = vrot.slane %v3265_v58, 5  ;;  %v6649_v24 = vrot.slane %v5399_v39, 9  ;;  %v4990_v14 = vrot.slane %v4989_v42, 4 }
 0x17a   : > { %7346 = vmatprep.mubr.bf16.mxu1 %v7999_v8  ;;  %v9715_v7 = vsel %vm8630_vm14, %v6648_v28, %v5512_v1  ;;  %v5514_v38 = vrot.slane %v5512_v1, 4  ;;  %v9718_v8 = vld [vmem:[#allocation2 + $0xbc] sm:$0x1]  ;;  %v9720_v57 = vrot.slane %v5006_v40, 5  ;;  %v5519_v51 = vrot.slane %v10105_v36, 5 }
 0x17b   : > { %7551 = vmatmul.mubr.bf16.gmra.mrb[12].mxu0 %v9576_v59  ;;  %v3268_v2 = vor.u32 %v3267_v35, %v3264_v22  ;;  %v5012_v58 = vrot.slane %v5010_v10, 4  ;;  %v5024_v61 = vshll.u32 %v4678_v6, 16  ;;  %v10106_v59 = vld [vmem:[#allocation14_spill] sm:$0xff]  ;;  %v5030_v42 = vshll.u32 %v9711_v20, 16  ;;  %v9748_v35 = vld [vmem:[#allocation2 + $0xc8] sm:$0x1] }
 0x17c   : > { %7554 = vmatprep.mubr.bf16.mxu0 %v9578_v45  ;;  %7583 = vmatpush3.bf16.msra.mxu0 %v8007_v49  ;;  %v9726_v39 = vsel %vm8630_vm14, %v5514_v38, %v5515_v55  ;;  %v5522_v13 = vrot.slane %v10106_v59, 5  ;;  %v5034_v40 = vshrl.u32 %v9711_v20, 16  ;;  %v4971_v45 = vsel %vm8228_vm3, %v9673_v60, %v9665_v47  ;;  %v10107_v47 = vld [vmem:[#allocation3_spill] sm:$0xff] }
 0x17d   : > { %7584 = vmatprep.subr.bf16.mxu0 %v8010_v31  ;;  %v3269_v28 = vrot.slane %v3268_v2, 4  ;;  %v6680_v50 = vcombine.low %v9715_v7, %v9726_v39  ;;  %v5016_v49 = vshll.u32 %v9718_v8, 16  ;;  %v9740_v6 = vsel %vm8630_vm14, %v6649_v24, %v5519_v51  ;;  %v10108_v38 = vld [vmem:[#allocation15_spill] sm:$0xff]  ;;  %v4681_v2 = vld [vmem:[#allocation2 + $0xcc] sm:$0xf] }
 0x17e   : > { %v5521_v10 = vrot.slane %v5519_v51, 4  ;;  %v4985_v1 = vsel %vm8228_vm3, %v9685_v11, %v9601_v53  ;;  %v5003_v22 = vor.u32 %v9705_v23, %v9689_v43  ;;  %v5023_v55 = vrot.slane %v5021_v29, 4  ;;  %v5400_v43 = vld [vmem:[#allocation2 + $0x90] sm:$0xe]  ;;  %v8079_v23 = vld [vmem:[%s10036_s3 + $0x108] sm:$0xff]  }
 0x17f   : > { %v3274_v60 = vsel %vm8228_vm3, %v3269_v28, %v10107_v47  ;;  %v4995_v24 = vsel %vm8228_vm3, %v4990_v14, %v9687_v27  ;;  %v5013_v29 = vor.u32 %v5012_v58, %v9720_v57  ;;  %v9767_v36 = vrot.slane %v5030_v42, 5  ;;  %v9769_v27 = vld [vmem:[#allocation2 + $0xd0] sm:$0xf]  ;;  %v8005_v28 = vld [vmem:[#allocation2 + $0x3c] sm:$0xff]  }
 0x180   : > { %v9757_v53 = vcombine.low %v3274_v60, %v3284_v54  ;;  %v9761_v11 = vsel %vm8630_vm14, %v5521_v10, %v5522_v13  ;;  %v5036_v51 = vrot.slane %v5034_v40, 4  ;;  %7585 = vmatpush3.bf16.msra.mxu0 %v8010_v31  ;;  %v6627_v14 = vcombine.low %v4961_v33, %v4971_v45  ;;  %v8003_v58 = vld [vmem:[#allocation2 + $0x30] sm:$0xff]   ;;  %v5401_v40 = vld [vmem:[#allocation2 + $0x9c] sm:$0xe]  ;;  %v10109_v33 = vld [vmem:[#allocation13_spill] sm:$0xff] }
 0x181   : > { %7347 = vmatmul.mubr.bf16.vlgmr.msra.gmra.mrb[0].mxu1 %v8000_v21  ;;  %v5026_v21 = vrot.slane %v5024_v61, 5  ;;  %v6681_v54 = vcombine.low %v9740_v6, %v9761_v11  ;;  %v5040_v61 = vshll.u32 %v9748_v35, 16  ;;  %v6628_v59 = vcombine.low %v4985_v1, %v4995_v24 }
 0x182   : > { %7626 = vmatpush3.bf16.msra.mxu1 %v10108_v38  ;;  %7350 = vmatprep.mubr.bf16.mxu1 %v8002_v17  ;;  %v9778_v17 = vrot.slane %v5016_v49, 5  ;;  %v5045_v13 = vshrl.u32 %v4681_v2, 16  ;;  %v5048_v42 = vshll.u32 %v4681_v2, 16  ;;  %v6650_v31 = vrot.slane %v5400_v43, 9 }
 0x183   : > { %7619 = vmatprep.subr.bf16.mxu1 %v8079_v23  ;;  %7555 = vmatmul.mubr.bf16.gmra.mrb[16].mxu0 %v9580_v15  ;;  %v5027_v10 = vor.u32 %v5026_v21, %v5023_v55  ;;  %v5054_v0 = vshll.u32 %v9769_v27, 16  ;;  %v5058_v4 = vshrl.u32 %v9769_v27, 16  ;;  %v5526_v45 = vrot.slane %v10109_v33, 5  ;;  %v8080_v15 = vld [vmem:[%s10036_s3 + $0x110] sm:$0xff]  }
 0x184   : > { %7558 = vmatprep.mubr.bf16.mxu0 %v9659_v62  ;;  %v5004_v49 = vrot.slane %v5003_v22, 4  ;;  %v5014_v1 = vrot.slane %v5013_v29, 4  ;;  %v5037_v47 = vor.u32 %v5036_v51, %v9767_v36  ;;  %v5529_v62 = vrot.slane %v9497_v26, 5 }
 0x185   : > { %v5042_v60 = vrot.slane %v5040_v61, 5  ;;  %v9793_v55 = vsel %vm8630_vm14, %v6650_v31, %v5526_v45  ;;  %v5528_v38 = vrot.slane %v5526_v45, 4  ;;  %v6651_v24 = vrot.slane %v5401_v40, 9  ;;  %v8081_v61 = vld [vmem:[%s10036_s3 + $0x118] sm:$0xff]   ;;  %v8006_v31 = vld [vmem:[#allocation2 + $0x48] sm:$0xff]  }
 0x186   : > { %7627 = vmatpush3.bf16.msra.mxu1 %v8079_v23  ;;  %v5047_v21 = vrot.slane %v5045_v13, 4  ;;  %v5050_v2 = vrot.slane %v5048_v42, 5  ;;  %v5533_v43 = vrot.slane %v9499_v3, 5  ;;  %v5536_v23 = vrot.slane %v9547_v46, 5  ;;  %v9806_v13 = vld [vmem:[#allocation2 + $0xd4] sm:$0x1] }
 0x187   : > { %7620 = vmatprep.subr.bf16.mxu1 %v8080_v15  ;;  %v5028_v22 = vrot.slane %v5027_v10, 4  ;;  %v9797_v29 = vrot.slane %v5054_v0, 5  ;;  %v5060_v26 = vrot.slane %v5058_v4, 4  ;;  %v9801_v51 = vsel %vm8630_vm14, %v5528_v38, %v5529_v62  ;;  %v8008_v0 = vld [vmem:[#allocation2 + $0x54] sm:$0xff]  }
 0x188   : > { %v6682_v3 = vcombine.low %v9793_v55, %v9801_v51  ;;  %v9812_v46 = vsel %vm8630_vm14, %v6651_v24, %v5533_v43  ;;  %v5535_v42 = vrot.slane %v5533_v43, 4  ;;  %v5009_v40 = vsel %vm8228_vm3, %v5004_v49, %v9720_v57  ;;  %v5390_v45 = vld [vmem:[#allocation2 + $0x18] sm:$0xe] }
 0x189   : > { %7351 = vmatmul.mubr.bf16.gmra.mrb[4].mxu1 %v8003_v58  ;;  %v5038_v58 = vrot.slane %v5037_v47, 4  ;;  %v5051_v4 = vor.u32 %v5050_v2, %v5047_v21  ;;  %v5061_v33 = vor.u32 %v5060_v26, %v9797_v29  ;;  %v6640_v38 = vrot.slane %v5390_v45, 9  ;;  %v5403_v21 = vld [vmem:[#allocation2 + $0xb4] sm:$0xe] }
 0x18a   : > { %7354 = vmatprep.mubr.bf16.mxu1 %v8005_v28  ;;  %7628 = vmatpush3.bf16.msra.mxu1 %v8080_v15  ;;  %v5019_v28 = vsel %vm8228_vm3, %v5014_v1, %v9778_v17  ;;  %v9822_v10 = vsel %vm8630_vm14, %v5535_v42, %v5536_v23  ;;  %v5402_v15 = vld [vmem:[#allocation2 + $0xa8] sm:$0xe]  ;;  %v5033_v17 = vsel %vm8228_vm3, %v5028_v22, %v9767_v36  ;;  %v8083_v1 = vld [vmem:[#allocation2 + $0x1c] sm:$0xf]  ;;  %v5543_v42 = vrot.slane %v9583_v52, 5 }
 0x18b   : > { %7621 = vmatprep.subr.bf16.mxu1 %v8081_v61  ;;  %7559 = vmatmul.mubr.bf16.gmra.mrb[20].mxu0 %v6627_v14  ;;  %v5064_v14 = vshll.u32 %v9806_v13, 16  ;;  %v6683_v57 = vcombine.low %v9812_v46, %v9822_v10  ;;  %v5043_v49 = vsel %vm8228_vm3, %v5038_v58, %v5042_v60  ;;  %v5456_v47 = vrot.slane %v8083_v1, 5  ;;  %v8084_v60 = vld [vmem:[#allocation2 + $0x20] sm:$0x1] }
 0x18c   : > { %7562 = vmatprep.mubr.bf16.mxu0 %v6628_v59  ;;  %v8082_v59 = vld [vmem:[%s10036_s3 + $0x120] sm:$0xff]   ;;  %v6629_v62 = vcombine.low %v5009_v40, %v5019_v28  ;;  %v6652_v24 = vrot.slane %v5402_v15, 9  ;;  %v6630_v2 = vcombine.low %v5033_v17, %v5043_v49  ;;  %v5052_v43 = vrot.slane %v5051_v4, 4  ;;  %v5392_v17 = vld [vmem:[#allocation2 + $0x30] sm:$0xe] }
 0x18d   : > { %v5062_v23 = vrot.slane %v5061_v33, 4  ;;  %v5066_v36 = vrot.slane %v5064_v14, 5  ;;  %v5458_v22 = vrot.slane %v5456_v47, 4  ;;  %v5459_v26 = vrot.slane %v8084_v60, 5  ;;  %v8009_v28 = vld [vmem:[#allocation2 + $0x60] sm:$0xff]  }
 0x18e   : > { %7629 = vmatpush3.bf16.msra.mxu1 %v8081_v61  ;;  %v8085_v61 = vld [vmem:[%s10036_s3 + $0x128] sm:$0xff]   ;;  %v5540_v58 = vrot.slane %v9530_v9, 5  ;;  %v5547_v40 = vrot.slane %v9667_v18, 5  ;;  %v5391_v4 = vld [vmem:[#allocation2 + $0x24] sm:$0xe]  ;;  %v5057_v9 = vsel %vm8228_vm3, %v5052_v43, %v9797_v29  ;;  %v6642_v60 = vrot.slane %v5392_v17, 9 }
 0x18f   : > { %7622 = vmatprep.subr.bf16.mxu1 %v8082_v59  ;;  %v8086_v33 = vld [vmem:[#allocation2 + $0x28] sm:$0xf]  ;;  %v5067_v52 = vsel %vm8228_vm3, %v5062_v23, %v5066_v36  ;;  %v8011_v18 = vld [vmem:[#allocation2 + $0x6c] sm:$0xff]   ;;  %v8087_v49 = vld [vmem:[#allocation2 + $0x34] sm:$0xf] }
 0x190   : > { %v5463_v14 = vrot.slane %v8086_v33, 5  ;;  %v9846_v45 = vsel %vm8630_vm14, %v6652_v24, %v5540_v58  ;;  %v5542_v15 = vrot.slane %v5540_v58, 4  ;;  %v5549_v1 = vrot.slane %v5547_v40, 4  ;;  %v5393_v58 = vld [vmem:[#allocation2 + $0x3c] sm:$0xe]  ;;  %v8013_v17 = vld [vmem:[#allocation2 + $0x84] sm:$0xff]  }
 0x191   : > { %7355 = vmatmul.mubr.bf16.gmra.mrb[8].mxu1 %v8006_v31  ;;  %v6653_v31 = vrot.slane %v5403_v21, 9  ;;  %v5550_v24 = vrot.slane %v9718_v8, 5  ;;  %v6641_v21 = vrot.slane %v5391_v4, 9  ;;  %v6631_v36 = vcombine.low %v5057_v9, %v5067_v52  ;;  %v3021_v4 = vld [vmem:[#allocation2 + $0x6c] sm:$0xf] }
 0x192   : > { %7358 = vmatprep.mubr.bf16.mxu1 %v8008_v0  ;;  %7630 = vmatpush3.bf16.msra.mxu1 %v8082_v59  ;;  %v5457_v0 = vsel %vm8630_vm14, %v6640_v38, %v5456_v47  ;;  %v5470_v59 = vrot.slane %v8087_v49, 5  ;;  %v5460_v47 = vsel %vm8630_vm14, %v5458_v22, %v5459_v26  ;;  %v9860_v29 = vsel %vm8630_vm14, %v5542_v15, %v5543_v42  ;;  %v5404_v33 = vld [vmem:[#allocation2 + $0xc0] sm:$0xe]  ;;  %v8012_v15 = vld [vmem:[#allocation2 + $0x78] sm:$0xff]  }
 0x193   : > { %7623 = vmatprep.subr.bf16.mxu1 %v8085_v61  ;;  %7563 = vmatmul.mubr.bf16.gmra.mrb[24].mxu0 %v6629_v62  ;;  %v8088_v62 = vld [vmem:[%s10036_s3 + $0x130] sm:$0xff]   ;;  %v9864_v38 = vsel %vm8630_vm14, %v6653_v31, %v5547_v40  ;;  %v6684_v23 = vcombine.low %v9846_v45, %v9860_v29  ;;  %v5465_v22 = vrot.slane %v5463_v14, 4  ;;  %v9871_v26 = vsel %vm8630_vm14, %v5549_v1, %v5550_v24  ;;  %v8090_v31 = vld [vmem:[#allocation2 + $0x38] sm:$0x1]  ;;  %v8092_v1 = vld [vmem:[#allocation2 + $0x40] sm:$0xf] }
 0x194   : > { %7566 = vmatprep.mubr.bf16.mxu0 %v6630_v2  ;;  %v8089_v2 = vld [vmem:[#allocation2 + $0x2c] sm:$0x1]  ;;  %v6685_v8 = vcombine.low %v9864_v38, %v9871_v26  ;;  %v5472_v42 = vrot.slane %v5470_v59, 4  ;;  %v5473_v40 = vrot.slane %v8090_v31, 5  ;;  %v5471_v52 = vsel %vm8630_vm14, %v6642_v60, %v5470_v59  ;;  %v8094_v31 = vld [vmem:[#allocation2 + $0x44] sm:$0x1] }
 0x195   : > { %v5466_v43 = vrot.slane %v8089_v2, 5  ;;  %v6643_v49 = vrot.slane %v5393_v58, 9  ;;  %v6654_v24 = vrot.slane %v5404_v33, 9 }
 0x196   : > { %7631 = vmatpush3.bf16.msra.mxu1 %v8085_v61  ;;  %v6672_v61 = vcombine.low %v5457_v0, %v5460_v47  ;;  %v5464_v0 = vsel %vm8630_vm14, %v6641_v21, %v5463_v14  ;;  %v5477_v47 = vrot.slane %v8092_v1, 5  ;;  %v5474_v2 = vsel %vm8630_vm14, %v5472_v42, %v5473_v40 }
 0x197   : > { %7624 = vmatprep.subr.bf16.mxu1 %v8088_v62  ;;  %v5467_v9 = vsel %vm8630_vm14, %v5465_v22, %v5466_v43  ;;  %v5554_v14 = vrot.slane %v9711_v20, 5  ;;  %v5557_v21 = vrot.slane %v9748_v35, 5  ;;  %v8093_v43 = vld [vmem:[#allocation2 + $0x70] sm:$0xf]  ;;  %v6674_v40 = vcombine.low %v5471_v52, %v5474_v2 }
 0x198   : > { %v3247_v22 = vshll.u32 %v8093_v43, 16  ;;  %v3251_v59 = vshrl.u32 %v8093_v43, 16  ;;  %v6673_v58 = vcombine.low %v5464_v0, %v5467_v9  ;;  %v5479_v20 = vrot.slane %v5477_v47, 4  ;;  %v8014_v52 = vld [vmem:[#allocation2 + $0x90] sm:$0xff]  }
 0x199   : > { %7359 = vmatmul.mubr.bf16.gmra.mrb[12].mxu1 %v8009_v28  ;;  %v8091_v28 = vld [vmem:[%s10036_s3 + $0x138] sm:$0xff]   ;;  %v9891_v33 = vsel %vm8630_vm14, %v6654_v24, %v5554_v14  ;;  %v5556_v42 = vrot.slane %v5554_v14, 4  ;;  %v5478_v24 = vsel %vm8630_vm14, %v6643_v49, %v5477_v47 }
 0x19a   : > { %7362 = vmatprep.mubr.bf16.mxu1 %v8011_v18  ;;  %7632 = vmatpush3.bf16.msra.mxu1 %v8088_v62  ;;  %v5405_v18 = vld [vmem:[#allocation2 + $0xcc] sm:$0xe]  ;;  %v3238_v62 = vshrl.u32 %v3021_v4, 16  ;;  %v3249_v0 = vrot.slane %v3247_v22, 5  ;;  %v3253_v9 = vrot.slane %v3251_v59, 4 }
 0x19b   : > { %7625 = vmatprep.subr.bf16.mxu1 %v8091_v28  ;;  %7567 = vmatmul.mubr.bf16.gmra.mrb[28].mxu0 %v6631_v36  ;;  %v3241_v36 = vshll.u32 %v3021_v4, 16  ;;  %v6655_v60 = vrot.slane %v5405_v18, 9  ;;  %v9895_v18 = vsel %vm8630_vm14, %v5556_v42, %v5557_v21  ;;  %v8095_v22 = vld [vmem:[#allocation2 + $0x74] sm:$0x1] }
 0x19c   : > { %7586 = vmatprep.mubr.bf16.mxu0 %v6672_v61  ;;  %v5561_v61 = vrot.slane %v9769_v27, 5  ;;  %v3240_v4 = vrot.slane %v3238_v62, 4  ;;  %v3254_v43 = vor.u32 %v3253_v9, %v3249_v0  ;;  %v3257_v59 = vshll.u32 %v8095_v22, 16  ;;  %v8098_v22 = vld [vmem:[#allocation2 + $0x94] sm:$0xf] }
 0x19d   : > { %v3243_v1 = vrot.slane %v3241_v36, 5  ;;  %v8015_v36 = vld [vmem:[#allocation2 + $0x9c] sm:$0xff]  }
 0x19e   : > { %7633 = vmatpush3.bf16.msra.mxu1 %v8091_v28  ;;  %v5480_v28 = vrot.slane %v8094_v31, 5  ;;  %v5563_v35 = vrot.slane %v5561_v61, 4  ;;  %v9899_v27 = vsel %vm8630_vm14, %v6655_v60, %v5561_v61  ;;  %v8096_v31 = vld [vmem:[#allocation2 + $0x88] sm:$0xf] }
 0x19f   : > { %v3244_v21 = vor.u32 %v3243_v1, %v3240_v4  ;;  %v3295_v42 = vshll.u32 %v8096_v31, 16  ;;  %v3299_v49 = vshrl.u32 %v8096_v31, 16 }
 0x1a0   : > { %v5481_v2 = vsel %vm8630_vm14, %v5479_v20, %v5480_v28  ;;  %v3255_v28 = vrot.slane %v3254_v43, 4  ;;  %v8016_v20 = vld [vmem:[#allocation2 + $0xa8] sm:$0xff]  }
 0x1a1   : > { %7363 = vmatmul.mubr.bf16.gmra.mrb[16].mxu1 %v8012_v15  ;;  %v5564_v15 = vrot.slane %v9806_v13, 5  ;;  %v3027_v13 = vld [vmem:[#allocation2 + $0x84] sm:$0xf]  ;;  %v6675_v60 = vcombine.low %v5478_v24, %v5481_v2  ;;  %v3245_v47 = vrot.slane %v3244_v21, 4  ;;  %v9917_v1 = vrot.slane %v3295_v42, 5 }
 0x1a2   : > { %7366 = vmatprep.mubr.bf16.mxu1 %v8013_v17  ;;  %v6686_v17 = vcombine.low %v9891_v33, %v9895_v18  ;;  %v3286_v61 = vshrl.u32 %v3027_v13, 16  ;;  %v3301_v9 = vrot.slane %v3299_v49, 4  ;;  %v3313_v24 = vshll.u32 %v3030_v63, 16  ;;  %v3033_v2 = vld [vmem:[#allocation2 + $0x9c] sm:$0xf] }
 0x1a3   : > { %7587 = vmatmul.mubr.bf16.vlgmr.msra.gmra.mrb[0].mxu0 %v6673_v58  ;;  %v9906_v62 = vsel %vm8630_vm14, %v5563_v35, %v5564_v15  ;;  %v3289_v58 = vshll.u32 %v3027_v13, 16  ;;  %v8017_v35 = vld [vmem:[#allocation2 + $0xb4] sm:$0xff]   ;;  %v8097_v21 = vld [vmem:[#allocation2 + $0x8c] sm:$0x1]  ;;  %v3334_v41 = vshrl.u32 %v3033_v2, 16  ;;  %v3337_v32 = vshll.u32 %v3033_v2, 16 }
 0x1a4   : > { %7590 = vmatprep.mubr.bf16.mxu0 %v6674_v40  ;;  %v6687_v14 = vcombine.low %v9899_v27, %v9906_v62  ;;  %v3259_v40 = vrot.slane %v3257_v59, 5  ;;  %v3288_v15 = vrot.slane %v3286_v61, 4  ;;  %v3305_v43 = vshll.u32 %v8097_v21, 16 }
 0x1a5   : > { %v3291_v4 = vrot.slane %v3289_v58, 5  ;;  %v3319_v59 = vshll.u32 %v8098_v22, 16  ;;  %v3302_v42 = vor.u32 %v3301_v9, %v9917_v1  ;;  %v3339_v2 = vrot.slane %v3337_v32, 5  ;;  %v8102_v32 = vld [vmem:[#allocation2 + $0xac] sm:$0xf] }
 0x1a6   : > { %v3260_v13 = vsel %vm8228_vm3, %v3255_v28, %v3259_v40  ;;  %v3307_v28 = vrot.slane %v3305_v43, 5  ;;  %v8101_v43 = vld [vmem:[#allocation2 + $0xa4] sm:$0x1]  ;;  %v3371_v12 = vshrl.u32 %v8102_v32, 16 }
 0x1a7   : > { %v3292_v31 = vor.u32 %v3291_v4, %v3288_v15  ;;  %v9924_v40 = vrot.slane %v3319_v59, 5  ;;  %v3036_v15 = vld [vmem:[#allocation2 + $0xa8] sm:$0xf]  ;;  %v3303_v9 = vrot.slane %v3302_v42, 4  ;;  %v3353_v44 = vshll.u32 %v8101_v43, 16 }
 0x1a8   : > { %v3358_v16 = vshrl.u32 %v3036_v15, 16  ;;  %v3039_v59 = vld [vmem:[#allocation2 + $0xb4] sm:$0xf] }
 0x1a9   : > { %7367 = vmatmul.mubr.bf16.gmra.mrb[20].mxu1 %v8014_v52  ;;  %v3310_v52 = vshrl.u32 %v3030_v63, 16  ;;  %v3293_v4 = vrot.slane %v3292_v31, 4  ;;  %v3382_v31 = vshrl.u32 %v3039_v59, 16  ;;  %v3385_v42 = vshll.u32 %v3039_v59, 16 }
 0x1aa   : > { %7370 = vmatprep.mubr.bf16.mxu1 %v8015_v36  ;;  %v3250_v36 = vsel %vm8228_vm3, %v3245_v47, %v3249_v0  ;;  %v3315_v0 = vrot.slane %v3313_v24, 5  ;;  %v8018_v47 = vld [vmem:[#allocation2 + $0xc0] sm:$0xff]   ;;  %v8100_v24 = vld [vmem:[#allocation2 + $0x98] sm:$0x1] }
 0x1ab   : > { %7591 = vmatmul.mubr.bf16.gmra.mrb[4].mxu0 %v6675_v60  ;;  %v3323_v60 = vshrl.u32 %v8098_v22, 16  ;;  %v3312_v49 = vrot.slane %v3310_v52, 4  ;;  %v6488_v63 = vcombine.low %v3250_v36, %v3260_v13  ;;  %v3329_v36 = vshll.u32 %v8100_v24, 16 }
 0x1ac   : > { %7594 = vmatprep.mubr.bf16.mxu0 %v6676_v5  ;;  %v8099_v5 = vld [vmem:[#allocation2 + $0xa0] sm:$0xf]  ;;  %v3298_v56 = vsel %vm8228_vm3, %v3293_v4, %v9917_v1  ;;  %v3373_v4 = vrot.slane %v3371_v12, 4 }
 0x1ad   : > { %v3343_v61 = vshll.u32 %v8099_v5, 16  ;;  %v3347_v58 = vshrl.u32 %v8099_v5, 16  ;;  %v3325_v21 = vrot.slane %v3323_v60, 4  ;;  %v3316_v52 = vor.u32 %v3315_v0, %v3312_v49  ;;  %v8103_v49 = vld [vmem:[#allocation2 + $0xb8] sm:$0xf] }
 0x1ae   : > { %v3367_v5 = vshll.u32 %v8102_v32, 16  ;;  %v3391_v0 = vshll.u32 %v8103_v49, 16 }
 0x1af   : > { %v9929_v22 = vrot.slane %v3343_v61, 5  ;;  %v3326_v13 = vor.u32 %v3325_v21, %v9924_v40  ;;  %v3317_v61 = vrot.slane %v3316_v52, 4  ;;  %v3387_v52 = vrot.slane %v3385_v42, 5 }
 0x1b0   : > { %v3393_v24 = vrot.slane %v3391_v0, 5 }
 0x1b1   : > { %7371 = vmatmul.mubr.bf16.gmra.mrb[24].mxu1 %v8016_v20  ;;  %v3336_v20 = vrot.slane %v3334_v41, 4  ;;  %v3327_v21 = vrot.slane %v3326_v13, 4  ;;  %v3042_v13 = vld [vmem:[#allocation2 + $0xc0] sm:$0xf]  ;;  %v3322_v43 = vsel %vm8228_vm3, %v3317_v61, %v9924_v40  ;;  %v8105_v40 = vld [vmem:[#allocation2 + $0xc4] sm:$0xf] }
 0x1b2   : > { %7374 = vmatprep.mubr.bf16.mxu1 %v8017_v35  ;;  %v3349_v35 = vrot.slane %v3347_v58, 4  ;;  %v3331_v58 = vrot.slane %v3329_v36, 5  ;;  %v3415_v59 = vshll.u32 %v8105_v40, 16 }
 0x1b3   : > { %7595 = vmatmul.mubr.bf16.gmra.mrb[8].mxu0 %v6677_v19  ;;  %v3361_v19 = vshll.u32 %v3036_v15, 16  ;;  %v3340_v60 = vor.u32 %v3339_v2, %v3336_v20  ;;  %v3355_v20 = vrot.slane %v3353_v44, 5  ;;  %v3360_v2 = vrot.slane %v3358_v16, 4 }
 0x1b4   : > { %7598 = vmatprep.mubr.bf16.mxu0 %v6678_v25  ;;  %v3350_v41 = vor.u32 %v3349_v35, %v9929_v22  ;;  %v3308_v25 = vsel %vm8228_vm3, %v3303_v9, %v3307_v28  ;;  %v3369_v15 = vrot.slane %v3367_v5, 5  ;;  %v3384_v9 = vrot.slane %v3382_v31, 4  ;;  %v8106_v5 = vld [vmem:[#allocation2 + $0xbc] sm:$0x1] }
 0x1b5   : > { %v3363_v35 = vrot.slane %v3361_v19, 5  ;;  %v6490_v28 = vcombine.low %v3298_v56, %v3308_v25  ;;  %v3332_v48 = vsel %vm8228_vm3, %v3327_v21, %v3331_v58  ;;  %v3406_v16 = vshrl.u32 %v3042_v13, 16 }
 0x1b6   : > { %v3351_v1 = vrot.slane %v3350_v41, 4  ;;  %v3374_v44 = vor.u32 %v3373_v4, %v3369_v15  ;;  %v3409_v19 = vshll.u32 %v3042_v13, 16  ;;  %v3388_v41 = vor.u32 %v3387_v52, %v3384_v9 }
 0x1b7   : > { %v3401_v12 = vshll.u32 %v8106_v5, 16  ;;  %v3408_v58 = vrot.slane %v3406_v16, 4  ;;  %v3417_v42 = vrot.slane %v3415_v59, 5 }
 0x1b8   : > { %v3356_v39 = vsel %vm8228_vm3, %v3351_v1, %v3355_v20  ;;  %v3375_v25 = vrot.slane %v3374_v44, 4  ;;  %v3411_v31 = vrot.slane %v3409_v19, 5  ;;  %v3389_v0 = vrot.slane %v3388_v41, 4 }
 0x1b9   : > { %7375 = vmatmul.mubr.bf16.gmra.mrb[28].mxu1 %v8018_v47  ;;  %v3395_v47 = vshrl.u32 %v8103_v49, 16  ;;  %v3403_v21 = vrot.slane %v3401_v12, 5 }
 0x1ba   : > { %7410 = vmatprep.mubr.bf16.mxu1 %v6488_v63  ;;  %v3341_v63 = vrot.slane %v3340_v60, 4  ;;  %v3419_v60 = vshrl.u32 %v8105_v40, 16  ;;  %v3394_v51 = vsel %vm8228_vm3, %v3389_v0, %v3393_v24 }
 0x1bb   : > { %7599 = vmatmul.mubr.bf16.gmra.mrb[12].mxu0 %v6679_v37  ;;  %v3397_v36 = vrot.slane %v3395_v47, 4  ;;  %v3377_v37 = vshll.u32 %v8104_v34, 16 }
 0x1bc   : > { %7602 = vmatprep.mubr.bf16.mxu0 %v6680_v50  ;;  %v3346_v7 = vsel %vm8228_vm3, %v3341_v63, %v9929_v22  ;;  %v3364_v50 = vor.u32 %v3363_v35, %v3360_v2  ;;  %v3421_v49 = vrot.slane %v3419_v60, 4  ;;  %v8107_v2 = vld [vmem:[#allocation2 + $0xc8] sm:$0x1] }
 0x1bd   : > { %v3398_v32 = vor.u32 %v3397_v36, %v3393_v24  ;;  %v6492_v22 = vcombine.low %v3346_v7, %v3356_v39  ;;  %v3379_v61 = vrot.slane %v3377_v37, 5  ;;  %v3425_v55 = vshll.u32 %v8107_v2, 16 }
 0x1be   : > { %v3365_v56 = vrot.slane %v3364_v50, 4  ;;  %v3422_v20 = vor.u32 %v3421_v49, %v3417_v42 }
 0x1bf   : > { %v3399_v47 = vrot.slane %v3398_v32, 4  ;;  %v3380_v11 = vsel %vm8228_vm3, %v3375_v25, %v3379_v61  ;;  %v3427_v4 = vrot.slane %v3425_v55, 5 }
 0x1c0   : > { %v3370_v6 = vsel %vm8228_vm3, %v3365_v56, %v3369_v15  ;;  %v3423_v15 = vrot.slane %v3422_v20, 4 }
 0x1c1   : > { %7411 = vmatmul.mubr.bf16.vlgmr.msra.gmra.mrb[16].mxu1 %v9757_v53  ;;  %v6491_v53 = vcombine.low %v3322_v43, %v3332_v48  ;;  %v6493_v35 = vcombine.low %v3370_v6, %v3380_v11 }
 0x1c2   : > { %7414 = vmatprep.mubr.bf16.mxu1 %v6490_v28  ;;  %v3428_v9 = vsel %vm8228_vm3, %v3423_v15, %v3427_v4 }
 0x1c3   : > { %7603 = vmatmul.mubr.bf16.gmra.mrb[16].mxu0 %v6681_v54  ;;  %v3412_v54 = vor.u32 %v3411_v31, %v3408_v58 }
 0x1c4   : > { %7606 = vmatprep.mubr.bf16.mxu0 %v6682_v3  ;;  %v3404_v3 = vsel %vm8228_vm3, %v3399_v47, %v3403_v21 }
 0x1c5   : > { %v6494_v63 = vcombine.low %v3394_v51, %v3404_v3  ;;  %v3413_v1 = vrot.slane %v3412_v54, 4 }
 0x1c7   : > { %v3418_v28 = vsel %vm8228_vm3, %v3413_v1, %v3417_v42 }
 0x1c8   : > { %v6495_v46 = vcombine.low %v3418_v28, %v3428_v9 }
 0x1c9   : > { %7415 = vmatmul.mubr.bf16.gmra.mrb[20].mxu1 %v6491_v53 }
 0x1ca   : > { %7418 = vmatprep.mubr.bf16.mxu1 %v6492_v22 }
 0x1cb   : > { %7607 = vmatmul.mubr.bf16.gmra.mrb[20].mxu0 %v6683_v57 }
 0x1cc   : > { %7610 = vmatprep.mubr.bf16.mxu0 %v6684_v23 }
 0x1d1   : > { %7419 = vmatmul.mubr.bf16.gmra.mrb[24].mxu1 %v6493_v35 }
 0x1d2   : > { %7422 = vmatprep.mubr.bf16.mxu1 %v6494_v63 }
 0x1d3   : > { %7611 = vmatmul.mubr.bf16.gmra.mrb[24].mxu0 %v6685_v8 }
 0x1d4   : > { %7614 = vmatprep.mubr.bf16.mxu0 %v6686_v17 }
 0x1d9   : > { %7423 = vmatmul.mubr.bf16.gmra.mrb[28].mxu1 %v6495_v46 }
 0x1db   : > { %7615 = vmatmul.mubr.bf16.gmra.mrb[28].mxu0 %v6687_v14 }
 0x254   : > { %v7348_v10 = vpop.f32.mrb[0].mxu1 }
 0x255   : > { %v2838_v57 = vpop.f32.mrb[1].mxu1 }
 0x256   : > { %v7349_v45 = vpop.f32.mrb[2].mxu1 }
 0x257   : > { %v2841_v29 = vpop.f32.mrb[3].mxu1 }
 0x25c   : > { %v7352_v30 = vpop.f32.mrb[4].mxu1 }
 0x25d   : > { %v2854_v23 = vpop.f32.mrb[5].mxu1 }
 0x25e   : > { %v7353_v52 = vpop.f32.mrb[6].mxu1 }
 0x25f   : > { %v2857_v24 = vpop.f32.mrb[7].mxu1 }
 0x264   : > { %v7356_v38 = vpop.f32.mrb[8].mxu1 }
 0x265   : > { %v2870_v26 = vpop.f32.mrb[9].mxu1 }
 0x266   : > { %v7357_v8 = vpop.f32.mrb[10].mxu1 }
 0x267   : > { %v2873_v36 = vpop.f32.mrb[11].mxu1 }
 0x26c   : > { %v9991_v33 = vpop.f32.mrb[12].mxu1 }
 0x26d   : > { %v9993_v18 = vpop.f32.mrb[13].mxu1 }
 0x26e   : > { %v9995_v17 = vpop.f32.mrb[14].mxu1 }
 0x26f   : > { %v9997_v27 = vpop.f32.mrb[15].mxu1 }
 0x276   : > { %v7588_v62 = vpop.f32.mrb[0].mxu0 }
 0x277   : > { %v7634_v14 = vadd.f32 %v7588_v62, %v7348_v10  ;;  %v5729_v13 = vpop.f32.mrb[1].mxu0 }
 0x278   : > { %v7635_v43 = vadd.f32 %v5729_v13, %v2838_v57  ;;  %v7589_v48 = vpop.f32.mrb[2].mxu0 }
 0x279   : > { %v7636_v34 = vadd.f32 %v7589_v48, %v7349_v45  ;;  %v5732_v37 = vpop.f32.mrb[3].mxu0  ;;  %v6088_v40 = vmul.f32 %v7634_v14, %v7634_v14 }
 0x27a   : > { %v7637_v7 = vadd.f32 %v5732_v37, %v2841_v29  ;;  %v6086_v50 = vmul.f32 %v7635_v43, %v7635_v43 }
 0x27b   : > { %v6868_v39 = vpack.c.bf16 %v7636_v34, %v7634_v14  ;;  %v6089_v12 = vmul.f32 %v7636_v34, %v7636_v34 }
 0x27c   : > { %v6863_v44 = vpack.c.bf16 %v7637_v7, %v7635_v43  ;;  %v6048_v16 = vadd.f32 %v7637_v7, %v7635_v43  ;;  %v6087_v19 = vmul.f32 %v7637_v7, %v7637_v7 }
 0x27d   : > { %6955 = vst [vmem:[%s10004_s23 + $0x8] sm:$0xff] %v6868_v39  }
 0x27e   : > { %6864 = vst [vmem:[%s10004_s23] sm:$0xff] %v6863_v44   ;;  %v6049_v59 = vadd.f32 %v7634_v14, %v6048_v16  ;;  %v6118_v60 = vadd.f32 %v6087_v19, %v6086_v50  ;;  %v7592_v41 = vpop.f32.mrb[4].mxu0 }
 0x27f   : > { %v7638_v32 = vadd.f32 %v7592_v41, %v7352_v30  ;;  %v5745_v5 = vpop.f32.mrb[5].mxu0 }
 0x280   : > { %v6119_v53 = vadd.f32 %v6118_v60, %v6088_v40  ;;  %v7639_v22 = vadd.f32 %v5745_v5, %v2854_v23  ;;  %v6050_v56 = vadd.f32 %v7636_v34, %v6049_v59  ;;  %v7593_v25 = vpop.f32.mrb[6].mxu0 }
 0x281   : > { %v7640_v61 = vadd.f32 %v7593_v25, %v7353_v52  ;;  %v5748_v58 = vpop.f32.mrb[7].mxu0  ;;  %v6092_v20 = vmul.f32 %v7638_v32, %v7638_v32 }
 0x282   : > { %v6051_v31 = vadd.f32 %v7639_v22, %v6050_v56  ;;  %v6090_v42 = vmul.f32 %v7639_v22, %v7639_v22  ;;  %v6120_v49 = vadd.f32 %v6119_v53, %v6089_v12  ;;  %v7641_v0 = vadd.f32 %v5748_v58, %v2857_v24 }
 0x283   : > { %v6878_v47 = vpack.c.bf16 %v7640_v61, %v7638_v32  ;;  %v6093_v63 = vmul.f32 %v7640_v61, %v7640_v61 }
 0x284   : > { %v6121_v21 = vadd.f32 %v6120_v49, %v6090_v42  ;;  %v6873_v6 = vpack.c.bf16 %v7641_v0, %v7639_v22  ;;  %v6052_v11 = vadd.f32 %v7641_v0, %v6051_v31  ;;  %v6091_v54 = vmul.f32 %v7641_v0, %v7641_v0 }
 0x285   : > { %6957 = vst [vmem:[%s10004_s23 + $0x18] sm:$0xff] %v6878_v47  }
 0x286   : > { %6956 = vst [vmem:[%s10004_s23 + $0x10] sm:$0xff] %v6873_v6   ;;  %v6053_v2 = vadd.f32 %v7638_v32, %v6052_v11  ;;  %v6122_v55 = vadd.f32 %v6121_v21, %v6091_v54  ;;  %v7596_v51 = vpop.f32.mrb[8].mxu0 }
 0x287   : > { %v7642_v3 = vadd.f32 %v7596_v51, %v7356_v38  ;;  %v5761_v35 = vpop.f32.mrb[9].mxu0 }
 0x288   : > { %v6123_v1 = vadd.f32 %v6122_v55, %v6092_v20  ;;  %v7643_v15 = vadd.f32 %v5761_v35, %v2870_v26  ;;  %v6054_v4 = vadd.f32 %v7640_v61, %v6053_v2  ;;  %v7597_v28 = vpop.f32.mrb[10].mxu0 }
 0x289   : > { %v7644_v9 = vadd.f32 %v7597_v28, %v7357_v8  ;;  %v5764_v46 = vpop.f32.mrb[11].mxu0  ;;  %v6096_v38 = vmul.f32 %v7642_v3, %v7642_v3 }
 0x28a   : > { %v6055_v10 = vadd.f32 %v7643_v15, %v6054_v4  ;;  %v6094_v57 = vmul.f32 %v7643_v15, %v7643_v15  ;;  %v6124_v45 = vadd.f32 %v6123_v1, %v6093_v63  ;;  %v7645_v29 = vadd.f32 %v5764_v46, %v2873_v36 }
 0x28b   : > { %v6888_v30 = vpack.c.bf16 %v7644_v9, %v7642_v3  ;;  %v6097_v8 = vmul.f32 %v7644_v9, %v7644_v9 }
 0x28c   : > { %v6125_v23 = vadd.f32 %v6124_v45, %v6094_v57  ;;  %v6883_v52 = vpack.c.bf16 %v7645_v29, %v7643_v15  ;;  %v6056_v24 = vadd.f32 %v7645_v29, %v6055_v10  ;;  %v6095_v62 = vmul.f32 %v7645_v29, %v7645_v29 }
 0x28d   : > { %6959 = vst [vmem:[%s10004_s23 + $0x28] sm:$0xff] %v6888_v30  }
 0x28e   : > { %6958 = vst [vmem:[%s10004_s23 + $0x20] sm:$0xff] %v6883_v52   ;;  %v6057_v14 = vadd.f32 %v7642_v3, %v6056_v24  ;;  %v6126_v13 = vadd.f32 %v6125_v23, %v6095_v62  ;;  %v7600_v26 = vpop.f32.mrb[12].mxu0 }
 0x28f   : > { %v7646_v43 = vadd.f32 %v7600_v26, %v9991_v33  ;;  %v5777_v48 = vpop.f32.mrb[13].mxu0 }
 0x290   : > { %v6127_v34 = vadd.f32 %v6126_v13, %v6096_v38  ;;  %v7647_v37 = vadd.f32 %v5777_v48, %v9993_v18  ;;  %v6058_v7 = vadd.f32 %v7644_v9, %v6057_v14  ;;  %v7601_v36 = vpop.f32.mrb[14].mxu0 }
 0x291   : > { %v7648_v39 = vadd.f32 %v7601_v36, %v9995_v17  ;;  %v5780_v50 = vpop.f32.mrb[15].mxu0  ;;  %v6100_v22 = vmul.f32 %v7646_v43, %v7646_v43 }
 0x292   : > { %v6059_v44 = vadd.f32 %v7647_v37, %v6058_v7  ;;  %v6098_v16 = vmul.f32 %v7647_v37, %v7647_v37  ;;  %v6128_v19 = vadd.f32 %v6127_v34, %v6097_v8  ;;  %v7649_v40 = vadd.f32 %v5780_v50, %v9997_v27 }
 0x293   : > { %v6898_v60 = vpack.c.bf16 %v7648_v39, %v7646_v43  ;;  %v6101_v31 = vmul.f32 %v7648_v39, %v7648_v39 }
 0x294   : > { %v7412_v59 = vpop.f32.mrb[16].mxu1  ;;  %v6129_v41 = vadd.f32 %v6128_v19, %v6098_v16  ;;  %v6893_v32 = vpack.c.bf16 %v7649_v40, %v7647_v37  ;;  %v6060_v5 = vadd.f32 %v7649_v40, %v6059_v44  ;;  %v6099_v12 = vmul.f32 %v7649_v40, %v7649_v40 }
 0x295   : > { %v3656_v33 = vpop.f32.mrb[17].mxu1  ;;  %6961 = vst [vmem:[%s10004_s23 + $0x38] sm:$0xff] %v6898_v60  }
 0x296   : > { %v7413_v18 = vpop.f32.mrb[18].mxu1  ;;  %6960 = vst [vmem:[%s10004_s23 + $0x30] sm:$0xff] %v6893_v32   ;;  %v6061_v17 = vadd.f32 %v7646_v43, %v6060_v5  ;;  %v6130_v56 = vadd.f32 %v6129_v41, %v6099_v12  ;;  %v7604_v25 = vpop.f32.mrb[16].mxu0 }
 0x297   : > { %v3659_v53 = vpop.f32.mrb[19].mxu1  ;;  %v7650_v61 = vadd.f32 %v7604_v25, %v7412_v59  ;;  %v5793_v58 = vpop.f32.mrb[17].mxu0 }
 0x298   : > { %v6131_v42 = vadd.f32 %v6130_v56, %v6100_v22  ;;  %v7651_v27 = vadd.f32 %v5793_v58, %v3656_v33  ;;  %v6062_v49 = vadd.f32 %v7648_v39, %v6061_v17  ;;  %v7605_v0 = vpop.f32.mrb[18].mxu0 }
 0x299   : > { %v7652_v47 = vadd.f32 %v7605_v0, %v7413_v18  ;;  %v5796_v21 = vpop.f32.mrb[19].mxu0  ;;  %v6104_v28 = vmul.f32 %v7650_v61, %v7650_v61 }
 0x29a   : > { %v6063_v6 = vadd.f32 %v7651_v27, %v6062_v49  ;;  %v6102_v11 = vmul.f32 %v7651_v27, %v7651_v27  ;;  %v6132_v54 = vadd.f32 %v6131_v42, %v6101_v31  ;;  %v7653_v20 = vadd.f32 %v5796_v21, %v3659_v53 }
 0x29b   : > { %v6908_v55 = vpack.c.bf16 %v7652_v47, %v7650_v61  ;;  %v6105_v29 = vmul.f32 %v7652_v47, %v7652_v47 }
 0x29c   : > { %v7416_v2 = vpop.f32.mrb[20].mxu1  ;;  %v6133_v3 = vadd.f32 %v6132_v54, %v6102_v11  ;;  %v6903_v35 = vpack.c.bf16 %v7653_v20, %v7651_v27  ;;  %v6064_v63 = vadd.f32 %v7653_v20, %v6063_v6  ;;  %v6103_v1 = vmul.f32 %v7653_v20, %v7653_v20 }
 0x29d   : > { %v3672_v51 = vpop.f32.mrb[21].mxu1  ;;  %6963 = vst [vmem:[%s10004_s23 + $0x48] sm:$0xff] %v6908_v55  }
 0x29e   : > { %v7417_v15 = vpop.f32.mrb[22].mxu1  ;;  %6962 = vst [vmem:[%s10004_s23 + $0x40] sm:$0xff] %v6903_v35   ;;  %v6065_v9 = vadd.f32 %v7650_v61, %v6064_v63  ;;  %v6134_v46 = vadd.f32 %v6133_v3, %v6103_v1  ;;  %v7608_v10 = vpop.f32.mrb[20].mxu0 }
 0x29f   : > { %v3675_v4 = vpop.f32.mrb[23].mxu1  ;;  %v7654_v57 = vadd.f32 %v7608_v10, %v7416_v2  ;;  %v5809_v45 = vpop.f32.mrb[21].mxu0 }
 0x2a0   : > { %v6135_v30 = vadd.f32 %v6134_v46, %v6104_v28  ;;  %v7655_v23 = vadd.f32 %v5809_v45, %v3672_v51  ;;  %v6066_v52 = vadd.f32 %v7652_v47, %v6065_v9  ;;  %v7609_v24 = vpop.f32.mrb[22].mxu0 }
 0x2a1   : > { %v7656_v62 = vadd.f32 %v7609_v24, %v7417_v15  ;;  %v5812_v38 = vpop.f32.mrb[23].mxu0  ;;  %v6108_v16 = vmul.f32 %v7654_v57, %v7654_v57 }
 0x2a2   : > { %v6067_v14 = vadd.f32 %v7655_v23, %v6066_v52  ;;  %v6106_v13 = vmul.f32 %v7655_v23, %v7655_v23  ;;  %v6136_v26 = vadd.f32 %v6135_v30, %v6105_v29  ;;  %v7657_v43 = vadd.f32 %v5812_v38, %v3675_v4 }
 0x2a3   : > { %v6918_v8 = vpack.c.bf16 %v7656_v62, %v7654_v57  ;;  %v6109_v41 = vmul.f32 %v7656_v62, %v7656_v62 }
 0x2a4   : > { %v7420_v48 = vpop.f32.mrb[24].mxu1  ;;  %v6137_v37 = vadd.f32 %v6136_v26, %v6106_v13  ;;  %v6913_v7 = vpack.c.bf16 %v7657_v43, %v7655_v23  ;;  %v6068_v36 = vadd.f32 %v7657_v43, %v6067_v14  ;;  %v6107_v39 = vmul.f32 %v7657_v43, %v7657_v43 }
 0x2a5   : > { %v3688_v34 = vpop.f32.mrb[25].mxu1  ;;  %6965 = vst [vmem:[%s10004_s23 + $0x58] sm:$0xff] %v6918_v8  }
 0x2a6   : > { %v7421_v50 = vpop.f32.mrb[26].mxu1  ;;  %6964 = vst [vmem:[%s10004_s23 + $0x50] sm:$0xff] %v6913_v7   ;;  %v6069_v19 = vadd.f32 %v7654_v57, %v6068_v36  ;;  %v6138_v40 = vadd.f32 %v6137_v37, %v6107_v39  ;;  %v7612_v59 = vpop.f32.mrb[24].mxu0 }
 0x2a7   : > { %v3691_v44 = vpop.f32.mrb[27].mxu1  ;;  %v7658_v60 = vadd.f32 %v7612_v59, %v7420_v48  ;;  %v5825_v33 = vpop.f32.mrb[25].mxu0 }
 0x2a8   : > { %v6139_v32 = vadd.f32 %v6138_v40, %v6108_v16  ;;  %v7659_v5 = vadd.f32 %v5825_v33, %v3688_v34  ;;  %v6070_v12 = vadd.f32 %v7656_v62, %v6069_v19  ;;  %v7613_v18 = vpop.f32.mrb[26].mxu0 }
 0x2a9   : > { %v7660_v53 = vadd.f32 %v7613_v18, %v7421_v50  ;;  %v5828_v22 = vpop.f32.mrb[27].mxu0  ;;  %v6112_v11 = vmul.f32 %v7658_v60, %v7658_v60 }
 0x2aa   : > { %v6071_v17 = vadd.f32 %v7659_v5, %v6070_v12  ;;  %v6110_v56 = vmul.f32 %v7659_v5, %v7659_v5  ;;  %v6140_v25 = vadd.f32 %v6139_v32, %v6109_v41  ;;  %v7661_v61 = vadd.f32 %v5828_v22, %v3691_v44 }
 0x2ab   : > { %v6928_v31 = vpack.c.bf16 %v7660_v53, %v7658_v60  ;;  %v6113_v3 = vmul.f32 %v7660_v53, %v7660_v53 }
 0x2ac   : > { %v7424_v58 = vpop.f32.mrb[28].mxu1  ;;  %v6141_v27 = vadd.f32 %v6140_v25, %v6110_v56  ;;  %v6923_v49 = vpack.c.bf16 %v7661_v61, %v7659_v5  ;;  %v6072_v0 = vadd.f32 %v7661_v61, %v6071_v17  ;;  %v6111_v47 = vmul.f32 %v7661_v61, %v7661_v61 }
 0x2ad   : > { %v3704_v42 = vpop.f32.mrb[29].mxu1  ;;  %6967 = vst [vmem:[%s10004_s23 + $0x68] sm:$0xff] %v6928_v31  }
 0x2ae   : > { %v7425_v21 = vpop.f32.mrb[30].mxu1  ;;  %6966 = vst [vmem:[%s10004_s23 + $0x60] sm:$0xff] %v6923_v49   ;;  %v6073_v54 = vadd.f32 %v7658_v60, %v6072_v0  ;;  %v6142_v20 = vadd.f32 %v6141_v27, %v6111_v47  ;;  %v7616_v2 = vpop.f32.mrb[28].mxu0 }
 0x2af   : > { %v3707_v6 = vpop.f32.mrb[31].mxu1  ;;  %v7662_v55 = vadd.f32 %v7616_v2, %v7424_v58  ;;  %v5841_v51 = vpop.f32.mrb[29].mxu0 }
 0x2b0   : > { %v6143_v35 = vadd.f32 %v6142_v20, %v6112_v11  ;;  %v7663_v63 = vadd.f32 %v5841_v51, %v3704_v42  ;;  %v6074_v1 = vadd.f32 %v7660_v53, %v6073_v54  ;;  %v7617_v15 = vpop.f32.mrb[30].mxu0 }
 0x2b1   : > { %v7664_v4 = vadd.f32 %v7617_v15, %v7425_v21  ;;  %v5844_v28 = vpop.f32.mrb[31].mxu0  ;;  %v6116_v24 = vmul.f32 %v7662_v55, %v7662_v55 }
 0x2b2   : > { %v6075_v9 = vadd.f32 %v7663_v63, %v6074_v1  ;;  %v6114_v46 = vmul.f32 %v7663_v63, %v7663_v63  ;;  %v6144_v10 = vadd.f32 %v6143_v35, %v6113_v3  ;;  %v7665_v57 = vadd.f32 %v5844_v28, %v3707_v6 }
 0x2b3   : > { %v6938_v45 = vpack.c.bf16 %v7664_v4, %v7662_v55  ;;  %v6117_v14 = vmul.f32 %v7664_v4, %v7664_v4 }
 0x2b4   : > { %v6145_v29 = vadd.f32 %v6144_v10, %v6114_v46  ;;  %v6933_v30 = vpack.c.bf16 %v7665_v57, %v7663_v63  ;;  %v6076_v23 = vadd.f32 %v7665_v57, %v6075_v9  ;;  %v6115_v52 = vmul.f32 %v7665_v57, %v7665_v57 }
 0x2b5   : > { %6969 = vst [vmem:[%s10004_s23 + $0x78] sm:$0xff] %v6938_v45  }
 0x2b6   : > { %6968 = vst [vmem:[%s10004_s23 + $0x70] sm:$0xff] %v6933_v30   ;;  %v6077_v62 = vadd.f32 %v7662_v55, %v6076_v23  ;;  %v6146_v38 = vadd.f32 %v6145_v29, %v6115_v52 }
 0x2b8   : > { %v6078_v13 = vadd.f32 %v7664_v4, %v6077_v62  ;;  %v6147_v26 = vadd.f32 %v6146_v38, %v6116_v24 }
 0x2ba   : > { %v6079_v43 = vrot.slane %v6078_v13, 4  ;;  %v6148_v48 = vadd.f32 %v6147_v26, %v6117_v14 }
 0x2bc   : > { %v6080_v8 = vadd.f32 %v6079_v43, %v6078_v13  ;;  %v6149_v34 = vrot.slane %v6148_v48, 4 }
 0x2be   : > { %v6081_v37 = vrot.slane %v6080_v8, 2  ;;  %v6150_v7 = vadd.f32 %v6149_v34, %v6148_v48 }
 0x2c0   : > { %v6082_v36 = vadd.f32 %v6081_v37, %v6080_v8  ;;  %v6151_v39 = vrot.slane %v6150_v7, 2 }
 0x2c2   : > { %v6083_v50 = vrot.slane %v6082_v36, 1  ;;  %v6152_v44 = vadd.f32 %v6151_v39, %v6150_v7 }
 0x2c4   : > { %v6084_v16 = vadd.f32 %v6083_v50, %v6082_v36  ;;  %v6153_v19 = vrot.slane %v6152_v44, 1 }
 0x2c6   : > { %6085 = vst [vmem:[%s263_s28] sm:$0x1] %v6084_v16  ;;  %v6154_v40 = vadd.f32 %v6153_v19, %v6152_v44 }
 0x2c8   : > { %6155 = vst [vmem:[%s263_s28 + $0x1] sm:$0x1] %v6154_v40 }
 0x2c9 PF: > { %s16_s18 = sadd.s32 1, %s8114_s18  }
 0x2ca   : > { %p13_p4 = scmp.ge.s32.totalorder %s16_s18, 4  }
 0x2cc   :  { %15 = sbr.rel (!%p13_p4) target bundleno = 1 (0x1), region = 95 }

</bundles_post_ra>
